<compile_context>
chip_gen: v7x
topology: tpu7x:2x2x1
jax: 0.10.0
libtpu: 0.0.40
codegen_flags: <defaults>
</compile_context>

<pallas_src>
import math

import jax
import jax.numpy as jnp
from jax.experimental import pallas as pl
from jax.experimental.pallas import tpu as pltpu

LN_EPS = 1e-5        # torch nn.LayerNorm default
NEG_INF = -1e30      # additive mask value (~ -inf after exp underflow)


# ----------------------------- in-kernel helpers ----------------------------

def _layernorm(x, g, b):
    mu = jnp.mean(x, axis=-1, keepdims=True)
    var = jnp.mean((x - mu) ** 2, axis=-1, keepdims=True)
    return (x - mu) * jax.lax.rsqrt(var + LN_EPS) * g + b


def _gelu(h):
    # TODO(synk): torch nn.GELU default is exact erf-GELU; tanh approximation used here.
    return 0.5 * h * (1.0 + jnp.tanh(0.7978845608028654 * (h + 0.044715 * h * h * h)))


def _attend(q, k, v, key_bias, wo, bo, H, Dh):
    """Multi-head attention core on already-projected q/k/v.

    q: (Sq, H*Dh) (already scaled); k, v: (Sk, H*Dh);
    key_bias: additive, broadcastable to (Sq, Sk) -- (1, Sk) pad bias or (Sq, Sk) causal.
    Returns attention output after the flat (H*Dh, E) projection: (Sq, E).
    """
    ctx = []
    for h in range(H):                      # unrolled; MXU serializes per-head anyway
        sl = slice(h * Dh, (h + 1) * Dh)
        s = jax.lax.dot_general(q[:, sl], k[:, sl],
                                (((1,), (1,)), ((), ())),
                                preferred_element_type=jnp.float32)   # (Sq, Sk)
        s = s + key_bias
        m = jnp.max(s, axis=-1, keepdims=True)
        e = jnp.exp(s - m)
        w = e * pl.reciprocal(jnp.sum(e, axis=-1, keepdims=True), approx=True)
        ctx.append(jnp.dot(w, v[:, sl], preferred_element_type=jnp.float32))
    ctx = jnp.concatenate(ctx, axis=-1)                               # (Sq, H*Dh)
    return jnp.dot(ctx, wo, preferred_element_type=jnp.float32) + bo


# ----------------------------- Pallas kernels -------------------------------

def make_encoder_block_kernel(H, Dh, final_ln):
    """Fused LN -> self-attn -> +res -> LN -> MLP -> +res [-> final encoder LN]."""
    scale = 1.0 / math.sqrt(Dh)
    HD = H * Dh

    def kernel(x_ref, pad_ref, ln1_g, ln1_b, wqkv, wo, bo,
               ln2_g, ln2_b, w1, b1, w2, b2, *rest):
        if final_ln:
            lnf_g, lnf_b, o_ref = rest
        else:
            (o_ref,) = rest

        x = x_ref[...]                       # (Ss, E)
        key_bias = pad_ref[...]              # (1, Ss) additive pad bias over keys

        # ---- self-attention (fused QKV matmul, flat Wo) ----
        xn = _layernorm(x, ln1_g[...], ln1_b[...])
        qkv = jnp.dot(xn, wqkv[...], preferred_element_type=jnp.float32)  # (Ss, 3*HD)
        x = x + _attend(qkv[:, :HD] * scale, qkv[:, HD:2 * HD], qkv[:, 2 * HD:],
                        key_bias, wo[...], bo[...], H, Dh)

        # ---- MLP ----
        xn = _layernorm(x, ln2_g[...], ln2_b[...])
        h = jnp.dot(xn, w1[...], preferred_element_type=jnp.float32) + b1[...]
        h = _gelu(h)
        x = x + jnp.dot(h, w2[...], preferred_element_type=jnp.float32) + b2[...]

        if final_ln:
            x = _layernorm(x, lnf_g[...], lnf_b[...])
        o_ref[...] = x

    return kernel


def make_decoder_block_kernel(H, Dh):
    """Fused LN -> causal self-attn -> +res -> LN -> cross-attn -> +res -> LN -> MLP -> +res."""
    scale = 1.0 / math.sqrt(Dh)
    HD = H * Dh

    def kernel(x_ref, enc_ref, causal_ref, pad_ref,
               ln1_g, ln1_b, wqkv1, wo1, bo1,
               ln2_g, ln2_b, wq2, wkv2, wo2, bo2,
               ln3_g, ln3_b, w1, b1, w2, b2, o_ref):
        x = x_ref[...]                       # (Sd, E)
        enc = enc_ref[...]                   # (Ss, E) encoder output
        causal_bias = causal_ref[...]        # (Sd, Sd), built once in the wrapper
        pad_bias = pad_ref[...]              # (1, Ss) source-pad bias

        # ---- masked self-attention ----
        xn = _layernorm(x, ln1_g[...], ln1_b[...])
        qkv = jnp.dot(xn, wqkv1[...], preferred_element_type=jnp.float32)  # (Sd, 3*HD)
        x = x + _attend(qkv[:, :HD] * scale, qkv[:, HD:2 * HD], qkv[:, 2 * HD:],
                        causal_bias, wo1[...], bo1[...], H, Dh)

        # ---- cross-attention (Q from decoder stream, K/V from encoder output) ----
        xn = _layernorm(x, ln2_g[...], ln2_b[...])
        q = jnp.dot(xn, wq2[...], preferred_element_type=jnp.float32) * scale  # (Sd, HD)
        kv = jnp.dot(enc, wkv2[...], preferred_element_type=jnp.float32)       # (Ss, 2*HD)
        x = x + _attend(q, kv[:, :HD], kv[:, HD:],
                        pad_bias, wo2[...], bo2[...], H, Dh)

        # ---- MLP ----
        xn = _layernorm(x, ln3_g[...], ln3_b[...])
        h = jnp.dot(xn, w1[...], preferred_element_type=jnp.float32) + b1[...]
        h = _gelu(h)
        x = x + jnp.dot(h, w2[...], preferred_element_type=jnp.float32) + b2[...]

        o_ref[...] = x

    return kernel


def head_kernel(x_ref, g_ref, b_ref, w_ref, bias_ref, o_ref):
    # fused final decoder LayerNorm -> classification Linear
    xn = _layernorm(x_ref[...], g_ref[...], b_ref[...])
    o_ref[...] = jnp.dot(xn, w_ref[...],
                         preferred_element_type=jnp.float32) + bias_ref[...]


# ----------------------------- wrappers --------------------------------------

def _const_spec(shape):
    """Grid-invariant operand: block index always 0 -> Pallas skips the re-DMA."""
    zeros = (0,) * len(shape)
    return pl.BlockSpec(tuple(shape), lambda i, _z=zeros: _z)


def encoder_block_p(x, pad_bias, blk, ln_f, *, H, Dh):
    B, Ss, E = x.shape
    final_ln = ln_f is not None
    a, m = blk["attn"], blk["mlp"]

    args = [x, pad_bias,
            blk["ln1_g"], blk["ln1_b"], a["wqkv"], a["wo"], a["bo"],
            blk["ln2_g"], blk["ln2_b"], m["w1"], m["b1"], m["w2"], m["b2"]]
    if final_ln:
        args += [ln_f[0], ln_f[1]]

    in_specs = [pl.BlockSpec((None, Ss, E), lambda i: (i, 0, 0)),
                pl.BlockSpec((None, 1, Ss), lambda i: (i, 0, 0))]
    in_specs += [_const_spec(w.shape) for w in args[2:]]

    return pl.pallas_call(
        make_encoder_block_kernel(H, Dh, final_ln),
        out_shape=jax.ShapeDtypeStruct((B, Ss, E), jnp.float32),
        grid=(B,),
        in_specs=in_specs,
        out_specs=pl.BlockSpec((None, Ss, E), lambda i: (i, 0, 0)),
        compiler_params=pltpu.CompilerParams(dimension_semantics=("parallel",)),
    )(*args)


def decoder_block_p(x, enc, causal_bias, pad_bias, blk, *, H, Dh):
    B, Sd, E = x.shape
    Ss = enc.shape[1]
    sa, ca, m = blk["self_attn"], blk["cross_attn"], blk["mlp"]

    args = [x, enc, causal_bias, pad_bias,
            blk["ln1_g"], blk["ln1_b"], sa["wqkv"], sa["wo"], sa["bo"],
            blk["ln2_g"], blk["ln2_b"], ca["wq"], ca["wkv"], ca["wo"], ca["bo"],
            blk["ln3_g"], blk["ln3_b"], m["w1"], m["b1"], m["w2"], m["b2"]]

    in_specs = [pl.BlockSpec((None, Sd, E), lambda i: (i, 0, 0)),
                pl.BlockSpec((None, Ss, E), lambda i: (i, 0, 0)),
                _const_spec(causal_bias.shape),
                pl.BlockSpec((None, 1, Ss), lambda i: (i, 0, 0))]
    in_specs += [_const_spec(w.shape) for w in args[4:]]

    return pl.pallas_call(
        make_decoder_block_kernel(H, Dh),
        out_shape=jax.ShapeDtypeStruct((B, Sd, E), jnp.float32),
        grid=(B,),
        in_specs=in_specs,
        out_specs=pl.BlockSpec((None, Sd, E), lambda i: (i, 0, 0)),
        compiler_params=pltpu.CompilerParams(dimension_semantics=("parallel",)),
    )(*args)


def head_p(x, g, b, w, bias):
    B, Sd, E = x.shape
    V = w.shape[1]
    # TODO(synk): tile the vocab dimension with a "parallel" grid axis (and set
    # vmem_limit_bytes) once vocab_size is scaled; whole (E, V) fits VMEM trivially here.
    in_specs = [pl.BlockSpec((None, Sd, E), lambda i: (i, 0, 0)),
                _const_spec(g.shape), _const_spec(b.shape),
                _const_spec(w.shape), _const_spec(bias.shape)]
    return pl.pallas_call(
        head_kernel,
        out_shape=jax.ShapeDtypeStruct((B, Sd, V), jnp.float32),
        grid=(B,),
        in_specs=in_specs,
        out_specs=pl.BlockSpec((None, Sd, V), lambda i: (i, 0, 0)),
        compiler_params=pltpu.CompilerParams(dimension_semantics=("parallel",)),
    )(x, g, b, w, bias)


# ----------------------------- parameters ------------------------------------

def init_params(key, vocab_size, max_seq, E, Dh, H, Dm, num_blocks):
    keys = iter(jax.random.split(key, 1024))

    def nrm(shape, std):
        return std * jax.random.normal(next(keys), shape, jnp.float32)

    def xavier(shape):  # nn.init.xavier_normal_ (std symmetric in fan_in/fan_out)
        fan_in, fan_out = shape[-2], shape[-1]
        return nrm(shape, math.sqrt(2.0 / (fan_in + fan_out)))

    def head_stack():
        # per-head (E -> Dh) Linear (bias=False), heads concatenated along the out dim
        return jnp.concatenate([xavier((E, Dh)) for _ in range(H)], axis=1)  # (E, H*Dh)

    def self_attn_params():
        wq, wk, wv = head_stack(), head_stack(), head_stack()
        return dict(wqkv=jnp.concatenate([wq, wk, wv], axis=1),   # (E, 3*H*Dh)
                    wo=xavier((H * Dh, E)),
                    bo=jnp.zeros((1, E), jnp.float32))

    def cross_attn_params():
        wq, wk, wv = head_stack(), head_stack(), head_stack()
        return dict(wq=wq,                                        # (E, H*Dh)
                    wkv=jnp.concatenate([wk, wv], axis=1),        # (E, 2*H*Dh)
                    wo=xavier((H * Dh, E)),
                    bo=jnp.zeros((1, E), jnp.float32))

    def mlp_params():
        return dict(w1=xavier((E, Dm)), b1=jnp.zeros((1, Dm), jnp.float32),
                    w2=xavier((Dm, E)), b2=jnp.zeros((1, E), jnp.float32))

    def ln():
        return jnp.ones((1, E), jnp.float32), jnp.zeros((1, E), jnp.float32)

    emb_std = 1.0 / math.sqrt(2.0 * E)
    params = dict(
        token_emb=nrm((vocab_size, E), emb_std),
        pos_emb=nrm((max_seq, E), emb_std),
        encoder=[], decoder=[],
        cls_w=xavier((E, vocab_size)),
        cls_b=jnp.zeros((1, vocab_size), jnp.float32),
    )
    for _ in range(num_blocks):
        g1, b1 = ln(); g2, b2 = ln()
        params["encoder"].append(dict(ln1_g=g1, ln1_b=b1, attn=self_attn_params(),
                                      ln2_g=g2, ln2_b=b2, mlp=mlp_params()))
    for _ in range(num_blocks):
        g1, b1 = ln(); g2, b2 = ln(); g3, b3 = ln()
        params["decoder"].append(dict(ln1_g=g1, ln1_b=b1, self_attn=self_attn_params(),
                                      ln2_g=g2, ln2_b=b2, cross_attn=cross_attn_params(),
                                      ln3_g=g3, ln3_b=b3, mlp=mlp_params()))
    params["ln_enc_g"], params["ln_enc_b"] = ln()
    params["ln_dec_g"], params["ln_dec_b"] = ln()
    return params


# ----------------------------- forward ----------------------------------------

def make_forward(num_heads, dim_head, token_id_pad):
    H, Dh, PAD = num_heads, dim_head, token_id_pad

    def forward(params, tokens_source, tokens_destination):
        B, Ss = tokens_source.shape
        _, Sd = tokens_destination.shape

        # Additive source-pad bias over keys (encoder self-attn and cross-attn).
        pad_bias = jnp.where(tokens_source == PAD, NEG_INF, 0.0)
        pad_bias = pad_bias.astype(jnp.float32).reshape(B, 1, Ss)

        # Batch-invariant causal bias, built once and passed with a constant index_map.
        row = jax.lax.broadcasted_iota(jnp.int32, (Sd, Sd), 0)
        col = jax.lax.broadcasted_iota(jnp.int32, (Sd, Sd), 1)
        causal_bias = jnp.where(row >= col, 0.0, NEG_INF).astype(jnp.float32)

        # ----- encoder (token/pos embedding gather stays in plain JAX) -----
        x_enc = jnp.take(params["token_emb"], tokens_source, axis=0) \
            + params["pos_emb"][:Ss][None]
        n_enc = len(params["encoder"])
        for idx, blk in enumerate(params["encoder"]):
            # final encoder LayerNorm is folded into the last block's kernel
            ln_f = (params["ln_enc_g"], params["ln_enc_b"]) if idx == n_enc - 1 else None
            x_enc = encoder_block_p(x_enc, pad_bias, blk, ln_f, H=H, Dh=Dh)

        # ----- decoder -----
        x_dec = jnp.take(params["token_emb"], tokens_destination, axis=0) \
            + params["pos_emb"][:Sd][None]
        for blk in params["decoder"]:
            x_dec = decoder_block_p(x_dec, x_enc, causal_bias, pad_bias, blk, H=H, Dh=Dh)

        # Final decoder LayerNorm fused with the classification head.
        logits = head_p(x_dec, params["ln_dec_g"], params["ln_dec_b"],
                        params["cls_w"], params["cls_b"])
        return logits

    return jax.jit(forward)


# ----------------------------- main --------------------------------------------

if __name__ == "__main__":
    vocab_size = 64
    max_sequence_length = 16
    dim_embedding = 32
    dim_head = 8
    num_heads = 4
    dim_mlp = 64
    num_blocks = 2
    token_id_bos, token_id_eos, token_id_pad = 1, 2, 0

    B, S_src, S_dst = 2, 8, 8

    key = jax.random.PRNGKey(0)
    k_params, k_src, k_dst = jax.random.split(key, 3)

    params = init_params(k_params, vocab_size, max_sequence_length,
                         dim_embedding, dim_head, num_heads, dim_mlp, num_blocks)

    tokens_source = jax.random.randint(k_src, (B, S_src), 3, vocab_size,
                                       dtype=jnp.int32)
    tokens_source = tokens_source.at[:, -2:].set(token_id_pad)   # some padding
    tokens_destination = jax.random.randint(k_dst, (B, S_dst), 3, vocab_size,
                                            dtype=jnp.int32)
    tokens_destination = tokens_destination.at[:, 0].set(token_id_bos)

    forward = make_forward(num_heads, dim_head, token_id_pad)
    logits = forward(params, tokens_source, tokens_destination)
    logits = jax.block_until_ready(logits)

    assert logits.shape == (B, S_dst, vocab_size), logits.shape
    assert bool(jnp.all(jnp.isfinite(logits)))
    print("KERNEL_OK")
</pallas_src>

<mosaic_0001>
module attributes {stable_mosaic.version = 11 : i64} {
  func.func @kernel(%arg0: i32, %arg1: memref<1x8x32xf32, #tpu.memory_space<vmem>>, %arg2: memref<1x1x8xf32, #tpu.memory_space<vmem>>, %arg3: memref<1x32xf32, #tpu.memory_space<vmem>>, %arg4: memref<1x32xf32, #tpu.memory_space<vmem>>, %arg5: memref<32x96xf32, #tpu.memory_space<vmem>>, %arg6: memref<32x32xf32, #tpu.memory_space<vmem>>, %arg7: memref<1x32xf32, #tpu.memory_space<vmem>>, %arg8: memref<1x32xf32, #tpu.memory_space<vmem>>, %arg9: memref<1x32xf32, #tpu.memory_space<vmem>>, %arg10: memref<32x64xf32, #tpu.memory_space<vmem>>, %arg11: memref<1x64xf32, #tpu.memory_space<vmem>>, %arg12: memref<64x32xf32, #tpu.memory_space<vmem>>, %arg13: memref<1x32xf32, #tpu.memory_space<vmem>>, %arg14: memref<1x8x32xf32, #tpu.memory_space<vmem>>) attributes {dimension_semantics = [#tpu.dimension_semantics<parallel>], iteration_bounds = array<i64: 2>, scalar_prefetch = 0 : i64, scratch_operands = 0 : i64, tpu.core_type = #tpu.core_type<tc>, window_params = [{transform_indices = @transform_0, window_bounds = array<i64: 1, 8, 32>}, {transform_indices = @transform_1, window_bounds = array<i64: 1, 1, 8>}, {pipeline_mode = #tpu.pipeline_mode<synchronous>, transform_indices = @transform_2, window_bounds = array<i64: 1, 32>}, {pipeline_mode = #tpu.pipeline_mode<synchronous>, transform_indices = @transform_3, window_bounds = array<i64: 1, 32>}, {pipeline_mode = #tpu.pipeline_mode<synchronous>, transform_indices = @transform_4, window_bounds = array<i64: 32, 96>}, {pipeline_mode = #tpu.pipeline_mode<synchronous>, transform_indices = @transform_5, window_bounds = array<i64: 32, 32>}, {pipeline_mode = #tpu.pipeline_mode<synchronous>, transform_indices = @transform_6, window_bounds = array<i64: 1, 32>}, {pipeline_mode = #tpu.pipeline_mode<synchronous>, transform_indices = @transform_7, window_bounds = array<i64: 1, 32>}, {pipeline_mode = #tpu.pipeline_mode<synchronous>, transform_indices = @transform_8, window_bounds = array<i64: 1, 32>}, {pipeline_mode = #tpu.pipeline_mode<synchronous>, transform_indices = @transform_9, window_bounds = array<i64: 32, 64>}, {pipeline_mode = #tpu.pipeline_mode<synchronous>, transform_indices = @transform_10, window_bounds = array<i64: 1, 64>}, {pipeline_mode = #tpu.pipeline_mode<synchronous>, transform_indices = @transform_11, window_bounds = array<i64: 64, 32>}, {pipeline_mode = #tpu.pipeline_mode<synchronous>, transform_indices = @transform_12, window_bounds = array<i64: 1, 32>}, {transform_indices = @transform_13, window_bounds = array<i64: 1, 8, 32>}]} {
    %c0 = arith.constant 0 : index
    %c0_0 = arith.constant 0 : index
    %c0_1 = arith.constant 0 : index
    %0 = vector.load %arg1[%c0, %c0_0, %c0_1] : memref<1x8x32xf32, #tpu.memory_space<vmem>>, vector<1x8x32xf32>
    %1 = vector.shape_cast %0 : vector<1x8x32xf32> to vector<8x32xf32>
    %c0_2 = arith.constant 0 : index
    %c0_3 = arith.constant 0 : index
    %c0_4 = arith.constant 0 : index
    %2 = vector.load %arg2[%c0_2, %c0_3, %c0_4] : memref<1x1x8xf32, #tpu.memory_space<vmem>>, vector<1x1x8xf32>
    %3 = vector.shape_cast %2 : vector<1x1x8xf32> to vector<1x8xf32>
    %c0_5 = arith.constant 0 : index
    %c0_6 = arith.constant 0 : index
    %4 = vector.load %arg3[%c0_5, %c0_6] : memref<1x32xf32, #tpu.memory_space<vmem>>, vector<1x32xf32>
    %c0_7 = arith.constant 0 : index
    %c0_8 = arith.constant 0 : index
    %5 = vector.load %arg4[%c0_7, %c0_8] : memref<1x32xf32, #tpu.memory_space<vmem>>, vector<1x32xf32>
    %cst = arith.constant dense<0.000000e+00> : vector<8xf32>
    %6 = vector.multi_reduction <add>, %1, %cst [1] : vector<8x32xf32> to vector<8xf32>
    %7 = vector.shape_cast %6 : vector<8xf32> to vector<8x1xf32>
    %cst_9 = arith.constant 3.200000e+01 : f32
    %8 = vector.broadcast %cst_9 : f32 to vector<8x1xf32>
    %9 = arith.divf %7, %8 : vector<8x1xf32>
    %10 = vector.broadcast %9 : vector<8x1xf32> to vector<8x32xf32>
    %11 = arith.subf %1, %10 : vector<8x32xf32>
    %12 = arith.mulf %11, %11 : vector<8x32xf32>
    %cst_10 = arith.constant dense<0.000000e+00> : vector<8xf32>
    %13 = vector.multi_reduction <add>, %12, %cst_10 [1] : vector<8x32xf32> to vector<8xf32>
    %14 = vector.shape_cast %13 : vector<8xf32> to vector<8x1xf32>
    %cst_11 = arith.constant 3.200000e+01 : f32
    %15 = vector.broadcast %cst_11 : f32 to vector<8x1xf32>
    %16 = arith.divf %14, %15 : vector<8x1xf32>
    %17 = vector.broadcast %9 : vector<8x1xf32> to vector<8x32xf32>
    %18 = arith.subf %1, %17 : vector<8x32xf32>
    %cst_12 = arith.constant 9.99999974E-6 : f32
    %19 = vector.broadcast %cst_12 : f32 to vector<8x1xf32>
    %20 = arith.addf %16, %19 : vector<8x1xf32>
    %21 = math.rsqrt %20 : vector<8x1xf32>
    %22 = vector.broadcast %21 : vector<8x1xf32> to vector<8x32xf32>
    %23 = arith.mulf %18, %22 : vector<8x32xf32>
    %24 = vector.broadcast %4 : vector<1x32xf32> to vector<8x32xf32>
    %25 = arith.mulf %23, %24 : vector<8x32xf32>
    %26 = vector.broadcast %5 : vector<1x32xf32> to vector<8x32xf32>
    %27 = arith.addf %25, %26 : vector<8x32xf32>
    %c0_13 = arith.constant 0 : index
    %c0_14 = arith.constant 0 : index
    %28 = vector.load %arg5[%c0_13, %c0_14] : memref<32x96xf32, #tpu.memory_space<vmem>>, vector<32x96xf32>
    %cst_15 = arith.constant dense<0.000000e+00> : vector<8x96xf32>
    %29 = tpu.matmul %27, %28, %cst_15 {dimension_numbers = #tpu.dot_dimension_numbers<[1], [0], [0], [1], [0, 0, 1, 1], [], []>} : vector<8x32xf32>, vector<32x96xf32>, vector<8x96xf32> -> vector<8x96xf32>
    %30 = vector.extract_strided_slice %29 {offsets = [0, 0], sizes = [8, 32], strides = [1, 1]} : vector<8x96xf32> to vector<8x32xf32>
    %cst_16 = arith.constant 0.353553385 : f32
    %31 = vector.broadcast %cst_16 : f32 to vector<8x32xf32>
    %32 = arith.mulf %30, %31 : vector<8x32xf32>
    %33 = vector.extract_strided_slice %29 {offsets = [0, 32], sizes = [8, 32], strides = [1, 1]} : vector<8x96xf32> to vector<8x32xf32>
    %34 = vector.extract_strided_slice %29 {offsets = [0, 64], sizes = [8, 32], strides = [1, 1]} : vector<8x96xf32> to vector<8x32xf32>
    %c0_17 = arith.constant 0 : index
    %c0_18 = arith.constant 0 : index
    %35 = vector.load %arg6[%c0_17, %c0_18] : memref<32x32xf32, #tpu.memory_space<vmem>>, vector<32x32xf32>
    %c0_19 = arith.constant 0 : index
    %c0_20 = arith.constant 0 : index
    %36 = vector.load %arg7[%c0_19, %c0_20] : memref<1x32xf32, #tpu.memory_space<vmem>>, vector<1x32xf32>
    %37 = vector.extract_strided_slice %32 {offsets = [0, 0], sizes = [8, 8], strides = [1, 1]} : vector<8x32xf32> to vector<8x8xf32>
    %38 = vector.extract_strided_slice %33 {offsets = [0, 0], sizes = [8, 8], strides = [1, 1]} : vector<8x32xf32> to vector<8x8xf32>
    %cst_21 = arith.constant dense<0.000000e+00> : vector<8x8xf32>
    %39 = tpu.matmul %37, %38, %cst_21 {dimension_numbers = #tpu.dot_dimension_numbers<[1], [1], [0], [0], [0, 0, 1, 0], [], []>} : vector<8x8xf32>, vector<8x8xf32>, vector<8x8xf32> -> vector<8x8xf32>
    %40 = vector.broadcast %3 : vector<1x8xf32> to vector<8x8xf32>
    %41 = arith.addf %39, %40 : vector<8x8xf32>
    %cst_22 = arith.constant dense<0xFF800000> : vector<8xf32>
    %42 = vector.multi_reduction <maximumf>, %41, %cst_22 [1] : vector<8x8xf32> to vector<8xf32>
    %43 = vector.shape_cast %42 : vector<8xf32> to vector<8x1xf32>
    %44 = vector.broadcast %43 : vector<8x1xf32> to vector<8x8xf32>
    %45 = arith.subf %41, %44 : vector<8x8xf32>
    %46 = math.exp %45 : vector<8x8xf32>
    %cst_23 = arith.constant dense<0.000000e+00> : vector<8xf32>
    %47 = vector.multi_reduction <add>, %46, %cst_23 [1] : vector<8x8xf32> to vector<8xf32>
    %48 = vector.shape_cast %47 : vector<8xf32> to vector<8x1xf32>
    %49 = tpu.reciprocal %48 {approx = true} : vector<8x1xf32> -> vector<8x1xf32>
    %50 = vector.broadcast %49 : vector<8x1xf32> to vector<8x8xf32>
    %51 = arith.mulf %46, %50 : vector<8x8xf32>
    %52 = vector.extract_strided_slice %34 {offsets = [0, 0], sizes = [8, 8], strides = [1, 1]} : vector<8x32xf32> to vector<8x8xf32>
    %cst_24 = arith.constant dense<0.000000e+00> : vector<8x8xf32>
    %53 = tpu.matmul %51, %52, %cst_24 {dimension_numbers = #tpu.dot_dimension_numbers<[1], [0], [0], [1], [0, 0, 1, 1], [], []>} : vector<8x8xf32>, vector<8x8xf32>, vector<8x8xf32> -> vector<8x8xf32>
    %54 = vector.extract_strided_slice %32 {offsets = [0, 8], sizes = [8, 8], strides = [1, 1]} : vector<8x32xf32> to vector<8x8xf32>
    %55 = vector.extract_strided_slice %33 {offsets = [0, 8], sizes = [8, 8], strides = [1, 1]} : vector<8x32xf32> to vector<8x8xf32>
    %cst_25 = arith.constant dense<0.000000e+00> : vector<8x8xf32>
    %56 = tpu.matmul %54, %55, %cst_25 {dimension_numbers = #tpu.dot_dimension_numbers<[1], [1], [0], [0], [0, 0, 1, 0], [], []>} : vector<8x8xf32>, vector<8x8xf32>, vector<8x8xf32> -> vector<8x8xf32>
    %57 = vector.broadcast %3 : vector<1x8xf32> to vector<8x8xf32>
    %58 = arith.addf %56, %57 : vector<8x8xf32>
    %cst_26 = arith.constant dense<0xFF800000> : vector<8xf32>
    %59 = vector.multi_reduction <maximumf>, %58, %cst_26 [1] : vector<8x8xf32> to vector<8xf32>
    %60 = vector.shape_cast %59 : vector<8xf32> to vector<8x1xf32>
    %61 = vector.broadcast %60 : vector<8x1xf32> to vector<8x8xf32>
    %62 = arith.subf %58, %61 : vector<8x8xf32>
    %63 = math.exp %62 : vector<8x8xf32>
    %cst_27 = arith.constant dense<0.000000e+00> : vector<8xf32>
    %64 = vector.multi_reduction <add>, %63, %cst_27 [1] : vector<8x8xf32> to vector<8xf32>
    %65 = vector.shape_cast %64 : vector<8xf32> to vector<8x1xf32>
    %66 = tpu.reciprocal %65 {approx = true} : vector<8x1xf32> -> vector<8x1xf32>
    %67 = vector.broadcast %66 : vector<8x1xf32> to vector<8x8xf32>
    %68 = arith.mulf %63, %67 : vector<8x8xf32>
    %69 = vector.extract_strided_slice %34 {offsets = [0, 8], sizes = [8, 8], strides = [1, 1]} : vector<8x32xf32> to vector<8x8xf32>
    %cst_28 = arith.constant dense<0.000000e+00> : vector<8x8xf32>
    %70 = tpu.matmul %68, %69, %cst_28 {dimension_numbers = #tpu.dot_dimension_numbers<[1], [0], [0], [1], [0, 0, 1, 1], [], []>} : vector<8x8xf32>, vector<8x8xf32>, vector<8x8xf32> -> vector<8x8xf32>
    %71 = vector.extract_strided_slice %32 {offsets = [0, 16], sizes = [8, 8], strides = [1, 1]} : vector<8x32xf32> to vector<8x8xf32>
    %72 = vector.extract_strided_slice %33 {offsets = [0, 16], sizes = [8, 8], strides = [1, 1]} : vector<8x32xf32> to vector<8x8xf32>
    %cst_29 = arith.constant dense<0.000000e+00> : vector<8x8xf32>
    %73 = tpu.matmul %71, %72, %cst_29 {dimension_numbers = #tpu.dot_dimension_numbers<[1], [1], [0], [0], [0, 0, 1, 0], [], []>} : vector<8x8xf32>, vector<8x8xf32>, vector<8x8xf32> -> vector<8x8xf32>
    %74 = vector.broadcast %3 : vector<1x8xf32> to vector<8x8xf32>
    %75 = arith.addf %73, %74 : vector<8x8xf32>
    %cst_30 = arith.constant dense<0xFF800000> : vector<8xf32>
    %76 = vector.multi_reduction <maximumf>, %75, %cst_30 [1] : vector<8x8xf32> to vector<8xf32>
    %77 = vector.shape_cast %76 : vector<8xf32> to vector<8x1xf32>
    %78 = vector.broadcast %77 : vector<8x1xf32> to vector<8x8xf32>
    %79 = arith.subf %75, %78 : vector<8x8xf32>
    %80 = math.exp %79 : vector<8x8xf32>
    %cst_31 = arith.constant dense<0.000000e+00> : vector<8xf32>
    %81 = vector.multi_reduction <add>, %80, %cst_31 [1] : vector<8x8xf32> to vector<8xf32>
    %82 = vector.shape_cast %81 : vector<8xf32> to vector<8x1xf32>
    %83 = tpu.reciprocal %82 {approx = true} : vector<8x1xf32> -> vector<8x1xf32>
    %84 = vector.broadcast %83 : vector<8x1xf32> to vector<8x8xf32>
    %85 = arith.mulf %80, %84 : vector<8x8xf32>
    %86 = vector.extract_strided_slice %34 {offsets = [0, 16], sizes = [8, 8], strides = [1, 1]} : vector<8x32xf32> to vector<8x8xf32>
    %cst_32 = arith.constant dense<0.000000e+00> : vector<8x8xf32>
    %87 = tpu.matmul %85, %86, %cst_32 {dimension_numbers = #tpu.dot_dimension_numbers<[1], [0], [0], [1], [0, 0, 1, 1], [], []>} : vector<8x8xf32>, vector<8x8xf32>, vector<8x8xf32> -> vector<8x8xf32>
    %88 = vector.extract_strided_slice %32 {offsets = [0, 24], sizes = [8, 8], strides = [1, 1]} : vector<8x32xf32> to vector<8x8xf32>
    %89 = vector.extract_strided_slice %33 {offsets = [0, 24], sizes = [8, 8], strides = [1, 1]} : vector<8x32xf32> to vector<8x8xf32>
    %cst_33 = arith.constant dense<0.000000e+00> : vector<8x8xf32>
    %90 = tpu.matmul %88, %89, %cst_33 {dimension_numbers = #tpu.dot_dimension_numbers<[1], [1], [0], [0], [0, 0, 1, 0], [], []>} : vector<8x8xf32>, vector<8x8xf32>, vector<8x8xf32> -> vector<8x8xf32>
    %91 = vector.broadcast %3 : vector<1x8xf32> to vector<8x8xf32>
    %92 = arith.addf %90, %91 : vector<8x8xf32>
    %cst_34 = arith.constant dense<0xFF800000> : vector<8xf32>
    %93 = vector.multi_reduction <maximumf>, %92, %cst_34 [1] : vector<8x8xf32> to vector<8xf32>
    %94 = vector.shape_cast %93 : vector<8xf32> to vector<8x1xf32>
    %95 = vector.broadcast %94 : vector<8x1xf32> to vector<8x8xf32>
    %96 = arith.subf %92, %95 : vector<8x8xf32>
    %97 = math.exp %96 : vector<8x8xf32>
    %cst_35 = arith.constant dense<0.000000e+00> : vector<8xf32>
    %98 = vector.multi_reduction <add>, %97, %cst_35 [1] : vector<8x8xf32> to vector<8xf32>
    %99 = vector.shape_cast %98 : vector<8xf32> to vector<8x1xf32>
    %100 = tpu.reciprocal %99 {approx = true} : vector<8x1xf32> -> vector<8x1xf32>
    %101 = vector.broadcast %100 : vector<8x1xf32> to vector<8x8xf32>
    %102 = arith.mulf %97, %101 : vector<8x8xf32>
    %103 = vector.extract_strided_slice %34 {offsets = [0, 24], sizes = [8, 8], strides = [1, 1]} : vector<8x32xf32> to vector<8x8xf32>
    %cst_36 = arith.constant dense<0.000000e+00> : vector<8x8xf32>
    %104 = tpu.matmul %102, %103, %cst_36 {dimension_numbers = #tpu.dot_dimension_numbers<[1], [0], [0], [1], [0, 0, 1, 1], [], []>} : vector<8x8xf32>, vector<8x8xf32>, vector<8x8xf32> -> vector<8x8xf32>
    %105 = tpu.concatenate %53, %70, %87, %104 in 1 : vector<8x8xf32>, vector<8x8xf32>, vector<8x8xf32>, vector<8x8xf32> -> vector<8x32xf32>
    %cst_37 = arith.constant dense<0.000000e+00> : vector<8x32xf32>
    %106 = tpu.matmul %105, %35, %cst_37 {dimension_numbers = #tpu.dot_dimension_numbers<[1], [0], [0], [1], [0, 0, 1, 1], [], []>} : vector<8x32xf32>, vector<32x32xf32>, vector<8x32xf32> -> vector<8x32xf32>
    %107 = vector.broadcast %36 : vector<1x32xf32> to vector<8x32xf32>
    %108 = arith.addf %106, %107 : vector<8x32xf32>
    %109 = arith.addf %1, %108 : vector<8x32xf32>
    %c0_38 = arith.constant 0 : index
    %c0_39 = arith.constant 0 : index
    %110 = vector.load %arg8[%c0_38, %c0_39] : memref<1x32xf32, #tpu.memory_space<vmem>>, vector<1x32xf32>
    %c0_40 = arith.constant 0 : index
    %c0_41 = arith.constant 0 : index
    %111 = vector.load %arg9[%c0_40, %c0_41] : memref<1x32xf32, #tpu.memory_space<vmem>>, vector<1x32xf32>
    %cst_42 = arith.constant dense<0.000000e+00> : vector<8xf32>
    %112 = vector.multi_reduction <add>, %109, %cst_42 [1] : vector<8x32xf32> to vector<8xf32>
    %113 = vector.shape_cast %112 : vector<8xf32> to vector<8x1xf32>
    %cst_43 = arith.constant 3.200000e+01 : f32
    %114 = vector.broadcast %cst_43 : f32 to vector<8x1xf32>
    %115 = arith.divf %113, %114 : vector<8x1xf32>
    %116 = vector.broadcast %115 : vector<8x1xf32> to vector<8x32xf32>
    %117 = arith.subf %109, %116 : vector<8x32xf32>
    %118 = arith.mulf %117, %117 : vector<8x32xf32>
    %cst_44 = arith.constant dense<0.000000e+00> : vector<8xf32>
    %119 = vector.multi_reduction <add>, %118, %cst_44 [1] : vector<8x32xf32> to vector<8xf32>
    %120 = vector.shape_cast %119 : vector<8xf32> to vector<8x1xf32>
    %cst_45 = arith.constant 3.200000e+01 : f32
    %121 = vector.broadcast %cst_45 : f32 to vector<8x1xf32>
    %122 = arith.divf %120, %121 : vector<8x1xf32>
    %123 = vector.broadcast %115 : vector<8x1xf32> to vector<8x32xf32>
    %124 = arith.subf %109, %123 : vector<8x32xf32>
    %cst_46 = arith.constant 9.99999974E-6 : f32
    %125 = vector.broadcast %cst_46 : f32 to vector<8x1xf32>
    %126 = arith.addf %122, %125 : vector<8x1xf32>
    %127 = math.rsqrt %126 : vector<8x1xf32>
    %128 = vector.broadcast %127 : vector<8x1xf32> to vector<8x32xf32>
    %129 = arith.mulf %124, %128 : vector<8x32xf32>
    %130 = vector.broadcast %110 : vector<1x32xf32> to vector<8x32xf32>
    %131 = arith.mulf %129, %130 : vector<8x32xf32>
    %132 = vector.broadcast %111 : vector<1x32xf32> to vector<8x32xf32>
    %133 = arith.addf %131, %132 : vector<8x32xf32>
    %c0_47 = arith.constant 0 : index
    %c0_48 = arith.constant 0 : index
    %134 = vector.load %arg10[%c0_47, %c0_48] : memref<32x64xf32, #tpu.memory_space<vmem>>, vector<32x64xf32>
    %cst_49 = arith.constant dense<0.000000e+00> : vector<8x64xf32>
    %135 = tpu.matmul %133, %134, %cst_49 {dimension_numbers = #tpu.dot_dimension_numbers<[1], [0], [0], [1], [0, 0, 1, 1], [], []>} : vector<8x32xf32>, vector<32x64xf32>, vector<8x64xf32> -> vector<8x64xf32>
    %c0_50 = arith.constant 0 : index
    %c0_51 = arith.constant 0 : index
    %136 = vector.load %arg11[%c0_50, %c0_51] : memref<1x64xf32, #tpu.memory_space<vmem>>, vector<1x64xf32>
    %137 = vector.broadcast %136 : vector<1x64xf32> to vector<8x64xf32>
    %138 = arith.addf %135, %137 : vector<8x64xf32>
    %cst_52 = arith.constant 5.000000e-01 : f32
    %139 = vector.broadcast %cst_52 : f32 to vector<8x64xf32>
    %140 = arith.mulf %139, %138 : vector<8x64xf32>
    %cst_53 = arith.constant 4.471500e-02 : f32
    %141 = vector.broadcast %cst_53 : f32 to vector<8x64xf32>
    %142 = arith.mulf %141, %138 : vector<8x64xf32>
    %143 = arith.mulf %142, %138 : vector<8x64xf32>
    %144 = arith.mulf %143, %138 : vector<8x64xf32>
    %145 = arith.addf %138, %144 : vector<8x64xf32>
    %cst_54 = arith.constant 0.797884583 : f32
    %146 = vector.broadcast %cst_54 : f32 to vector<8x64xf32>
    %147 = arith.mulf %146, %145 : vector<8x64xf32>
    %148 = math.tanh %147 : vector<8x64xf32>
    %cst_55 = arith.constant 1.000000e+00 : f32
    %149 = vector.broadcast %cst_55 : f32 to vector<8x64xf32>
    %150 = arith.addf %149, %148 : vector<8x64xf32>
    %151 = arith.mulf %140, %150 : vector<8x64xf32>
    %c0_56 = arith.constant 0 : index
    %c0_57 = arith.constant 0 : index
    %152 = vector.load %arg12[%c0_56, %c0_57] : memref<64x32xf32, #tpu.memory_space<vmem>>, vector<64x32xf32>
    %cst_58 = arith.constant dense<0.000000e+00> : vector<8x32xf32>
    %153 = tpu.matmul %151, %152, %cst_58 {dimension_numbers = #tpu.dot_dimension_numbers<[1], [0], [0], [1], [0, 0, 1, 1], [], []>} : vector<8x64xf32>, vector<64x32xf32>, vector<8x32xf32> -> vector<8x32xf32>
    %154 = arith.addf %109, %153 : vector<8x32xf32>
    %c0_59 = arith.constant 0 : index
    %c0_60 = arith.constant 0 : index
    %155 = vector.load %arg13[%c0_59, %c0_60] : memref<1x32xf32, #tpu.memory_space<vmem>>, vector<1x32xf32>
    %156 = vector.broadcast %155 : vector<1x32xf32> to vector<8x32xf32>
    %157 = arith.addf %154, %156 : vector<8x32xf32>
    %c0_61 = arith.constant 0 : index
    %c0_62 = arith.constant 0 : index
    %c0_63 = arith.constant 0 : index
    %158 = vector.load %arg14[%c0_61, %c0_62, %c0_63] : memref<1x8x32xf32, #tpu.memory_space<vmem>>, vector<1x8x32xf32>
    %159 = vector.shape_cast %158 : vector<1x8x32xf32> to vector<8x32xf32>
    %160 = vector.shape_cast %157 : vector<8x32xf32> to vector<1x8x32xf32>
    tpu.vector_store %arg14[%c0_61, %c0_62, %c0_63], %160 {strides = array<i32>} : memref<1x8x32xf32, #tpu.memory_space<vmem>>, vector<1x8x32xf32>,
    return
  }
  func.func @transform_0(%arg0: i32) -> (i32, i32, i32) {
    %c0_i32 = arith.constant 0 : i32
    %c0_i32_0 = arith.constant 0 : i32
    %c0_i32_1 = arith.constant 0 : i32
    return %arg0, %c0_i32, %c0_i32_0 : i32, i32, i32
  }
  func.func @transform_1(%arg0: i32) -> (i32, i32, i32) {
    %c0_i32 = arith.constant 0 : i32
    %c0_i32_0 = arith.constant 0 : i32
    %c0_i32_1 = arith.constant 0 : i32
    return %arg0, %c0_i32, %c0_i32_0 : i32, i32, i32
  }
  func.func @transform_2(%arg0: i32) -> (i32, i32) {
    %c0_i32 = arith.constant 0 : i32
    %c0_i32_0 = arith.constant 0 : i32
    %c0_i32_1 = arith.constant 0 : i32
    return %c0_i32, %c0_i32_0 : i32, i32
  }
  func.func @transform_3(%arg0: i32) -> (i32, i32) {
    %c0_i32 = arith.constant 0 : i32
    %c0_i32_0 = arith.constant 0 : i32
    %c0_i32_1 = arith.constant 0 : i32
    return %c0_i32, %c0_i32_0 : i32, i32
  }
  func.func @transform_4(%arg0: i32) -> (i32, i32) {
    %c0_i32 = arith.constant 0 : i32
    %c0_i32_0 = arith.constant 0 : i32
    %c0_i32_1 = arith.constant 0 : i32
    return %c0_i32, %c0_i32_0 : i32, i32
  }
  func.func @transform_5(%arg0: i32) -> (i32, i32) {
    %c0_i32 = arith.constant 0 : i32
    %c0_i32_0 = arith.constant 0 : i32
    %c0_i32_1 = arith.constant 0 : i32
    return %c0_i32, %c0_i32_0 : i32, i32
  }
  func.func @transform_6(%arg0: i32) -> (i32, i32) {
    %c0_i32 = arith.constant 0 : i32
    %c0_i32_0 = arith.constant 0 : i32
    %c0_i32_1 = arith.constant 0 : i32
    return %c0_i32, %c0_i32_0 : i32, i32
  }
  func.func @transform_7(%arg0: i32) -> (i32, i32) {
    %c0_i32 = arith.constant 0 : i32
    %c0_i32_0 = arith.constant 0 : i32
    %c0_i32_1 = arith.constant 0 : i32
    return %c0_i32, %c0_i32_0 : i32, i32
  }
  func.func @transform_8(%arg0: i32) -> (i32, i32) {
    %c0_i32 = arith.constant 0 : i32
    %c0_i32_0 = arith.constant 0 : i32
    %c0_i32_1 = arith.constant 0 : i32
    return %c0_i32, %c0_i32_0 : i32, i32
  }
  func.func @transform_9(%arg0: i32) -> (i32, i32) {
    %c0_i32 = arith.constant 0 : i32
    %c0_i32_0 = arith.constant 0 : i32
    %c0_i32_1 = arith.constant 0 : i32
    return %c0_i32, %c0_i32_0 : i32, i32
  }
  func.func @transform_10(%arg0: i32) -> (i32, i32) {
    %c0_i32 = arith.constant 0 : i32
    %c0_i32_0 = arith.constant 0 : i32
    %c0_i32_1 = arith.constant 0 : i32
    return %c0_i32, %c0_i32_0 : i32, i32
  }
  func.func @transform_11(%arg0: i32) -> (i32, i32) {
    %c0_i32 = arith.constant 0 : i32
    %c0_i32_0 = arith.constant 0 : i32
    %c0_i32_1 = arith.constant 0 : i32
    return %c0_i32, %c0_i32_0 : i32, i32
  }
  func.func @transform_12(%arg0: i32) -> (i32, i32) {
    %c0_i32 = arith.constant 0 : i32
    %c0_i32_0 = arith.constant 0 : i32
    %c0_i32_1 = arith.constant 0 : i32
    return %c0_i32, %c0_i32_0 : i32, i32
  }
  func.func @transform_13(%arg0: i32) -> (i32, i32, i32) {
    %c0_i32 = arith.constant 0 : i32
    %c0_i32_0 = arith.constant 0 : i32
    %c0_i32_1 = arith.constant 0 : i32
    return %arg0, %c0_i32, %c0_i32_0 : i32, i32, i32
  }
}

module attributes {stable_mosaic.version = 11 : i64} {
  func.func @head_kernel(%arg0: i32, %arg1: memref<1x8x32xf32, #tpu.memory_space<vmem>>, %arg2: memref<1x32xf32, #tpu.memory_space<vmem>>, %arg3: memref<1x32xf32, #tpu.memory_space<vmem>>, %arg4: memref<32x64xf32, #tpu.memory_space<vmem>>, %arg5: memref<1x64xf32, #tpu.memory_space<vmem>>, %arg6: memref<1x8x64xf32, #tpu.memory_space<vmem>>) attributes {dimension_semantics = [#tpu.dimension_semantics<parallel>], iteration_bounds = array<i64: 2>, scalar_prefetch = 0 : i64, scratch_operands = 0 : i64, tpu.core_type = #tpu.core_type<tc>, window_params = [{transform_indices = @transform_0, window_bounds = array<i64: 1, 8, 32>}, {pipeline_mode = #tpu.pipeline_mode<synchronous>, transform_indices = @transform_1, window_bounds = array<i64: 1, 32>}, {pipeline_mode = #tpu.pipeline_mode<synchronous>, transform_indices = @transform_2, window_bounds = array<i64: 1, 32>}, {pipeline_mode = #tpu.pipeline_mode<synchronous>, transform_indices = @transform_3, window_bounds = array<i64: 32, 64>}, {pipeline_mode = #tpu.pipeline_mode<synchronous>, transform_indices = @transform_4, window_bounds = array<i64: 1, 64>}, {transform_indices = @transform_5, window_bounds = array<i64: 1, 8, 64>}]} {
    %c0 = arith.constant 0 : index
    %c0_0 = arith.constant 0 : index
    %c0_1 = arith.constant 0 : index
    %0 = vector.load %arg1[%c0, %c0_0, %c0_1] : memref<1x8x32xf32, #tpu.memory_space<vmem>>, vector<1x8x32xf32>
    %1 = vector.shape_cast %0 : vector<1x8x32xf32> to vector<8x32xf32>
    %c0_2 = arith.constant 0 : index
    %c0_3 = arith.constant 0 : index
    %2 = vector.load %arg2[%c0_2, %c0_3] : memref<1x32xf32, #tpu.memory_space<vmem>>, vector<1x32xf32>
    %c0_4 = arith.constant 0 : index
    %c0_5 = arith.constant 0 : index
    %3 = vector.load %arg3[%c0_4, %c0_5] : memref<1x32xf32, #tpu.memory_space<vmem>>, vector<1x32xf32>
    %cst = arith.constant dense<0.000000e+00> : vector<8xf32>
    %4 = vector.multi_reduction <add>, %1, %cst [1] : vector<8x32xf32> to vector<8xf32>
    %5 = vector.shape_cast %4 : vector<8xf32> to vector<8x1xf32>
    %cst_6 = arith.constant 3.200000e+01 : f32
    %6 = vector.broadcast %cst_6 : f32 to vector<8x1xf32>
    %7 = arith.divf %5, %6 : vector<8x1xf32>
    %8 = vector.broadcast %7 : vector<8x1xf32> to vector<8x32xf32>
    %9 = arith.subf %1, %8 : vector<8x32xf32>
    %10 = arith.mulf %9, %9 : vector<8x32xf32>
    %cst_7 = arith.constant dense<0.000000e+00> : vector<8xf32>
    %11 = vector.multi_reduction <add>, %10, %cst_7 [1] : vector<8x32xf32> to vector<8xf32>
    %12 = vector.shape_cast %11 : vector<8xf32> to vector<8x1xf32>
    %cst_8 = arith.constant 3.200000e+01 : f32
    %13 = vector.broadcast %cst_8 : f32 to vector<8x1xf32>
    %14 = arith.divf %12, %13 : vector<8x1xf32>
    %15 = vector.broadcast %7 : vector<8x1xf32> to vector<8x32xf32>
    %16 = arith.subf %1, %15 : vector<8x32xf32>
    %cst_9 = arith.constant 9.99999974E-6 : f32
    %17 = vector.broadcast %cst_9 : f32 to vector<8x1xf32>
    %18 = arith.addf %14, %17 : vector<8x1xf32>
    %19 = math.rsqrt %18 : vector<8x1xf32>
    %20 = vector.broadcast %19 : vector<8x1xf32> to vector<8x32xf32>
    %21 = arith.mulf %16, %20 : vector<8x32xf32>
    %22 = vector.broadcast %2 : vector<1x32xf32> to vector<8x32xf32>
    %23 = arith.mulf %21, %22 : vector<8x32xf32>
    %24 = vector.broadcast %3 : vector<1x32xf32> to vector<8x32xf32>
    %25 = arith.addf %23, %24 : vector<8x32xf32>
    %c0_10 = arith.constant 0 : index
    %c0_11 = arith.constant 0 : index
    %26 = vector.load %arg4[%c0_10, %c0_11] : memref<32x64xf32, #tpu.memory_space<vmem>>, vector<32x64xf32>
    %cst_12 = arith.constant dense<0.000000e+00> : vector<8x64xf32>
    %27 = tpu.matmul %25, %26, %cst_12 {dimension_numbers = #tpu.dot_dimension_numbers<[1], [0], [0], [1], [0, 0, 1, 1], [], []>} : vector<8x32xf32>, vector<32x64xf32>, vector<8x64xf32> -> vector<8x64xf32>
    %c0_13 = arith.constant 0 : index
    %c0_14 = arith.constant 0 : index
    %28 = vector.load %arg5[%c0_13, %c0_14] : memref<1x64xf32, #tpu.memory_space<vmem>>, vector<1x64xf32>
    %29 = vector.broadcast %28 : vector<1x64xf32> to vector<8x64xf32>
    %30 = arith.addf %27, %29 : vector<8x64xf32>
    %c0_15 = arith.constant 0 : index
    %c0_16 = arith.constant 0 : index
    %c0_17 = arith.constant 0 : index
    %31 = vector.load %arg6[%c0_15, %c0_16, %c0_17] : memref<1x8x64xf32, #tpu.memory_space<vmem>>, vector<1x8x64xf32>
    %32 = vector.shape_cast %31 : vector<1x8x64xf32> to vector<8x64xf32>
    %33 = vector.shape_cast %30 : vector<8x64xf32> to vector<1x8x64xf32>
    tpu.vector_store %arg6[%c0_15, %c0_16, %c0_17], %33 {strides = array<i32>} : memref<1x8x64xf32, #tpu.memory_space<vmem>>, vector<1x8x64xf32>,
    return
  }
  func.func @transform_0(%arg0: i32) -> (i32, i32, i32) {
    %c0_i32 = arith.constant 0 : i32
    %c0_i32_0 = arith.constant 0 : i32
    %c0_i32_1 = arith.constant 0 : i32
    return %arg0, %c0_i32, %c0_i32_0 : i32, i32, i32
  }
  func.func @transform_1(%arg0: i32) -> (i32, i32) {
    %c0_i32 = arith.constant 0 : i32
    %c0_i32_0 = arith.constant 0 : i32
    %c0_i32_1 = arith.constant 0 : i32
    return %c0_i32, %c0_i32_0 : i32, i32
  }
  func.func @transform_2(%arg0: i32) -> (i32, i32) {
    %c0_i32 = arith.constant 0 : i32
    %c0_i32_0 = arith.constant 0 : i32
    %c0_i32_1 = arith.constant 0 : i32
    return %c0_i32, %c0_i32_0 : i32, i32
  }
  func.func @transform_3(%arg0: i32) -> (i32, i32) {
    %c0_i32 = arith.constant 0 : i32
    %c0_i32_0 = arith.constant 0 : i32
    %c0_i32_1 = arith.constant 0 : i32
    return %c0_i32, %c0_i32_0 : i32, i32
  }
  func.func @transform_4(%arg0: i32) -> (i32, i32) {
    %c0_i32 = arith.constant 0 : i32
    %c0_i32_0 = arith.constant 0 : i32
    %c0_i32_1 = arith.constant 0 : i32
    return %c0_i32, %c0_i32_0 : i32, i32
  }
  func.func @transform_5(%arg0: i32) -> (i32, i32, i32) {
    %c0_i32 = arith.constant 0 : i32
    %c0_i32_0 = arith.constant 0 : i32
    %c0_i32_1 = arith.constant 0 : i32
    return %arg0, %c0_i32, %c0_i32_0 : i32, i32, i32
  }
}

module attributes {stable_mosaic.version = 11 : i64} {
  func.func @kernel(%arg0: i32, %arg1: memref<1x8x32xf32, #tpu.memory_space<vmem>>, %arg2: memref<1x1x8xf32, #tpu.memory_space<vmem>>, %arg3: memref<1x32xf32, #tpu.memory_space<vmem>>, %arg4: memref<1x32xf32, #tpu.memory_space<vmem>>, %arg5: memref<32x96xf32, #tpu.memory_space<vmem>>, %arg6: memref<32x32xf32, #tpu.memory_space<vmem>>, %arg7: memref<1x32xf32, #tpu.memory_space<vmem>>, %arg8: memref<1x32xf32, #tpu.memory_space<vmem>>, %arg9: memref<1x32xf32, #tpu.memory_space<vmem>>, %arg10: memref<32x64xf32, #tpu.memory_space<vmem>>, %arg11: memref<1x64xf32, #tpu.memory_space<vmem>>, %arg12: memref<64x32xf32, #tpu.memory_space<vmem>>, %arg13: memref<1x32xf32, #tpu.memory_space<vmem>>, %arg14: memref<1x32xf32, #tpu.memory_space<vmem>>, %arg15: memref<1x32xf32, #tpu.memory_space<vmem>>, %arg16: memref<1x8x32xf32, #tpu.memory_space<vmem>>) attributes {dimension_semantics = [#tpu.dimension_semantics<parallel>], iteration_bounds = array<i64: 2>, scalar_prefetch = 0 : i64, scratch_operands = 0 : i64, tpu.core_type = #tpu.core_type<tc>, window_params = [{transform_indices = @transform_0, window_bounds = array<i64: 1, 8, 32>}, {transform_indices = @transform_1, window_bounds = array<i64: 1, 1, 8>}, {pipeline_mode = #tpu.pipeline_mode<synchronous>, transform_indices = @transform_2, window_bounds = array<i64: 1, 32>}, {pipeline_mode = #tpu.pipeline_mode<synchronous>, transform_indices = @transform_3, window_bounds = array<i64: 1, 32>}, {pipeline_mode = #tpu.pipeline_mode<synchronous>, transform_indices = @transform_4, window_bounds = array<i64: 32, 96>}, {pipeline_mode = #tpu.pipeline_mode<synchronous>, transform_indices = @transform_5, window_bounds = array<i64: 32, 32>}, {pipeline_mode = #tpu.pipeline_mode<synchronous>, transform_indices = @transform_6, window_bounds = array<i64: 1, 32>}, {pipeline_mode = #tpu.pipeline_mode<synchronous>, transform_indices = @transform_7, window_bounds = array<i64: 1, 32>}, {pipeline_mode = #tpu.pipeline_mode<synchronous>, transform_indices = @transform_8, window_bounds = array<i64: 1, 32>}, {pipeline_mode = #tpu.pipeline_mode<synchronous>, transform_indices = @transform_9, window_bounds = array<i64: 32, 64>}, {pipeline_mode = #tpu.pipeline_mode<synchronous>, transform_indices = @transform_10, window_bounds = array<i64: 1, 64>}, {pipeline_mode = #tpu.pipeline_mode<synchronous>, transform_indices = @transform_11, window_bounds = array<i64: 64, 32>}, {pipeline_mode = #tpu.pipeline_mode<synchronous>, transform_indices = @transform_12, window_bounds = array<i64: 1, 32>}, {pipeline_mode = #tpu.pipeline_mode<synchronous>, transform_indices = @transform_13, window_bounds = array<i64: 1, 32>}, {pipeline_mode = #tpu.pipeline_mode<synchronous>, transform_indices = @transform_14, window_bounds = array<i64: 1, 32>}, {transform_indices = @transform_15, window_bounds = array<i64: 1, 8, 32>}]} {
    %c0 = arith.constant 0 : index
    %c0_0 = arith.constant 0 : index
    %c0_1 = arith.constant 0 : index
    %0 = vector.load %arg1[%c0, %c0_0, %c0_1] : memref<1x8x32xf32, #tpu.memory_space<vmem>>, vector<1x8x32xf32>
    %1 = vector.shape_cast %0 : vector<1x8x32xf32> to vector<8x32xf32>
    %c0_2 = arith.constant 0 : index
    %c0_3 = arith.constant 0 : index
    %c0_4 = arith.constant 0 : index
    %2 = vector.load %arg2[%c0_2, %c0_3, %c0_4] : memref<1x1x8xf32, #tpu.memory_space<vmem>>, vector<1x1x8xf32>
    %3 = vector.shape_cast %2 : vector<1x1x8xf32> to vector<1x8xf32>
    %c0_5 = arith.constant 0 : index
    %c0_6 = arith.constant 0 : index
    %4 = vector.load %arg3[%c0_5, %c0_6] : memref<1x32xf32, #tpu.memory_space<vmem>>, vector<1x32xf32>
    %c0_7 = arith.constant 0 : index
    %c0_8 = arith.constant 0 : index
    %5 = vector.load %arg4[%c0_7, %c0_8] : memref<1x32xf32, #tpu.memory_space<vmem>>, vector<1x32xf32>
    %cst = arith.constant dense<0.000000e+00> : vector<8xf32>
    %6 = vector.multi_reduction <add>, %1, %cst [1] : vector<8x32xf32> to vector<8xf32>
    %7 = vector.shape_cast %6 : vector<8xf32> to vector<8x1xf32>
    %cst_9 = arith.constant 3.200000e+01 : f32
    %8 = vector.broadcast %cst_9 : f32 to vector<8x1xf32>
    %9 = arith.divf %7, %8 : vector<8x1xf32>
    %10 = vector.broadcast %9 : vector<8x1xf32> to vector<8x32xf32>
    %11 = arith.subf %1, %10 : vector<8x32xf32>
    %12 = arith.mulf %11, %11 : vector<8x32xf32>
    %cst_10 = arith.constant dense<0.000000e+00> : vector<8xf32>
    %13 = vector.multi_reduction <add>, %12, %cst_10 [1] : vector<8x32xf32> to vector<8xf32>
    %14 = vector.shape_cast %13 : vector<8xf32> to vector<8x1xf32>
    %cst_11 = arith.constant 3.200000e+01 : f32
    %15 = vector.broadcast %cst_11 : f32 to vector<8x1xf32>
    %16 = arith.divf %14, %15 : vector<8x1xf32>
    %17 = vector.broadcast %9 : vector<8x1xf32> to vector<8x32xf32>
    %18 = arith.subf %1, %17 : vector<8x32xf32>
    %cst_12 = arith.constant 9.99999974E-6 : f32
    %19 = vector.broadcast %cst_12 : f32 to vector<8x1xf32>
    %20 = arith.addf %16, %19 : vector<8x1xf32>
    %21 = math.rsqrt %20 : vector<8x1xf32>
    %22 = vector.broadcast %21 : vector<8x1xf32> to vector<8x32xf32>
    %23 = arith.mulf %18, %22 : vector<8x32xf32>
    %24 = vector.broadcast %4 : vector<1x32xf32> to vector<8x32xf32>
    %25 = arith.mulf %23, %24 : vector<8x32xf32>
    %26 = vector.broadcast %5 : vector<1x32xf32> to vector<8x32xf32>
    %27 = arith.addf %25, %26 : vector<8x32xf32>
    %c0_13 = arith.constant 0 : index
    %c0_14 = arith.constant 0 : index
    %28 = vector.load %arg5[%c0_13, %c0_14] : memref<32x96xf32, #tpu.memory_space<vmem>>, vector<32x96xf32>
    %cst_15 = arith.constant dense<0.000000e+00> : vector<8x96xf32>
    %29 = tpu.matmul %27, %28, %cst_15 {dimension_numbers = #tpu.dot_dimension_numbers<[1], [0], [0], [1], [0, 0, 1, 1], [], []>} : vector<8x32xf32>, vector<32x96xf32>, vector<8x96xf32> -> vector<8x96xf32>
    %30 = vector.extract_strided_slice %29 {offsets = [0, 0], sizes = [8, 32], strides = [1, 1]} : vector<8x96xf32> to vector<8x32xf32>
    %cst_16 = arith.constant 0.353553385 : f32
    %31 = vector.broadcast %cst_16 : f32 to vector<8x32xf32>
    %32 = arith.mulf %30, %31 : vector<8x32xf32>
    %33 = vector.extract_strided_slice %29 {offsets = [0, 32], sizes = [8, 32], strides = [1, 1]} : vector<8x96xf32> to vector<8x32xf32>
    %34 = vector.extract_strided_slice %29 {offsets = [0, 64], sizes = [8, 32], strides = [1, 1]} : vector<8x96xf32> to vector<8x32xf32>
    %c0_17 = arith.constant 0 : index
    %c0_18 = arith.constant 0 : index
    %35 = vector.load %arg6[%c0_17, %c0_18] : memref<32x32xf32, #tpu.memory_space<vmem>>, vector<32x32xf32>
    %c0_19 = arith.constant 0 : index
    %c0_20 = arith.constant 0 : index
    %36 = vector.load %arg7[%c0_19, %c0_20] : memref<1x32xf32, #tpu.memory_space<vmem>>, vector<1x32xf32>
    %37 = vector.extract_strided_slice %32 {offsets = [0, 0], sizes = [8, 8], strides = [1, 1]} : vector<8x32xf32> to vector<8x8xf32>
    %38 = vector.extract_strided_slice %33 {offsets = [0, 0], sizes = [8, 8], strides = [1, 1]} : vector<8x32xf32> to vector<8x8xf32>
    %cst_21 = arith.constant dense<0.000000e+00> : vector<8x8xf32>
    %39 = tpu.matmul %37, %38, %cst_21 {dimension_numbers = #tpu.dot_dimension_numbers<[1], [1], [0], [0], [0, 0, 1, 0], [], []>} : vector<8x8xf32>, vector<8x8xf32>, vector<8x8xf32> -> vector<8x8xf32>
    %40 = vector.broadcast %3 : vector<1x8xf32> to vector<8x8xf32>
    %41 = arith.addf %39, %40 : vector<8x8xf32>
    %cst_22 = arith.constant dense<0xFF800000> : vector<8xf32>
    %42 = vector.multi_reduction <maximumf>, %41, %cst_22 [1] : vector<8x8xf32> to vector<8xf32>
    %43 = vector.shape_cast %42 : vector<8xf32> to vector<8x1xf32>
    %44 = vector.broadcast %43 : vector<8x1xf32> to vector<8x8xf32>
    %45 = arith.subf %41, %44 : vector<8x8xf32>
    %46 = math.exp %45 : vector<8x8xf32>
    %cst_23 = arith.constant dense<0.000000e+00> : vector<8xf32>
    %47 = vector.multi_reduction <add>, %46, %cst_23 [1] : vector<8x8xf32> to vector<8xf32>
    %48 = vector.shape_cast %47 : vector<8xf32> to vector<8x1xf32>
    %49 = tpu.reciprocal %48 {approx = true} : vector<8x1xf32> -> vector<8x1xf32>
    %50 = vector.broadcast %49 : vector<8x1xf32> to vector<8x8xf32>
    %51 = arith.mulf %46, %50 : vector<8x8xf32>
    %52 = vector.extract_strided_slice %34 {offsets = [0, 0], sizes = [8, 8], strides = [1, 1]} : vector<8x32xf32> to vector<8x8xf32>
    %cst_24 = arith.constant dense<0.000000e+00> : vector<8x8xf32>
    %53 = tpu.matmul %51, %52, %cst_24 {dimension_numbers = #tpu.dot_dimension_numbers<[1], [0], [0], [1], [0, 0, 1, 1], [], []>} : vector<8x8xf32>, vector<8x8xf32>, vector<8x8xf32> -> vector<8x8xf32>
    %54 = vector.extract_strided_slice %32 {offsets = [0, 8], sizes = [8, 8], strides = [1, 1]} : vector<8x32xf32> to vector<8x8xf32>
    %55 = vector.extract_strided_slice %33 {offsets = [0, 8], sizes = [8, 8], strides = [1, 1]} : vector<8x32xf32> to vector<8x8xf32>
    %cst_25 = arith.constant dense<0.000000e+00> : vector<8x8xf32>
    %56 = tpu.matmul %54, %55, %cst_25 {dimension_numbers = #tpu.dot_dimension_numbers<[1], [1], [0], [0], [0, 0, 1, 0], [], []>} : vector<8x8xf32>, vector<8x8xf32>, vector<8x8xf32> -> vector<8x8xf32>
    %57 = vector.broadcast %3 : vector<1x8xf32> to vector<8x8xf32>
    %58 = arith.addf %56, %57 : vector<8x8xf32>
    %cst_26 = arith.constant dense<0xFF800000> : vector<8xf32>
    %59 = vector.multi_reduction <maximumf>, %58, %cst_26 [1] : vector<8x8xf32> to vector<8xf32>
    %60 = vector.shape_cast %59 : vector<8xf32> to vector<8x1xf32>
    %61 = vector.broadcast %60 : vector<8x1xf32> to vector<8x8xf32>
    %62 = arith.subf %58, %61 : vector<8x8xf32>
    %63 = math.exp %62 : vector<8x8xf32>
    %cst_27 = arith.constant dense<0.000000e+00> : vector<8xf32>
    %64 = vector.multi_reduction <add>, %63, %cst_27 [1] : vector<8x8xf32> to vector<8xf32>
    %65 = vector.shape_cast %64 : vector<8xf32> to vector<8x1xf32>
    %66 = tpu.reciprocal %65 {approx = true} : vector<8x1xf32> -> vector<8x1xf32>
    %67 = vector.broadcast %66 : vector<8x1xf32> to vector<8x8xf32>
    %68 = arith.mulf %63, %67 : vector<8x8xf32>
    %69 = vector.extract_strided_slice %34 {offsets = [0, 8], sizes = [8, 8], strides = [1, 1]} : vector<8x32xf32> to vector<8x8xf32>
    %cst_28 = arith.constant dense<0.000000e+00> : vector<8x8xf32>
    %70 = tpu.matmul %68, %69, %cst_28 {dimension_numbers = #tpu.dot_dimension_numbers<[1], [0], [0], [1], [0, 0, 1, 1], [], []>} : vector<8x8xf32>, vector<8x8xf32>, vector<8x8xf32> -> vector<8x8xf32>
    %71 = vector.extract_strided_slice %32 {offsets = [0, 16], sizes = [8, 8], strides = [1, 1]} : vector<8x32xf32> to vector<8x8xf32>
    %72 = vector.extract_strided_slice %33 {offsets = [0, 16], sizes = [8, 8], strides = [1, 1]} : vector<8x32xf32> to vector<8x8xf32>
    %cst_29 = arith.constant dense<0.000000e+00> : vector<8x8xf32>
    %73 = tpu.matmul %71, %72, %cst_29 {dimension_numbers = #tpu.dot_dimension_numbers<[1], [1], [0], [0], [0, 0, 1, 0], [], []>} : vector<8x8xf32>, vector<8x8xf32>, vector<8x8xf32> -> vector<8x8xf32>
    %74 = vector.broadcast %3 : vector<1x8xf32> to vector<8x8xf32>
    %75 = arith.addf %73, %74 : vector<8x8xf32>
    %cst_30 = arith.constant dense<0xFF800000> : vector<8xf32>
    %76 = vector.multi_reduction <maximumf>, %75, %cst_30 [1] : vector<8x8xf32> to vector<8xf32>
    %77 = vector.shape_cast %76 : vector<8xf32> to vector<8x1xf32>
    %78 = vector.broadcast %77 : vector<8x1xf32> to vector<8x8xf32>
    %79 = arith.subf %75, %78 : vector<8x8xf32>
    %80 = math.exp %79 : vector<8x8xf32>
    %cst_31 = arith.constant dense<0.000000e+00> : vector<8xf32>
    %81 = vector.multi_reduction <add>, %80, %cst_31 [1] : vector<8x8xf32> to vector<8xf32>
    %82 = vector.shape_cast %81 : vector<8xf32> to vector<8x1xf32>
    %83 = tpu.reciprocal %82 {approx = true} : vector<8x1xf32> -> vector<8x1xf32>
    %84 = vector.broadcast %83 : vector<8x1xf32> to vector<8x8xf32>
    %85 = arith.mulf %80, %84 : vector<8x8xf32>
    %86 = vector.extract_strided_slice %34 {offsets = [0, 16], sizes = [8, 8], strides = [1, 1]} : vector<8x32xf32> to vector<8x8xf32>
    %cst_32 = arith.constant dense<0.000000e+00> : vector<8x8xf32>
    %87 = tpu.matmul %85, %86, %cst_32 {dimension_numbers = #tpu.dot_dimension_numbers<[1], [0], [0], [1], [0, 0, 1, 1], [], []>} : vector<8x8xf32>, vector<8x8xf32>, vector<8x8xf32> -> vector<8x8xf32>
    %88 = vector.extract_strided_slice %32 {offsets = [0, 24], sizes = [8, 8], strides = [1, 1]} : vector<8x32xf32> to vector<8x8xf32>
    %89 = vector.extract_strided_slice %33 {offsets = [0, 24], sizes = [8, 8], strides = [1, 1]} : vector<8x32xf32> to vector<8x8xf32>
    %cst_33 = arith.constant dense<0.000000e+00> : vector<8x8xf32>
    %90 = tpu.matmul %88, %89, %cst_33 {dimension_numbers = #tpu.dot_dimension_numbers<[1], [1], [0], [0], [0, 0, 1, 0], [], []>} : vector<8x8xf32>, vector<8x8xf32>, vector<8x8xf32> -> vector<8x8xf32>
    %91 = vector.broadcast %3 : vector<1x8xf32> to vector<8x8xf32>
    %92 = arith.addf %90, %91 : vector<8x8xf32>
    %cst_34 = arith.constant dense<0xFF800000> : vector<8xf32>
    %93 = vector.multi_reduction <maximumf>, %92, %cst_34 [1] : vector<8x8xf32> to vector<8xf32>
    %94 = vector.shape_cast %93 : vector<8xf32> to vector<8x1xf32>
    %95 = vector.broadcast %94 : vector<8x1xf32> to vector<8x8xf32>
    %96 = arith.subf %92, %95 : vector<8x8xf32>
    %97 = math.exp %96 : vector<8x8xf32>
    %cst_35 = arith.constant dense<0.000000e+00> : vector<8xf32>
    %98 = vector.multi_reduction <add>, %97, %cst_35 [1] : vector<8x8xf32> to vector<8xf32>
    %99 = vector.shape_cast %98 : vector<8xf32> to vector<8x1xf32>
    %100 = tpu.reciprocal %99 {approx = true} : vector<8x1xf32> -> vector<8x1xf32>
    %101 = vector.broadcast %100 : vector<8x1xf32> to vector<8x8xf32>
    %102 = arith.mulf %97, %101 : vector<8x8xf32>
    %103 = vector.extract_strided_slice %34 {offsets = [0, 24], sizes = [8, 8], strides = [1, 1]} : vector<8x32xf32> to vector<8x8xf32>
    %cst_36 = arith.constant dense<0.000000e+00> : vector<8x8xf32>
    %104 = tpu.matmul %102, %103, %cst_36 {dimension_numbers = #tpu.dot_dimension_numbers<[1], [0], [0], [1], [0, 0, 1, 1], [], []>} : vector<8x8xf32>, vector<8x8xf32>, vector<8x8xf32> -> vector<8x8xf32>
    %105 = tpu.concatenate %53, %70, %87, %104 in 1 : vector<8x8xf32>, vector<8x8xf32>, vector<8x8xf32>, vector<8x8xf32> -> vector<8x32xf32>
    %cst_37 = arith.constant dense<0.000000e+00> : vector<8x32xf32>
    %106 = tpu.matmul %105, %35, %cst_37 {dimension_numbers = #tpu.dot_dimension_numbers<[1], [0], [0], [1], [0, 0, 1, 1], [], []>} : vector<8x32xf32>, vector<32x32xf32>, vector<8x32xf32> -> vector<8x32xf32>
    %107 = vector.broadcast %36 : vector<1x32xf32> to vector<8x32xf32>
    %108 = arith.addf %106, %107 : vector<8x32xf32>
    %109 = arith.addf %1, %108 : vector<8x32xf32>
    %c0_38 = arith.constant 0 : index
    %c0_39 = arith.constant 0 : index
    %110 = vector.load %arg8[%c0_38, %c0_39] : memref<1x32xf32, #tpu.memory_space<vmem>>, vector<1x32xf32>
    %c0_40 = arith.constant 0 : index
    %c0_41 = arith.constant 0 : index
    %111 = vector.load %arg9[%c0_40, %c0_41] : memref<1x32xf32, #tpu.memory_space<vmem>>, vector<1x32xf32>
    %cst_42 = arith.constant dense<0.000000e+00> : vector<8xf32>
    %112 = vector.multi_reduction <add>, %109, %cst_42 [1] : vector<8x32xf32> to vector<8xf32>
    %113 = vector.shape_cast %112 : vector<8xf32> to vector<8x1xf32>
    %cst_43 = arith.constant 3.200000e+01 : f32
    %114 = vector.broadcast %cst_43 : f32 to vector<8x1xf32>
    %115 = arith.divf %113, %114 : vector<8x1xf32>
    %116 = vector.broadcast %115 : vector<8x1xf32> to vector<8x32xf32>
    %117 = arith.subf %109, %116 : vector<8x32xf32>
    %118 = arith.mulf %117, %117 : vector<8x32xf32>
    %cst_44 = arith.constant dense<0.000000e+00> : vector<8xf32>
    %119 = vector.multi_reduction <add>, %118, %cst_44 [1] : vector<8x32xf32> to vector<8xf32>
    %120 = vector.shape_cast %119 : vector<8xf32> to vector<8x1xf32>
    %cst_45 = arith.constant 3.200000e+01 : f32
    %121 = vector.broadcast %cst_45 : f32 to vector<8x1xf32>
    %122 = arith.divf %120, %121 : vector<8x1xf32>
    %123 = vector.broadcast %115 : vector<8x1xf32> to vector<8x32xf32>
    %124 = arith.subf %109, %123 : vector<8x32xf32>
    %cst_46 = arith.constant 9.99999974E-6 : f32
    %125 = vector.broadcast %cst_46 : f32 to vector<8x1xf32>
    %126 = arith.addf %122, %125 : vector<8x1xf32>
    %127 = math.rsqrt %126 : vector<8x1xf32>
    %128 = vector.broadcast %127 : vector<8x1xf32> to vector<8x32xf32>
    %129 = arith.mulf %124, %128 : vector<8x32xf32>
    %130 = vector.broadcast %110 : vector<1x32xf32> to vector<8x32xf32>
    %131 = arith.mulf %129, %130 : vector<8x32xf32>
    %132 = vector.broadcast %111 : vector<1x32xf32> to vector<8x32xf32>
    %133 = arith.addf %131, %132 : vector<8x32xf32>
    %c0_47 = arith.constant 0 : index
    %c0_48 = arith.constant 0 : index
    %134 = vector.load %arg10[%c0_47, %c0_48] : memref<32x64xf32, #tpu.memory_space<vmem>>, vector<32x64xf32>
    %cst_49 = arith.constant dense<0.000000e+00> : vector<8x64xf32>
    %135 = tpu.matmul %133, %134, %cst_49 {dimension_numbers = #tpu.dot_dimension_numbers<[1], [0], [0], [1], [0, 0, 1, 1], [], []>} : vector<8x32xf32>, vector<32x64xf32>, vector<8x64xf32> -> vector<8x64xf32>
    %c0_50 = arith.constant 0 : index
    %c0_51 = arith.constant 0 : index
    %136 = vector.load %arg11[%c0_50, %c0_51] : memref<1x64xf32, #tpu.memory_space<vmem>>, vector<1x64xf32>
    %137 = vector.broadcast %136 : vector<1x64xf32> to vector<8x64xf32>
    %138 = arith.addf %135, %137 : vector<8x64xf32>
    %cst_52 = arith.constant 5.000000e-01 : f32
    %139 = vector.broadcast %cst_52 : f32 to vector<8x64xf32>
    %140 = arith.mulf %139, %138 : vector<8x64xf32>
    %cst_53 = arith.constant 4.471500e-02 : f32
    %141 = vector.broadcast %cst_53 : f32 to vector<8x64xf32>
    %142 = arith.mulf %141, %138 : vector<8x64xf32>
    %143 = arith.mulf %142, %138 : vector<8x64xf32>
    %144 = arith.mulf %143, %138 : vector<8x64xf32>
    %145 = arith.addf %138, %144 : vector<8x64xf32>
    %cst_54 = arith.constant 0.797884583 : f32
    %146 = vector.broadcast %cst_54 : f32 to vector<8x64xf32>
    %147 = arith.mulf %146, %145 : vector<8x64xf32>
    %148 = math.tanh %147 : vector<8x64xf32>
    %cst_55 = arith.constant 1.000000e+00 : f32
    %149 = vector.broadcast %cst_55 : f32 to vector<8x64xf32>
    %150 = arith.addf %149, %148 : vector<8x64xf32>
    %151 = arith.mulf %140, %150 : vector<8x64xf32>
    %c0_56 = arith.constant 0 : index
    %c0_57 = arith.constant 0 : index
    %152 = vector.load %arg12[%c0_56, %c0_57] : memref<64x32xf32, #tpu.memory_space<vmem>>, vector<64x32xf32>
    %cst_58 = arith.constant dense<0.000000e+00> : vector<8x32xf32>
    %153 = tpu.matmul %151, %152, %cst_58 {dimension_numbers = #tpu.dot_dimension_numbers<[1], [0], [0], [1], [0, 0, 1, 1], [], []>} : vector<8x64xf32>, vector<64x32xf32>, vector<8x32xf32> -> vector<8x32xf32>
    %154 = arith.addf %109, %153 : vector<8x32xf32>
    %c0_59 = arith.constant 0 : index
    %c0_60 = arith.constant 0 : index
    %155 = vector.load %arg13[%c0_59, %c0_60] : memref<1x32xf32, #tpu.memory_space<vmem>>, vector<1x32xf32>
    %156 = vector.broadcast %155 : vector<1x32xf32> to vector<8x32xf32>
    %157 = arith.addf %154, %156 : vector<8x32xf32>
    %c0_61 = arith.constant 0 : index
    %c0_62 = arith.constant 0 : index
    %158 = vector.load %arg14[%c0_61, %c0_62] : memref<1x32xf32, #tpu.memory_space<vmem>>, vector<1x32xf32>
    %c0_63 = arith.constant 0 : index
    %c0_64 = arith.constant 0 : index
    %159 = vector.load %arg15[%c0_63, %c0_64] : memref<1x32xf32, #tpu.memory_space<vmem>>, vector<1x32xf32>
    %cst_65 = arith.constant dense<0.000000e+00> : vector<8xf32>
    %160 = vector.multi_reduction <add>, %157, %cst_65 [1] : vector<8x32xf32> to vector<8xf32>
    %161 = vector.shape_cast %160 : vector<8xf32> to vector<8x1xf32>
    %cst_66 = arith.constant 3.200000e+01 : f32
    %162 = vector.broadcast %cst_66 : f32 to vector<8x1xf32>
    %163 = arith.divf %161, %162 : vector<8x1xf32>
    %164 = vector.broadcast %163 : vector<8x1xf32> to vector<8x32xf32>
    %165 = arith.subf %157, %164 : vector<8x32xf32>
    %166 = arith.mulf %165, %165 : vector<8x32xf32>
    %cst_67 = arith.constant dense<0.000000e+00> : vector<8xf32>
    %167 = vector.multi_reduction <add>, %166, %cst_67 [1] : vector<8x32xf32> to vector<8xf32>
    %168 = vector.shape_cast %167 : vector<8xf32> to vector<8x1xf32>
    %cst_68 = arith.constant 3.200000e+01 : f32
    %169 = vector.broadcast %cst_68 : f32 to vector<8x1xf32>
    %170 = arith.divf %168, %169 : vector<8x1xf32>
    %171 = vector.broadcast %163 : vector<8x1xf32> to vector<8x32xf32>
    %172 = arith.subf %157, %171 : vector<8x32xf32>
    %cst_69 = arith.constant 9.99999974E-6 : f32
    %173 = vector.broadcast %cst_69 : f32 to vector<8x1xf32>
    %174 = arith.addf %170, %173 : vector<8x1xf32>
    %175 = math.rsqrt %174 : vector<8x1xf32>
    %176 = vector.broadcast %175 : vector<8x1xf32> to vector<8x32xf32>
    %177 = arith.mulf %172, %176 : vector<8x32xf32>
    %178 = vector.broadcast %158 : vector<1x32xf32> to vector<8x32xf32>
    %179 = arith.mulf %177, %178 : vector<8x32xf32>
    %180 = vector.broadcast %159 : vector<1x32xf32> to vector<8x32xf32>
    %181 = arith.addf %179, %180 : vector<8x32xf32>
    %c0_70 = arith.constant 0 : index
    %c0_71 = arith.constant 0 : index
    %c0_72 = arith.constant 0 : index
    %182 = vector.load %arg16[%c0_70, %c0_71, %c0_72] : memref<1x8x32xf32, #tpu.memory_space<vmem>>, vector<1x8x32xf32>
    %183 = vector.shape_cast %182 : vector<1x8x32xf32> to vector<8x32xf32>
    %184 = vector.shape_cast %181 : vector<8x32xf32> to vector<1x8x32xf32>
    tpu.vector_store %arg16[%c0_70, %c0_71, %c0_72], %184 {strides = array<i32>} : memref<1x8x32xf32, #tpu.memory_space<vmem>>, vector<1x8x32xf32>,
    return
  }
  func.func @transform_0(%arg0: i32) -> (i32, i32, i32) {
    %c0_i32 = arith.constant 0 : i32
    %c0_i32_0 = arith.constant 0 : i32
    %c0_i32_1 = arith.constant 0 : i32
    return %arg0, %c0_i32, %c0_i32_0 : i32, i32, i32
  }
  func.func @transform_1(%arg0: i32) -> (i32, i32, i32) {
    %c0_i32 = arith.constant 0 : i32
    %c0_i32_0 = arith.constant 0 : i32
    %c0_i32_1 = arith.constant 0 : i32
    return %arg0, %c0_i32, %c0_i32_0 : i32, i32, i32
  }
  func.func @transform_2(%arg0: i32) -> (i32, i32) {
    %c0_i32 = arith.constant 0 : i32
    %c0_i32_0 = arith.constant 0 : i32
    %c0_i32_1 = arith.constant 0 : i32
    return %c0_i32, %c0_i32_0 : i32, i32
  }
  func.func @transform_3(%arg0: i32) -> (i32, i32) {
    %c0_i32 = arith.constant 0 : i32
    %c0_i32_0 = arith.constant 0 : i32
    %c0_i32_1 = arith.constant 0 : i32
    return %c0_i32, %c0_i32_0 : i32, i32
  }
  func.func @transform_4(%arg0: i32) -> (i32, i32) {
    %c0_i32 = arith.constant 0 : i32
    %c0_i32_0 = arith.constant 0 : i32
    %c0_i32_1 = arith.constant 0 : i32
    return %c0_i32, %c0_i32_0 : i32, i32
  }
  func.func @transform_5(%arg0: i32) -> (i32, i32) {
    %c0_i32 = arith.constant 0 : i32
    %c0_i32_0 = arith.constant 0 : i32
    %c0_i32_1 = arith.constant 0 : i32
    return %c0_i32, %c0_i32_0 : i32, i32
  }
  func.func @transform_6(%arg0: i32) -> (i32, i32) {
    %c0_i32 = arith.constant 0 : i32
    %c0_i32_0 = arith.constant 0 : i32
    %c0_i32_1 = arith.constant 0 : i32
    return %c0_i32, %c0_i32_0 : i32, i32
  }
  func.func @transform_7(%arg0: i32) -> (i32, i32) {
    %c0_i32 = arith.constant 0 : i32
    %c0_i32_0 = arith.constant 0 : i32
    %c0_i32_1 = arith.constant 0 : i32
    return %c0_i32, %c0_i32_0 : i32, i32
  }
  func.func @transform_8(%arg0: i32) -> (i32, i32) {
    %c0_i32 = arith.constant 0 : i32
    %c0_i32_0 = arith.constant 0 : i32
    %c0_i32_1 = arith.constant 0 : i32
    return %c0_i32, %c0_i32_0 : i32, i32
  }
  func.func @transform_9(%arg0: i32) -> (i32, i32) {
    %c0_i32 = arith.constant 0 : i32
    %c0_i32_0 = arith.constant 0 : i32
    %c0_i32_1 = arith.constant 0 : i32
    return %c0_i32, %c0_i32_0 : i32, i32
  }
  func.func @transform_10(%arg0: i32) -> (i32, i32) {
    %c0_i32 = arith.constant 0 : i32
    %c0_i32_0 = arith.constant 0 : i32
    %c0_i32_1 = arith.constant 0 : i32
    return %c0_i32, %c0_i32_0 : i32, i32
  }
  func.func @transform_11(%arg0: i32) -> (i32, i32) {
    %c0_i32 = arith.constant 0 : i32
    %c0_i32_0 = arith.constant 0 : i32
    %c0_i32_1 = arith.constant 0 : i32
    return %c0_i32, %c0_i32_0 : i32, i32
  }
  func.func @transform_12(%arg0: i32) -> (i32, i32) {
    %c0_i32 = arith.constant 0 : i32
    %c0_i32_0 = arith.constant 0 : i32
    %c0_i32_1 = arith.constant 0 : i32
    return %c0_i32, %c0_i32_0 : i32, i32
  }
  func.func @transform_13(%arg0: i32) -> (i32, i32) {
    %c0_i32 = arith.constant 0 : i32
    %c0_i32_0 = arith.constant 0 : i32
    %c0_i32_1 = arith.constant 0 : i32
    return %c0_i32, %c0_i32_0 : i32, i32
  }
  func.func @transform_14(%arg0: i32) -> (i32, i32) {
    %c0_i32 = arith.constant 0 : i32
    %c0_i32_0 = arith.constant 0 : i32
    %c0_i32_1 = arith.constant 0 : i32
    return %c0_i32, %c0_i32_0 : i32, i32
  }
  func.func @transform_15(%arg0: i32) -> (i32, i32, i32) {
    %c0_i32 = arith.constant 0 : i32
    %c0_i32_0 = arith.constant 0 : i32
    %c0_i32_1 = arith.constant 0 : i32
    return %arg0, %c0_i32, %c0_i32_0 : i32, i32, i32
  }
}

module attributes {stable_mosaic.version = 11 : i64} {
  func.func @kernel(%arg0: i32, %arg1: memref<1x8x32xf32, #tpu.memory_space<vmem>>, %arg2: memref<1x8x32xf32, #tpu.memory_space<vmem>>, %arg3: memref<8x8xf32, #tpu.memory_space<vmem>>, %arg4: memref<1x1x8xf32, #tpu.memory_space<vmem>>, %arg5: memref<1x32xf32, #tpu.memory_space<vmem>>, %arg6: memref<1x32xf32, #tpu.memory_space<vmem>>, %arg7: memref<32x96xf32, #tpu.memory_space<vmem>>, %arg8: memref<32x32xf32, #tpu.memory_space<vmem>>, %arg9: memref<1x32xf32, #tpu.memory_space<vmem>>, %arg10: memref<1x32xf32, #tpu.memory_space<vmem>>, %arg11: memref<1x32xf32, #tpu.memory_space<vmem>>, %arg12: memref<32x32xf32, #tpu.memory_space<vmem>>, %arg13: memref<32x64xf32, #tpu.memory_space<vmem>>, %arg14: memref<32x32xf32, #tpu.memory_space<vmem>>, %arg15: memref<1x32xf32, #tpu.memory_space<vmem>>, %arg16: memref<1x32xf32, #tpu.memory_space<vmem>>, %arg17: memref<1x32xf32, #tpu.memory_space<vmem>>, %arg18: memref<32x64xf32, #tpu.memory_space<vmem>>, %arg19: memref<1x64xf32, #tpu.memory_space<vmem>>, %arg20: memref<64x32xf32, #tpu.memory_space<vmem>>, %arg21: memref<1x32xf32, #tpu.memory_space<vmem>>, %arg22: memref<1x8x32xf32, #tpu.memory_space<vmem>>) attributes {dimension_semantics = [#tpu.dimension_semantics<parallel>], iteration_bounds = array<i64: 2>, scalar_prefetch = 0 : i64, scratch_operands = 0 : i64, tpu.core_type = #tpu.core_type<tc>, window_params = [{transform_indices = @transform_0, window_bounds = array<i64: 1, 8, 32>}, {transform_indices = @transform_1, window_bounds = array<i64: 1, 8, 32>}, {pipeline_mode = #tpu.pipeline_mode<synchronous>, transform_indices = @transform_2, window_bounds = array<i64: 8, 8>}, {transform_indices = @transform_3, window_bounds = array<i64: 1, 1, 8>}, {pipeline_mode = #tpu.pipeline_mode<synchronous>, transform_indices = @transform_4, window_bounds = array<i64: 1, 32>}, {pipeline_mode = #tpu.pipeline_mode<synchronous>, transform_indices = @transform_5, window_bounds = array<i64: 1, 32>}, {pipeline_mode = #tpu.pipeline_mode<synchronous>, transform_indices = @transform_6, window_bounds = array<i64: 32, 96>}, {pipeline_mode = #tpu.pipeline_mode<synchronous>, transform_indices = @transform_7, window_bounds = array<i64: 32, 32>}, {pipeline_mode = #tpu.pipeline_mode<synchronous>, transform_indices = @transform_8, window_bounds = array<i64: 1, 32>}, {pipeline_mode = #tpu.pipeline_mode<synchronous>, transform_indices = @transform_9, window_bounds = array<i64: 1, 32>}, {pipeline_mode = #tpu.pipeline_mode<synchronous>, transform_indices = @transform_10, window_bounds = array<i64: 1, 32>}, {pipeline_mode = #tpu.pipeline_mode<synchronous>, transform_indices = @transform_11, window_bounds = array<i64: 32, 32>}, {pipeline_mode = #tpu.pipeline_mode<synchronous>, transform_indices = @transform_12, window_bounds = array<i64: 32, 64>}, {pipeline_mode = #tpu.pipeline_mode<synchronous>, transform_indices = @transform_13, window_bounds = array<i64: 32, 32>}, {pipeline_mode = #tpu.pipeline_mode<synchronous>, transform_indices = @transform_14, window_bounds = array<i64: 1, 32>}, {pipeline_mode = #tpu.pipeline_mode<synchronous>, transform_indices = @transform_15, window_bounds = array<i64: 1, 32>}, {pipeline_mode = #tpu.pipeline_mode<synchronous>, transform_indices = @transform_16, window_bounds = array<i64: 1, 32>}, {pipeline_mode = #tpu.pipeline_mode<synchronous>, transform_indices = @transform_17, window_bounds = array<i64: 32, 64>}, {pipeline_mode = #tpu.pipeline_mode<synchronous>, transform_indices = @transform_18, window_bounds = array<i64: 1, 64>}, {pipeline_mode = #tpu.pipeline_mode<synchronous>, transform_indices = @transform_19, window_bounds = array<i64: 64, 32>}, {pipeline_mode = #tpu.pipeline_mode<synchronous>, transform_indices = @transform_20, window_bounds = array<i64: 1, 32>}, {transform_indices = @transform_21, window_bounds = array<i64: 1, 8, 32>}]} {
    %c0 = arith.constant 0 : index
    %c0_0 = arith.constant 0 : index
    %c0_1 = arith.constant 0 : index
    %0 = vector.load %arg1[%c0, %c0_0, %c0_1] : memref<1x8x32xf32, #tpu.memory_space<vmem>>, vector<1x8x32xf32>
    %1 = vector.shape_cast %0 : vector<1x8x32xf32> to vector<8x32xf32>
    %c0_2 = arith.constant 0 : index
    %c0_3 = arith.constant 0 : index
    %c0_4 = arith.constant 0 : index
    %2 = vector.load %arg2[%c0_2, %c0_3, %c0_4] : memref<1x8x32xf32, #tpu.memory_space<vmem>>, vector<1x8x32xf32>
    %3 = vector.shape_cast %2 : vector<1x8x32xf32> to vector<8x32xf32>
    %c0_5 = arith.constant 0 : index
    %c0_6 = arith.constant 0 : index
    %4 = vector.load %arg3[%c0_5, %c0_6] : memref<8x8xf32, #tpu.memory_space<vmem>>, vector<8x8xf32>
    %c0_7 = arith.constant 0 : index
    %c0_8 = arith.constant 0 : index
    %c0_9 = arith.constant 0 : index
    %5 = vector.load %arg4[%c0_7, %c0_8, %c0_9] : memref<1x1x8xf32, #tpu.memory_space<vmem>>, vector<1x1x8xf32>
    %6 = vector.shape_cast %5 : vector<1x1x8xf32> to vector<1x8xf32>
    %c0_10 = arith.constant 0 : index
    %c0_11 = arith.constant 0 : index
    %7 = vector.load %arg5[%c0_10, %c0_11] : memref<1x32xf32, #tpu.memory_space<vmem>>, vector<1x32xf32>
    %c0_12 = arith.constant 0 : index
    %c0_13 = arith.constant 0 : index
    %8 = vector.load %arg6[%c0_12, %c0_13] : memref<1x32xf32, #tpu.memory_space<vmem>>, vector<1x32xf32>
    %cst = arith.constant dense<0.000000e+00> : vector<8xf32>
    %9 = vector.multi_reduction <add>, %1, %cst [1] : vector<8x32xf32> to vector<8xf32>
    %10 = vector.shape_cast %9 : vector<8xf32> to vector<8x1xf32>
    %cst_14 = arith.constant 3.200000e+01 : f32
    %11 = vector.broadcast %cst_14 : f32 to vector<8x1xf32>
    %12 = arith.divf %10, %11 : vector<8x1xf32>
    %13 = vector.broadcast %12 : vector<8x1xf32> to vector<8x32xf32>
    %14 = arith.subf %1, %13 : vector<8x32xf32>
    %15 = arith.mulf %14, %14 : vector<8x32xf32>
    %cst_15 = arith.constant dense<0.000000e+00> : vector<8xf32>
    %16 = vector.multi_reduction <add>, %15, %cst_15 [1] : vector<8x32xf32> to vector<8xf32>
    %17 = vector.shape_cast %16 : vector<8xf32> to vector<8x1xf32>
    %cst_16 = arith.constant 3.200000e+01 : f32
    %18 = vector.broadcast %cst_16 : f32 to vector<8x1xf32>
    %19 = arith.divf %17, %18 : vector<8x1xf32>
    %20 = vector.broadcast %12 : vector<8x1xf32> to vector<8x32xf32>
    %21 = arith.subf %1, %20 : vector<8x32xf32>
    %cst_17 = arith.constant 9.99999974E-6 : f32
    %22 = vector.broadcast %cst_17 : f32 to vector<8x1xf32>
    %23 = arith.addf %19, %22 : vector<8x1xf32>
    %24 = math.rsqrt %23 : vector<8x1xf32>
    %25 = vector.broadcast %24 : vector<8x1xf32> to vector<8x32xf32>
    %26 = arith.mulf %21, %25 : vector<8x32xf32>
    %27 = vector.broadcast %7 : vector<1x32xf32> to vector<8x32xf32>
    %28 = arith.mulf %26, %27 : vector<8x32xf32>
    %29 = vector.broadcast %8 : vector<1x32xf32> to vector<8x32xf32>
    %30 = arith.addf %28, %29 : vector<8x32xf32>
    %c0_18 = arith.constant 0 : index
    %c0_19 = arith.constant 0 : index
    %31 = vector.load %arg7[%c0_18, %c0_19] : memref<32x96xf32, #tpu.memory_space<vmem>>, vector<32x96xf32>
    %cst_20 = arith.constant dense<0.000000e+00> : vector<8x96xf32>
    %32 = tpu.matmul %30, %31, %cst_20 {dimension_numbers = #tpu.dot_dimension_numbers<[1], [0], [0], [1], [0, 0, 1, 1], [], []>} : vector<8x32xf32>, vector<32x96xf32>, vector<8x96xf32> -> vector<8x96xf32>
    %33 = vector.extract_strided_slice %32 {offsets = [0, 0], sizes = [8, 32], strides = [1, 1]} : vector<8x96xf32> to vector<8x32xf32>
    %cst_21 = arith.constant 0.353553385 : f32
    %34 = vector.broadcast %cst_21 : f32 to vector<8x32xf32>
    %35 = arith.mulf %33, %34 : vector<8x32xf32>
    %36 = vector.extract_strided_slice %32 {offsets = [0, 32], sizes = [8, 32], strides = [1, 1]} : vector<8x96xf32> to vector<8x32xf32>
    %37 = vector.extract_strided_slice %32 {offsets = [0, 64], sizes = [8, 32], strides = [1, 1]} : vector<8x96xf32> to vector<8x32xf32>
    %c0_22 = arith.constant 0 : index
    %c0_23 = arith.constant 0 : index
    %38 = vector.load %arg8[%c0_22, %c0_23] : memref<32x32xf32, #tpu.memory_space<vmem>>, vector<32x32xf32>
    %c0_24 = arith.constant 0 : index
    %c0_25 = arith.constant 0 : index
    %39 = vector.load %arg9[%c0_24, %c0_25] : memref<1x32xf32, #tpu.memory_space<vmem>>, vector<1x32xf32>
    %40 = vector.extract_strided_slice %35 {offsets = [0, 0], sizes = [8, 8], strides = [1, 1]} : vector<8x32xf32> to vector<8x8xf32>
    %41 = vector.extract_strided_slice %36 {offsets = [0, 0], sizes = [8, 8], strides = [1, 1]} : vector<8x32xf32> to vector<8x8xf32>
    %cst_26 = arith.constant dense<0.000000e+00> : vector<8x8xf32>
    %42 = tpu.matmul %40, %41, %cst_26 {dimension_numbers = #tpu.dot_dimension_numbers<[1], [1], [0], [0], [0, 0, 1, 0], [], []>} : vector<8x8xf32>, vector<8x8xf32>, vector<8x8xf32> -> vector<8x8xf32>
    %43 = arith.addf %42, %4 : vector<8x8xf32>
    %cst_27 = arith.constant dense<0xFF800000> : vector<8xf32>
    %44 = vector.multi_reduction <maximumf>, %43, %cst_27 [1] : vector<8x8xf32> to vector<8xf32>
    %45 = vector.shape_cast %44 : vector<8xf32> to vector<8x1xf32>
    %46 = vector.broadcast %45 : vector<8x1xf32> to vector<8x8xf32>
    %47 = arith.subf %43, %46 : vector<8x8xf32>
    %48 = math.exp %47 : vector<8x8xf32>
    %cst_28 = arith.constant dense<0.000000e+00> : vector<8xf32>
    %49 = vector.multi_reduction <add>, %48, %cst_28 [1] : vector<8x8xf32> to vector<8xf32>
    %50 = vector.shape_cast %49 : vector<8xf32> to vector<8x1xf32>
    %51 = tpu.reciprocal %50 {approx = true} : vector<8x1xf32> -> vector<8x1xf32>
    %52 = vector.broadcast %51 : vector<8x1xf32> to vector<8x8xf32>
    %53 = arith.mulf %48, %52 : vector<8x8xf32>
    %54 = vector.extract_strided_slice %37 {offsets = [0, 0], sizes = [8, 8], strides = [1, 1]} : vector<8x32xf32> to vector<8x8xf32>
    %cst_29 = arith.constant dense<0.000000e+00> : vector<8x8xf32>
    %55 = tpu.matmul %53, %54, %cst_29 {dimension_numbers = #tpu.dot_dimension_numbers<[1], [0], [0], [1], [0, 0, 1, 1], [], []>} : vector<8x8xf32>, vector<8x8xf32>, vector<8x8xf32> -> vector<8x8xf32>
    %56 = vector.extract_strided_slice %35 {offsets = [0, 8], sizes = [8, 8], strides = [1, 1]} : vector<8x32xf32> to vector<8x8xf32>
    %57 = vector.extract_strided_slice %36 {offsets = [0, 8], sizes = [8, 8], strides = [1, 1]} : vector<8x32xf32> to vector<8x8xf32>
    %cst_30 = arith.constant dense<0.000000e+00> : vector<8x8xf32>
    %58 = tpu.matmul %56, %57, %cst_30 {dimension_numbers = #tpu.dot_dimension_numbers<[1], [1], [0], [0], [0, 0, 1, 0], [], []>} : vector<8x8xf32>, vector<8x8xf32>, vector<8x8xf32> -> vector<8x8xf32>
    %59 = arith.addf %58, %4 : vector<8x8xf32>
    %cst_31 = arith.constant dense<0xFF800000> : vector<8xf32>
    %60 = vector.multi_reduction <maximumf>, %59, %cst_31 [1] : vector<8x8xf32> to vector<8xf32>
    %61 = vector.shape_cast %60 : vector<8xf32> to vector<8x1xf32>
    %62 = vector.broadcast %61 : vector<8x1xf32> to vector<8x8xf32>
    %63 = arith.subf %59, %62 : vector<8x8xf32>
    %64 = math.exp %63 : vector<8x8xf32>
    %cst_32 = arith.constant dense<0.000000e+00> : vector<8xf32>
    %65 = vector.multi_reduction <add>, %64, %cst_32 [1] : vector<8x8xf32> to vector<8xf32>
    %66 = vector.shape_cast %65 : vector<8xf32> to vector<8x1xf32>
    %67 = tpu.reciprocal %66 {approx = true} : vector<8x1xf32> -> vector<8x1xf32>
    %68 = vector.broadcast %67 : vector<8x1xf32> to vector<8x8xf32>
    %69 = arith.mulf %64, %68 : vector<8x8xf32>
    %70 = vector.extract_strided_slice %37 {offsets = [0, 8], sizes = [8, 8], strides = [1, 1]} : vector<8x32xf32> to vector<8x8xf32>
    %cst_33 = arith.constant dense<0.000000e+00> : vector<8x8xf32>
    %71 = tpu.matmul %69, %70, %cst_33 {dimension_numbers = #tpu.dot_dimension_numbers<[1], [0], [0], [1], [0, 0, 1, 1], [], []>} : vector<8x8xf32>, vector<8x8xf32>, vector<8x8xf32> -> vector<8x8xf32>
    %72 = vector.extract_strided_slice %35 {offsets = [0, 16], sizes = [8, 8], strides = [1, 1]} : vector<8x32xf32> to vector<8x8xf32>
    %73 = vector.extract_strided_slice %36 {offsets = [0, 16], sizes = [8, 8], strides = [1, 1]} : vector<8x32xf32> to vector<8x8xf32>
    %cst_34 = arith.constant dense<0.000000e+00> : vector<8x8xf32>
    %74 = tpu.matmul %72, %73, %cst_34 {dimension_numbers = #tpu.dot_dimension_numbers<[1], [1], [0], [0], [0, 0, 1, 0], [], []>} : vector<8x8xf32>, vector<8x8xf32>, vector<8x8xf32> -> vector<8x8xf32>
    %75 = arith.addf %74, %4 : vector<8x8xf32>
    %cst_35 = arith.constant dense<0xFF800000> : vector<8xf32>
    %76 = vector.multi_reduction <maximumf>, %75, %cst_35 [1] : vector<8x8xf32> to vector<8xf32>
    %77 = vector.shape_cast %76 : vector<8xf32> to vector<8x1xf32>
    %78 = vector.broadcast %77 : vector<8x1xf32> to vector<8x8xf32>
    %79 = arith.subf %75, %78 : vector<8x8xf32>
    %80 = math.exp %79 : vector<8x8xf32>
    %cst_36 = arith.constant dense<0.000000e+00> : vector<8xf32>
    %81 = vector.multi_reduction <add>, %80, %cst_36 [1] : vector<8x8xf32> to vector<8xf32>
    %82 = vector.shape_cast %81 : vector<8xf32> to vector<8x1xf32>
    %83 = tpu.reciprocal %82 {approx = true} : vector<8x1xf32> -> vector<8x1xf32>
    %84 = vector.broadcast %83 : vector<8x1xf32> to vector<8x8xf32>
    %85 = arith.mulf %80, %84 : vector<8x8xf32>
    %86 = vector.extract_strided_slice %37 {offsets = [0, 16], sizes = [8, 8], strides = [1, 1]} : vector<8x32xf32> to vector<8x8xf32>
    %cst_37 = arith.constant dense<0.000000e+00> : vector<8x8xf32>
    %87 = tpu.matmul %85, %86, %cst_37 {dimension_numbers = #tpu.dot_dimension_numbers<[1], [0], [0], [1], [0, 0, 1, 1], [], []>} : vector<8x8xf32>, vector<8x8xf32>, vector<8x8xf32> -> vector<8x8xf32>
    %88 = vector.extract_strided_slice %35 {offsets = [0, 24], sizes = [8, 8], strides = [1, 1]} : vector<8x32xf32> to vector<8x8xf32>
    %89 = vector.extract_strided_slice %36 {offsets = [0, 24], sizes = [8, 8], strides = [1, 1]} : vector<8x32xf32> to vector<8x8xf32>
    %cst_38 = arith.constant dense<0.000000e+00> : vector<8x8xf32>
    %90 = tpu.matmul %88, %89, %cst_38 {dimension_numbers = #tpu.dot_dimension_numbers<[1], [1], [0], [0], [0, 0, 1, 0], [], []>} : vector<8x8xf32>, vector<8x8xf32>, vector<8x8xf32> -> vector<8x8xf32>
    %91 = arith.addf %90, %4 : vector<8x8xf32>
    %cst_39 = arith.constant dense<0xFF800000> : vector<8xf32>
    %92 = vector.multi_reduction <maximumf>, %91, %cst_39 [1] : vector<8x8xf32> to vector<8xf32>
    %93 = vector.shape_cast %92 : vector<8xf32> to vector<8x1xf32>
    %94 = vector.broadcast %93 : vector<8x1xf32> to vector<8x8xf32>
    %95 = arith.subf %91, %94 : vector<8x8xf32>
    %96 = math.exp %95 : vector<8x8xf32>
    %cst_40 = arith.constant dense<0.000000e+00> : vector<8xf32>
    %97 = vector.multi_reduction <add>, %96, %cst_40 [1] : vector<8x8xf32> to vector<8xf32>
    %98 = vector.shape_cast %97 : vector<8xf32> to vector<8x1xf32>
    %99 = tpu.reciprocal %98 {approx = true} : vector<8x1xf32> -> vector<8x1xf32>
    %100 = vector.broadcast %99 : vector<8x1xf32> to vector<8x8xf32>
    %101 = arith.mulf %96, %100 : vector<8x8xf32>
    %102 = vector.extract_strided_slice %37 {offsets = [0, 24], sizes = [8, 8], strides = [1, 1]} : vector<8x32xf32> to vector<8x8xf32>
    %cst_41 = arith.constant dense<0.000000e+00> : vector<8x8xf32>
    %103 = tpu.matmul %101, %102, %cst_41 {dimension_numbers = #tpu.dot_dimension_numbers<[1], [0], [0], [1], [0, 0, 1, 1], [], []>} : vector<8x8xf32>, vector<8x8xf32>, vector<8x8xf32> -> vector<8x8xf32>
    %104 = tpu.concatenate %55, %71, %87, %103 in 1 : vector<8x8xf32>, vector<8x8xf32>, vector<8x8xf32>, vector<8x8xf32> -> vector<8x32xf32>
    %cst_42 = arith.constant dense<0.000000e+00> : vector<8x32xf32>
    %105 = tpu.matmul %104, %38, %cst_42 {dimension_numbers = #tpu.dot_dimension_numbers<[1], [0], [0], [1], [0, 0, 1, 1], [], []>} : vector<8x32xf32>, vector<32x32xf32>, vector<8x32xf32> -> vector<8x32xf32>
    %106 = vector.broadcast %39 : vector<1x32xf32> to vector<8x32xf32>
    %107 = arith.addf %105, %106 : vector<8x32xf32>
    %108 = arith.addf %1, %107 : vector<8x32xf32>
    %c0_43 = arith.constant 0 : index
    %c0_44 = arith.constant 0 : index
    %109 = vector.load %arg10[%c0_43, %c0_44] : memref<1x32xf32, #tpu.memory_space<vmem>>, vector<1x32xf32>
    %c0_45 = arith.constant 0 : index
    %c0_46 = arith.constant 0 : index
    %110 = vector.load %arg11[%c0_45, %c0_46] : memref<1x32xf32, #tpu.memory_space<vmem>>, vector<1x32xf32>
    %cst_47 = arith.constant dense<0.000000e+00> : vector<8xf32>
    %111 = vector.multi_reduction <add>, %108, %cst_47 [1] : vector<8x32xf32> to vector<8xf32>
    %112 = vector.shape_cast %111 : vector<8xf32> to vector<8x1xf32>
    %cst_48 = arith.constant 3.200000e+01 : f32
    %113 = vector.broadcast %cst_48 : f32 to vector<8x1xf32>
    %114 = arith.divf %112, %113 : vector<8x1xf32>
    %115 = vector.broadcast %114 : vector<8x1xf32> to vector<8x32xf32>
    %116 = arith.subf %108, %115 : vector<8x32xf32>
    %117 = arith.mulf %116, %116 : vector<8x32xf32>
    %cst_49 = arith.constant dense<0.000000e+00> : vector<8xf32>
    %118 = vector.multi_reduction <add>, %117, %cst_49 [1] : vector<8x32xf32> to vector<8xf32>
    %119 = vector.shape_cast %118 : vector<8xf32> to vector<8x1xf32>
    %cst_50 = arith.constant 3.200000e+01 : f32
    %120 = vector.broadcast %cst_50 : f32 to vector<8x1xf32>
    %121 = arith.divf %119, %120 : vector<8x1xf32>
    %122 = vector.broadcast %114 : vector<8x1xf32> to vector<8x32xf32>
    %123 = arith.subf %108, %122 : vector<8x32xf32>
    %cst_51 = arith.constant 9.99999974E-6 : f32
    %124 = vector.broadcast %cst_51 : f32 to vector<8x1xf32>
    %125 = arith.addf %121, %124 : vector<8x1xf32>
    %126 = math.rsqrt %125 : vector<8x1xf32>
    %127 = vector.broadcast %126 : vector<8x1xf32> to vector<8x32xf32>
    %128 = arith.mulf %123, %127 : vector<8x32xf32>
    %129 = vector.broadcast %109 : vector<1x32xf32> to vector<8x32xf32>
    %130 = arith.mulf %128, %129 : vector<8x32xf32>
    %131 = vector.broadcast %110 : vector<1x32xf32> to vector<8x32xf32>
    %132 = arith.addf %130, %131 : vector<8x32xf32>
    %c0_52 = arith.constant 0 : index
    %c0_53 = arith.constant 0 : index
    %133 = vector.load %arg12[%c0_52, %c0_53] : memref<32x32xf32, #tpu.memory_space<vmem>>, vector<32x32xf32>
    %cst_54 = arith.constant dense<0.000000e+00> : vector<8x32xf32>
    %134 = tpu.matmul %132, %133, %cst_54 {dimension_numbers = #tpu.dot_dimension_numbers<[1], [0], [0], [1], [0, 0, 1, 1], [], []>} : vector<8x32xf32>, vector<32x32xf32>, vector<8x32xf32> -> vector<8x32xf32>
    %cst_55 = arith.constant 0.353553385 : f32
    %135 = vector.broadcast %cst_55 : f32 to vector<8x32xf32>
    %136 = arith.mulf %134, %135 : vector<8x32xf32>
    %c0_56 = arith.constant 0 : index
    %c0_57 = arith.constant 0 : index
    %137 = vector.load %arg13[%c0_56, %c0_57] : memref<32x64xf32, #tpu.memory_space<vmem>>, vector<32x64xf32>
    %cst_58 = arith.constant dense<0.000000e+00> : vector<8x64xf32>
    %138 = tpu.matmul %3, %137, %cst_58 {dimension_numbers = #tpu.dot_dimension_numbers<[1], [0], [0], [1], [0, 0, 1, 1], [], []>} : vector<8x32xf32>, vector<32x64xf32>, vector<8x64xf32> -> vector<8x64xf32>
    %139 = vector.extract_strided_slice %138 {offsets = [0, 0], sizes = [8, 32], strides = [1, 1]} : vector<8x64xf32> to vector<8x32xf32>
    %140 = vector.extract_strided_slice %138 {offsets = [0, 32], sizes = [8, 32], strides = [1, 1]} : vector<8x64xf32> to vector<8x32xf32>
    %c0_59 = arith.constant 0 : index
    %c0_60 = arith.constant 0 : index
    %141 = vector.load %arg14[%c0_59, %c0_60] : memref<32x32xf32, #tpu.memory_space<vmem>>, vector<32x32xf32>
    %c0_61 = arith.constant 0 : index
    %c0_62 = arith.constant 0 : index
    %142 = vector.load %arg15[%c0_61, %c0_62] : memref<1x32xf32, #tpu.memory_space<vmem>>, vector<1x32xf32>
    %143 = vector.extract_strided_slice %136 {offsets = [0, 0], sizes = [8, 8], strides = [1, 1]} : vector<8x32xf32> to vector<8x8xf32>
    %144 = vector.extract_strided_slice %139 {offsets = [0, 0], sizes = [8, 8], strides = [1, 1]} : vector<8x32xf32> to vector<8x8xf32>
    %cst_63 = arith.constant dense<0.000000e+00> : vector<8x8xf32>
    %145 = tpu.matmul %143, %144, %cst_63 {dimension_numbers = #tpu.dot_dimension_numbers<[1], [1], [0], [0], [0, 0, 1, 0], [], []>} : vector<8x8xf32>, vector<8x8xf32>, vector<8x8xf32> -> vector<8x8xf32>
    %146 = vector.broadcast %6 : vector<1x8xf32> to vector<8x8xf32>
    %147 = arith.addf %145, %146 : vector<8x8xf32>
    %cst_64 = arith.constant dense<0xFF800000> : vector<8xf32>
    %148 = vector.multi_reduction <maximumf>, %147, %cst_64 [1] : vector<8x8xf32> to vector<8xf32>
    %149 = vector.shape_cast %148 : vector<8xf32> to vector<8x1xf32>
    %150 = vector.broadcast %149 : vector<8x1xf32> to vector<8x8xf32>
    %151 = arith.subf %147, %150 : vector<8x8xf32>
    %152 = math.exp %151 : vector<8x8xf32>
    %cst_65 = arith.constant dense<0.000000e+00> : vector<8xf32>
    %153 = vector.multi_reduction <add>, %152, %cst_65 [1] : vector<8x8xf32> to vector<8xf32>
    %154 = vector.shape_cast %153 : vector<8xf32> to vector<8x1xf32>
    %155 = tpu.reciprocal %154 {approx = true} : vector<8x1xf32> -> vector<8x1xf32>
    %156 = vector.broadcast %155 : vector<8x1xf32> to vector<8x8xf32>
    %157 = arith.mulf %152, %156 : vector<8x8xf32>
    %158 = vector.extract_strided_slice %140 {offsets = [0, 0], sizes = [8, 8], strides = [1, 1]} : vector<8x32xf32> to vector<8x8xf32>
    %cst_66 = arith.constant dense<0.000000e+00> : vector<8x8xf32>
    %159 = tpu.matmul %157, %158, %cst_66 {dimension_numbers = #tpu.dot_dimension_numbers<[1], [0], [0], [1], [0, 0, 1, 1], [], []>} : vector<8x8xf32>, vector<8x8xf32>, vector<8x8xf32> -> vector<8x8xf32>
    %160 = vector.extract_strided_slice %136 {offsets = [0, 8], sizes = [8, 8], strides = [1, 1]} : vector<8x32xf32> to vector<8x8xf32>
    %161 = vector.extract_strided_slice %139 {offsets = [0, 8], sizes = [8, 8], strides = [1, 1]} : vector<8x32xf32> to vector<8x8xf32>
    %cst_67 = arith.constant dense<0.000000e+00> : vector<8x8xf32>
    %162 = tpu.matmul %160, %161, %cst_67 {dimension_numbers = #tpu.dot_dimension_numbers<[1], [1], [0], [0], [0, 0, 1, 0], [], []>} : vector<8x8xf32>, vector<8x8xf32>, vector<8x8xf32> -> vector<8x8xf32>
    %163 = vector.broadcast %6 : vector<1x8xf32> to vector<8x8xf32>
    %164 = arith.addf %162, %163 : vector<8x8xf32>
    %cst_68 = arith.constant dense<0xFF800000> : vector<8xf32>
    %165 = vector.multi_reduction <maximumf>, %164, %cst_68 [1] : vector<8x8xf32> to vector<8xf32>
    %166 = vector.shape_cast %165 : vector<8xf32> to vector<8x1xf32>
    %167 = vector.broadcast %166 : vector<8x1xf32> to vector<8x8xf32>
    %168 = arith.subf %164, %167 : vector<8x8xf32>
    %169 = math.exp %168 : vector<8x8xf32>
    %cst_69 = arith.constant dense<0.000000e+00> : vector<8xf32>
    %170 = vector.multi_reduction <add>, %169, %cst_69 [1] : vector<8x8xf32> to vector<8xf32>
    %171 = vector.shape_cast %170 : vector<8xf32> to vector<8x1xf32>
    %172 = tpu.reciprocal %171 {approx = true} : vector<8x1xf32> -> vector<8x1xf32>
    %173 = vector.broadcast %172 : vector<8x1xf32> to vector<8x8xf32>
    %174 = arith.mulf %169, %173 : vector<8x8xf32>
    %175 = vector.extract_strided_slice %140 {offsets = [0, 8], sizes = [8, 8], strides = [1, 1]} : vector<8x32xf32> to vector<8x8xf32>
    %cst_70 = arith.constant dense<0.000000e+00> : vector<8x8xf32>
    %176 = tpu.matmul %174, %175, %cst_70 {dimension_numbers = #tpu.dot_dimension_numbers<[1], [0], [0], [1], [0, 0, 1, 1], [], []>} : vector<8x8xf32>, vector<8x8xf32>, vector<8x8xf32> -> vector<8x8xf32>
    %177 = vector.extract_strided_slice %136 {offsets = [0, 16], sizes = [8, 8], strides = [1, 1]} : vector<8x32xf32> to vector<8x8xf32>
    %178 = vector.extract_strided_slice %139 {offsets = [0, 16], sizes = [8, 8], strides = [1, 1]} : vector<8x32xf32> to vector<8x8xf32>
    %cst_71 = arith.constant dense<0.000000e+00> : vector<8x8xf32>
    %179 = tpu.matmul %177, %178, %cst_71 {dimension_numbers = #tpu.dot_dimension_numbers<[1], [1], [0], [0], [0, 0, 1, 0], [], []>} : vector<8x8xf32>, vector<8x8xf32>, vector<8x8xf32> -> vector<8x8xf32>
    %180 = vector.broadcast %6 : vector<1x8xf32> to vector<8x8xf32>
    %181 = arith.addf %179, %180 : vector<8x8xf32>
    %cst_72 = arith.constant dense<0xFF800000> : vector<8xf32>
    %182 = vector.multi_reduction <maximumf>, %181, %cst_72 [1] : vector<8x8xf32> to vector<8xf32>
    %183 = vector.shape_cast %182 : vector<8xf32> to vector<8x1xf32>
    %184 = vector.broadcast %183 : vector<8x1xf32> to vector<8x8xf32>
    %185 = arith.subf %181, %184 : vector<8x8xf32>
    %186 = math.exp %185 : vector<8x8xf32>
    %cst_73 = arith.constant dense<0.000000e+00> : vector<8xf32>
    %187 = vector.multi_reduction <add>, %186, %cst_73 [1] : vector<8x8xf32> to vector<8xf32>
    %188 = vector.shape_cast %187 : vector<8xf32> to vector<8x1xf32>
    %189 = tpu.reciprocal %188 {approx = true} : vector<8x1xf32> -> vector<8x1xf32>
    %190 = vector.broadcast %189 : vector<8x1xf32> to vector<8x8xf32>
    %191 = arith.mulf %186, %190 : vector<8x8xf32>
    %192 = vector.extract_strided_slice %140 {offsets = [0, 16], sizes = [8, 8], strides = [1, 1]} : vector<8x32xf32> to vector<8x8xf32>
    %cst_74 = arith.constant dense<0.000000e+00> : vector<8x8xf32>
    %193 = tpu.matmul %191, %192, %cst_74 {dimension_numbers = #tpu.dot_dimension_numbers<[1], [0], [0], [1], [0, 0, 1, 1], [], []>} : vector<8x8xf32>, vector<8x8xf32>, vector<8x8xf32> -> vector<8x8xf32>
    %194 = vector.extract_strided_slice %136 {offsets = [0, 24], sizes = [8, 8], strides = [1, 1]} : vector<8x32xf32> to vector<8x8xf32>
    %195 = vector.extract_strided_slice %139 {offsets = [0, 24], sizes = [8, 8], strides = [1, 1]} : vector<8x32xf32> to vector<8x8xf32>
    %cst_75 = arith.constant dense<0.000000e+00> : vector<8x8xf32>
    %196 = tpu.matmul %194, %195, %cst_75 {dimension_numbers = #tpu.dot_dimension_numbers<[1], [1], [0], [0], [0, 0, 1, 0], [], []>} : vector<8x8xf32>, vector<8x8xf32>, vector<8x8xf32> -> vector<8x8xf32>
    %197 = vector.broadcast %6 : vector<1x8xf32> to vector<8x8xf32>
    %198 = arith.addf %196, %197 : vector<8x8xf32>
    %cst_76 = arith.constant dense<0xFF800000> : vector<8xf32>
    %199 = vector.multi_reduction <maximumf>, %198, %cst_76 [1] : vector<8x8xf32> to vector<8xf32>
    %200 = vector.shape_cast %199 : vector<8xf32> to vector<8x1xf32>
    %201 = vector.broadcast %200 : vector<8x1xf32> to vector<8x8xf32>
    %202 = arith.subf %198, %201 : vector<8x8xf32>
    %203 = math.exp %202 : vector<8x8xf32>
    %cst_77 = arith.constant dense<0.000000e+00> : vector<8xf32>
    %204 = vector.multi_reduction <add>, %203, %cst_77 [1] : vector<8x8xf32> to vector<8xf32>
    %205 = vector.shape_cast %204 : vector<8xf32> to vector<8x1xf32>
    %206 = tpu.reciprocal %205 {approx = true} : vector<8x1xf32> -> vector<8x1xf32>
    %207 = vector.broadcast %206 : vector<8x1xf32> to vector<8x8xf32>
    %208 = arith.mulf %203, %207 : vector<8x8xf32>
    %209 = vector.extract_strided_slice %140 {offsets = [0, 24], sizes = [8, 8], strides = [1, 1]} : vector<8x32xf32> to vector<8x8xf32>
    %cst_78 = arith.constant dense<0.000000e+00> : vector<8x8xf32>
    %210 = tpu.matmul %208, %209, %cst_78 {dimension_numbers = #tpu.dot_dimension_numbers<[1], [0], [0], [1], [0, 0, 1, 1], [], []>} : vector<8x8xf32>, vector<8x8xf32>, vector<8x8xf32> -> vector<8x8xf32>
    %211 = tpu.concatenate %159, %176, %193, %210 in 1 : vector<8x8xf32>, vector<8x8xf32>, vector<8x8xf32>, vector<8x8xf32> -> vector<8x32xf32>
    %cst_79 = arith.constant dense<0.000000e+00> : vector<8x32xf32>
    %212 = tpu.matmul %211, %141, %cst_79 {dimension_numbers = #tpu.dot_dimension_numbers<[1], [0], [0], [1], [0, 0, 1, 1], [], []>} : vector<8x32xf32>, vector<32x32xf32>, vector<8x32xf32> -> vector<8x32xf32>
    %213 = vector.broadcast %142 : vector<1x32xf32> to vector<8x32xf32>
    %214 = arith.addf %212, %213 : vector<8x32xf32>
    %215 = arith.addf %108, %214 : vector<8x32xf32>
    %c0_80 = arith.constant 0 : index
    %c0_81 = arith.constant 0 : index
    %216 = vector.load %arg16[%c0_80, %c0_81] : memref<1x32xf32, #tpu.memory_space<vmem>>, vector<1x32xf32>
    %c0_82 = arith.constant 0 : index
    %c0_83 = arith.constant 0 : index
    %217 = vector.load %arg17[%c0_82, %c0_83] : memref<1x32xf32, #tpu.memory_space<vmem>>, vector<1x32xf32>
    %cst_84 = arith.constant dense<0.000000e+00> : vector<8xf32>
    %218 = vector.multi_reduction <add>, %215, %cst_84 [1] : vector<8x32xf32> to vector<8xf32>
    %219 = vector.shape_cast %218 : vector<8xf32> to vector<8x1xf32>
    %cst_85 = arith.constant 3.200000e+01 : f32
    %220 = vector.broadcast %cst_85 : f32 to vector<8x1xf32>
    %221 = arith.divf %219, %220 : vector<8x1xf32>
    %222 = vector.broadcast %221 : vector<8x1xf32> to vector<8x32xf32>
    %223 = arith.subf %215, %222 : vector<8x32xf32>
    %224 = arith.mulf %223, %223 : vector<8x32xf32>
    %cst_86 = arith.constant dense<0.000000e+00> : vector<8xf32>
    %225 = vector.multi_reduction <add>, %224, %cst_86 [1] : vector<8x32xf32> to vector<8xf32>
    %226 = vector.shape_cast %225 : vector<8xf32> to vector<8x1xf32>
    %cst_87 = arith.constant 3.200000e+01 : f32
    %227 = vector.broadcast %cst_87 : f32 to vector<8x1xf32>
    %228 = arith.divf %226, %227 : vector<8x1xf32>
    %229 = vector.broadcast %221 : vector<8x1xf32> to vector<8x32xf32>
    %230 = arith.subf %215, %229 : vector<8x32xf32>
    %cst_88 = arith.constant 9.99999974E-6 : f32
    %231 = vector.broadcast %cst_88 : f32 to vector<8x1xf32>
    %232 = arith.addf %228, %231 : vector<8x1xf32>
    %233 = math.rsqrt %232 : vector<8x1xf32>
    %234 = vector.broadcast %233 : vector<8x1xf32> to vector<8x32xf32>
    %235 = arith.mulf %230, %234 : vector<8x32xf32>
    %236 = vector.broadcast %216 : vector<1x32xf32> to vector<8x32xf32>
    %237 = arith.mulf %235, %236 : vector<8x32xf32>
    %238 = vector.broadcast %217 : vector<1x32xf32> to vector<8x32xf32>
    %239 = arith.addf %237, %238 : vector<8x32xf32>
    %c0_89 = arith.constant 0 : index
    %c0_90 = arith.constant 0 : index
    %240 = vector.load %arg18[%c0_89, %c0_90] : memref<32x64xf32, #tpu.memory_space<vmem>>, vector<32x64xf32>
    %cst_91 = arith.constant dense<0.000000e+00> : vector<8x64xf32>
    %241 = tpu.matmul %239, %240, %cst_91 {dimension_numbers = #tpu.dot_dimension_numbers<[1], [0], [0], [1], [0, 0, 1, 1], [], []>} : vector<8x32xf32>, vector<32x64xf32>, vector<8x64xf32> -> vector<8x64xf32>
    %c0_92 = arith.constant 0 : index
    %c0_93 = arith.constant 0 : index
    %242 = vector.load %arg19[%c0_92, %c0_93] : memref<1x64xf32, #tpu.memory_space<vmem>>, vector<1x64xf32>
    %243 = vector.broadcast %242 : vector<1x64xf32> to vector<8x64xf32>
    %244 = arith.addf %241, %243 : vector<8x64xf32>
    %cst_94 = arith.constant 5.000000e-01 : f32
    %245 = vector.broadcast %cst_94 : f32 to vector<8x64xf32>
    %246 = arith.mulf %245, %244 : vector<8x64xf32>
    %cst_95 = arith.constant 4.471500e-02 : f32
    %247 = vector.broadcast %cst_95 : f32 to vector<8x64xf32>
    %248 = arith.mulf %247, %244 : vector<8x64xf32>
    %249 = arith.mulf %248, %244 : vector<8x64xf32>
    %250 = arith.mulf %249, %244 : vector<8x64xf32>
    %251 = arith.addf %244, %250 : vector<8x64xf32>
    %cst_96 = arith.constant 0.797884583 : f32
    %252 = vector.broadcast %cst_96 : f32 to vector<8x64xf32>
    %253 = arith.mulf %252, %251 : vector<8x64xf32>
    %254 = math.tanh %253 : vector<8x64xf32>
    %cst_97 = arith.constant 1.000000e+00 : f32
    %255 = vector.broadcast %cst_97 : f32 to vector<8x64xf32>
    %256 = arith.addf %255, %254 : vector<8x64xf32>
    %257 = arith.mulf %246, %256 : vector<8x64xf32>
    %c0_98 = arith.constant 0 : index
    %c0_99 = arith.constant 0 : index
    %258 = vector.load %arg20[%c0_98, %c0_99] : memref<64x32xf32, #tpu.memory_space<vmem>>, vector<64x32xf32>
    %cst_100 = arith.constant dense<0.000000e+00> : vector<8x32xf32>
    %259 = tpu.matmul %257, %258, %cst_100 {dimension_numbers = #tpu.dot_dimension_numbers<[1], [0], [0], [1], [0, 0, 1, 1], [], []>} : vector<8x64xf32>, vector<64x32xf32>, vector<8x32xf32> -> vector<8x32xf32>
    %260 = arith.addf %215, %259 : vector<8x32xf32>
    %c0_101 = arith.constant 0 : index
    %c0_102 = arith.constant 0 : index
    %261 = vector.load %arg21[%c0_101, %c0_102] : memref<1x32xf32, #tpu.memory_space<vmem>>, vector<1x32xf32>
    %262 = vector.broadcast %261 : vector<1x32xf32> to vector<8x32xf32>
    %263 = arith.addf %260, %262 : vector<8x32xf32>
    %c0_103 = arith.constant 0 : index
    %c0_104 = arith.constant 0 : index
    %c0_105 = arith.constant 0 : index
    %264 = vector.load %arg22[%c0_103, %c0_104, %c0_105] : memref<1x8x32xf32, #tpu.memory_space<vmem>>, vector<1x8x32xf32>
    %265 = vector.shape_cast %264 : vector<1x8x32xf32> to vector<8x32xf32>
    %266 = vector.shape_cast %263 : vector<8x32xf32> to vector<1x8x32xf32>
    tpu.vector_store %arg22[%c0_103, %c0_104, %c0_105], %266 {strides = array<i32>} : memref<1x8x32xf32, #tpu.memory_space<vmem>>, vector<1x8x32xf32>,
    return
  }
  func.func @transform_0(%arg0: i32) -> (i32, i32, i32) {
    %c0_i32 = arith.constant 0 : i32
    %c0_i32_0 = arith.constant 0 : i32
    %c0_i32_1 = arith.constant 0 : i32
    return %arg0, %c0_i32, %c0_i32_0 : i32, i32, i32
  }
  func.func @transform_1(%arg0: i32) -> (i32, i32, i32) {
    %c0_i32 = arith.constant 0 : i32
    %c0_i32_0 = arith.constant 0 : i32
    %c0_i32_1 = arith.constant 0 : i32
    return %arg0, %c0_i32, %c0_i32_0 : i32, i32, i32
  }
  func.func @transform_2(%arg0: i32) -> (i32, i32) {
    %c0_i32 = arith.constant 0 : i32
    %c0_i32_0 = arith.constant 0 : i32
    %c0_i32_1 = arith.constant 0 : i32
    return %c0_i32, %c0_i32_0 : i32, i32
  }
  func.func @transform_3(%arg0: i32) -> (i32, i32, i32) {
    %c0_i32 = arith.constant 0 : i32
    %c0_i32_0 = arith.constant 0 : i32
    %c0_i32_1 = arith.constant 0 : i32
    return %arg0, %c0_i32, %c0_i32_0 : i32, i32, i32
  }
  func.func @transform_4(%arg0: i32) -> (i32, i32) {
    %c0_i32 = arith.constant 0 : i32
    %c0_i32_0 = arith.constant 0 : i32
    %c0_i32_1 = arith.constant 0 : i32
    return %c0_i32, %c0_i32_0 : i32, i32
  }
  func.func @transform_5(%arg0: i32) -> (i32, i32) {
    %c0_i32 = arith.constant 0 : i32
    %c0_i32_0 = arith.constant 0 : i32
    %c0_i32_1 = arith.constant 0 : i32
    return %c0_i32, %c0_i32_0 : i32, i32
  }
  func.func @transform_6(%arg0: i32) -> (i32, i32) {
    %c0_i32 = arith.constant 0 : i32
    %c0_i32_0 = arith.constant 0 : i32
    %c0_i32_1 = arith.constant 0 : i32
    return %c0_i32, %c0_i32_0 : i32, i32
  }
  func.func @transform_7(%arg0: i32) -> (i32, i32) {
    %c0_i32 = arith.constant 0 : i32
    %c0_i32_0 = arith.constant 0 : i32
    %c0_i32_1 = arith.constant 0 : i32
    return %c0_i32, %c0_i32_0 : i32, i32
  }
  func.func @transform_8(%arg0: i32) -> (i32, i32) {
    %c0_i32 = arith.constant 0 : i32
    %c0_i32_0 = arith.constant 0 : i32
    %c0_i32_1 = arith.constant 0 : i32
    return %c0_i32, %c0_i32_0 : i32, i32
  }
  func.func @transform_9(%arg0: i32) -> (i32, i32) {
    %c0_i32 = arith.constant 0 : i32
    %c0_i32_0 = arith.constant 0 : i32
    %c0_i32_1 = arith.constant 0 : i32
    return %c0_i32, %c0_i32_0 : i32, i32
  }
  func.func @transform_10(%arg0: i32) -> (i32, i32) {
    %c0_i32 = arith.constant 0 : i32
    %c0_i32_0 = arith.constant 0 : i32
    %c0_i32_1 = arith.constant 0 : i32
    return %c0_i32, %c0_i32_0 : i32, i32
  }
  func.func @transform_11(%arg0: i32) -> (i32, i32) {
    %c0_i32 = arith.constant 0 : i32
    %c0_i32_0 = arith.constant 0 : i32
    %c0_i32_1 = arith.constant 0 : i32
    return %c0_i32, %c0_i32_0 : i32, i32
  }
  func.func @transform_12(%arg0: i32) -> (i32, i32) {
    %c0_i32 = arith.constant 0 : i32
    %c0_i32_0 = arith.constant 0 : i32
    %c0_i32_1 = arith.constant 0 : i32
    return %c0_i32, %c0_i32_0 : i32, i32
  }
  func.func @transform_13(%arg0: i32) -> (i32, i32) {
    %c0_i32 = arith.constant 0 : i32
    %c0_i32_0 = arith.constant 0 : i32
    %c0_i32_1 = arith.constant 0 : i32
    return %c0_i32, %c0_i32_0 : i32, i32
  }
  func.func @transform_14(%arg0: i32) -> (i32, i32) {
    %c0_i32 = arith.constant 0 : i32
    %c0_i32_0 = arith.constant 0 : i32
    %c0_i32_1 = arith.constant 0 : i32
    return %c0_i32, %c0_i32_0 : i32, i32
  }
  func.func @transform_15(%arg0: i32) -> (i32, i32) {
    %c0_i32 = arith.constant 0 : i32
    %c0_i32_0 = arith.constant 0 : i32
    %c0_i32_1 = arith.constant 0 : i32
    return %c0_i32, %c0_i32_0 : i32, i32
  }
  func.func @transform_16(%arg0: i32) -> (i32, i32) {
    %c0_i32 = arith.constant 0 : i32
    %c0_i32_0 = arith.constant 0 : i32
    %c0_i32_1 = arith.constant 0 : i32
    return %c0_i32, %c0_i32_0 : i32, i32
  }
  func.func @transform_17(%arg0: i32) -> (i32, i32) {
    %c0_i32 = arith.constant 0 : i32
    %c0_i32_0 = arith.constant 0 : i32
    %c0_i32_1 = arith.constant 0 : i32
    return %c0_i32, %c0_i32_0 : i32, i32
  }
  func.func @transform_18(%arg0: i32) -> (i32, i32) {
    %c0_i32 = arith.constant 0 : i32
    %c0_i32_0 = arith.constant 0 : i32
    %c0_i32_1 = arith.constant 0 : i32
    return %c0_i32, %c0_i32_0 : i32, i32
  }
  func.func @transform_19(%arg0: i32) -> (i32, i32) {
    %c0_i32 = arith.constant 0 : i32
    %c0_i32_0 = arith.constant 0 : i32
    %c0_i32_1 = arith.constant 0 : i32
    return %c0_i32, %c0_i32_0 : i32, i32
  }
  func.func @transform_20(%arg0: i32) -> (i32, i32) {
    %c0_i32 = arith.constant 0 : i32
    %c0_i32_0 = arith.constant 0 : i32
    %c0_i32_1 = arith.constant 0 : i32
    return %c0_i32, %c0_i32_0 : i32, i32
  }
  func.func @transform_21(%arg0: i32) -> (i32, i32, i32) {
    %c0_i32 = arith.constant 0 : i32
    %c0_i32_0 = arith.constant 0 : i32
    %c0_i32_1 = arith.constant 0 : i32
    return %arg0, %c0_i32, %c0_i32_0 : i32, i32, i32
  }
}

</mosaic_0001>

<bundles_post_ra>
// kernel: forward.9
= control target key start
LH: loop header
LB: loop body
LE: loop exit
PB: predicated region body
PF: predicated region fallthrough
CT: control target
= control target key end

     0   :  { %10 = vsyncpa [#allocation3], 0  ;;  %s713_s0 = inlined_call_operand.vmem [shape: f32[2,8,32], index: 0, kind: input, shape index: {}]   ;;  %s714_s1 = inlined_call_operand.vmem [shape: f32[1,32], index: 1, kind: input, shape index: {}]   ;;  %s715_s2 = inlined_call_operand.vmem [shape: f32[1,32], index: 2, kind: input, shape index: {}]   ;;  %s716_s3 = inlined_call_operand.vmem [shape: f32[32,64], index: 3, kind: input, shape index: {}]   ;;  %s717_s4 = inlined_call_operand.vmem [shape: f32[1,64], index: 4, kind: input, shape index: {}]   ;;  %s718_s5 = inlined_call_operand.hbm [shape: f32[2,8,64], index: 5, kind: output, shape index: {}]  }
   0x1   :  { %12 = vsyncpa [#allocation3 + $0x1], 0  ;;  %s589_s18 = smov 0   ;;  %s591_s19 = smov 0  }
   0x2   :  { %s593_s20 = smov 0   ;;  %s595_s21 = smov 0  }
   0x3 LB: > { %s610_s22 = sadd.s32 4294967295, %s553_s21   ;;  %s411_s23 = sadd.s32 4294967294, %s553_s21   ;;  %s553_s21 = sphi %s595_s21, %s724_s21   ;;  %s549_s20 = sphi %s593_s20, %s723_s20   ;;  %s545_s19 = sphi %s591_s19, %s722_s19   ;;  %s541_s18 = sphi %s589_s18, %s721_s18  }
   0x4   : > { %s614_s24 = sadd.s32 1, %s553_s21   ;;  %s135_s25 = sadd.s32 1, %s549_s20 }
   0x5   : > { %s132_s26 = ssub.s32 %s553_s21, %s614_s24  ;;  %p145_p0 = scmp.ne.s32.totalorder %s549_s20, %s545_s19 }
   0x6   : > { %p133_p1 = scmp.eq.s32.totalorder %s132_s26, 0  ;;  %p146_p2 = scmp.eq.s32.totalorder %s610_s22, 1 }
   0x7   : > { %p151_p3 = scmp.ne.s32.totalorder %s545_s19, %s541_s18  ;;  %p152_p4 = scmp.eq.s32.totalorder %s411_s23, 1 }
   0x8   : > { %s625_s27 = scalar_select %p133_p1, %s549_s20, %s135_s25  }
   0x9   : > { %p627_p5 = por %p146_p2, %p145_p0  ;;  %p631_p6 = por %p152_p4, %p151_p3 }
   0xa   : > { %p414_p7 = scmp.ge.s32.totalorder %s553_s21, 1  ;;  %p189_p8 = scmp.lt.s32.totalorder %s553_s21, 3 }
   0xc   : > { %p190_p9 = pnand %p414_p7, %p189_p8 }
   0xd   : > { %p216_p10 = scmp.lt.s32.totalorder (!%p190_p9), %s610_s22, 1  ;;  %vm223_vm0 = vcmask (!%p190_p9), 261120   ;;  %v252_v7 = vld [vmem:[%s716_s3] sm:$0xff] (!%p190_p9)  ;;  %v253_v8 = vld [vmem:[%s716_s3 + $0x8] sm:$0xff] (!%p190_p9)  ;;  %v254_v9 = vld [vmem:[%s716_s3 + $0x10] sm:$0xff] (!%p190_p9)  ;;  %v555_v10 = vmov (!%p190_p9), 0.0|0.0  }
   0xe   : > { %193 = sbr.rel (%p190_p9) target bundleno = 567 (0x237), region = 40  ;;  %441 = vmatprep.subr.bf16.mxu0 (!%p190_p9), %v555_v10  ;;  %v442_v11 = vpack.c.bf16 (!%p190_p9), %v253_v8, %v252_v7  ;;  %v255_v12 = vld [vmem:[%s716_s3 + $0x18] sm:$0xff] (!%p190_p9)  ;;  %vm556_vm1 = vmmov (!%p190_p9), 0   ;;  %v557_v13 = vmov (!%p190_p9), 0.0   ;;  %v417_v19 = vld [vmem:[%s714_s1] ss:$0 sm:$0xff] (!%p190_p9) }
   0xf   : > { %438 = vmatprep.mubr.msk.f32.mxu0 (!%p190_p9), %vm556_vm1, %v557_v13  ;;  %v445_v14 = vpack.c.bf16 (!%p190_p9), %v255_v12, %v254_v9  ;;  %v418_v21 = vld [vmem:[%s715_s2] ss:$0 sm:$0xff] (!%p190_p9)  ;;  %s422_s10 = sshll.u32 (!%p190_p9), %s610_s22, 7  ;;  %vm336_vm2 = vcmask (!%p190_p9), 523264  }
  0x10   : > { %443 = vmatpush3.bf16.msra.mxu0 (!%p190_p9), %v442_v11  ;;  %v419_v24 = vld [vmem:[%s717_s4] ss:$0 sm:$0xff] (!%p190_p9)  ;;  %s671_s15 = scalar_lea.hbm (!%p190_p9), %s718_s5, %s422_s10 }
  0x11   : > { %444 = vmatprep.subr.bf16.mxu0 (!%p190_p9), %v555_v10 }
  0x14   : > { %446 = vmatpush3.bf16.msra.mxu0 (!%p190_p9), %v445_v14 }
  0x15   : > { %s217_s30 = scalar_select %p216_p10, %s610_s22, 1 }
  0x16   : > { %s558_s22 = smov [#allocation2]  }
  0x17   : > { %s416_s6 = sshll.u32 %s217_s30, 3  ;;  %s495_s23 = sshll.u32 %s558_s22, 4  ;;  %s496_s23 = int_to_ptr.vmem [resolvable:$false] %s495_s23 }
  0x18   : > { %s219_s9 = scalar_lea.vmem %s713_s0, %s416_s6  ;;  %s213_s6 = sand.u32 1, %s545_s19  }
  0x19   : > { %v220_v0 = vld [vmem:[%s219_s9] sm:$0xff]  ;;  %s415_s7 = sshll.u32 %s213_s6, 3  ;;  %s339_s16 = scalar_lea.sflag [#allocation3], %s213_s6 }
  0x1a   : > { %v224_v1 = vsel %vm223_vm0, %v220_v0, 0.0  ;;  %s215_s11 = scalar_lea.vmem [#allocation2], %s415_s7  ;;  %s497_s25 = scalar_lea.vmem %s496_s23, 256 }
  0x1b   : > { %225 = vadd.xlane.f32.xlu0 %v224_v1  ;;  %s352_s12 = sshll.u32 %s215_s11, 4  ;;  %s673_s12 = int_to_ptr.vmem [resolvable:$true] %s352_s12 }
  0x1c   : > { %s491_s17 = scalar_lea.vmem %s673_s12, 128  ;;  %p498_p0 = scmp.lt.s32.totalorder %s673_s12, %s496_s23 }
  0x1d   : > { %p492_p11 = scmp.ne.s32.totalorder %s673_s12, %s491_s17  ;;  %p499_p1 = scmp.lt.s32.totalorder %s497_s25, %s491_s17 }
  0x1f   : > { %p493_p12 = pnand %p492_p11, %p627_p5  ;;  %p500_p2 = por %p499_p1, %p498_p0 }
  0x21   : > { %p494_p13 = pneg %p493_p12 }
  0x23   : > { %p501_p3 = pnand %p500_p2, %p494_p13 }
  0xa8   : > { %v226_v2 = vpop.xlane.xlu0 %225 }
  0xa9   : > { %v228_v3 = vmul.f32 0.03125, %v226_v2 }
  0xab   : > { %v229_v4 = vsub.f32 %v220_v0, %v228_v3 }
  0xad   : > { %v230_v5 = vmul.f32 %v229_v4, %v229_v4 }
  0xaf   : > { %v231_v6 = vsel %vm223_vm0, %v230_v5, 0.0 }
  0xb0   : > { %232 = vadd.xlane.f32.xlu0 %v231_v6 }
 0x13d   : > { %v233_v15 = vpop.xlane.xlu0 %232 }
 0x13e   : > { %v234_v16 = vmul.f32 0.03125, %v233_v15 }
 0x140   : > { %v235_v17 = vadd.f32 1e-05, %v234_v16 }
 0x142   : > { %489 = vrsqrt.f32 %v235_v17 }
 0x14c   : > { %v490_v18 = vpop.eup %489 }
 0x14d   : > { %v237_v20 = vmul.f32 %v490_v18, %v229_v4 }
 0x14f   : > { %v244_v22 = vmul.f32 %v417_v19, %v237_v20 }
 0x151   : > { %v251_v23 = vadd.f32 %v418_v21, %v244_v22 }
 0x153   : > { %439 = vmatmul.mubr.msk.f32.vlgmr.msra.gmra.mrb[0].mxu0 %vm223_vm0, %v251_v23 }
 0x226   : > { %v332_v25 = vpop.f32.mrb[0].mxu0 }
 0x227   : > { %v333_v26 = vadd.f32 %v419_v24, %v332_v25  ;;  %v440_v27 = vpop.f32.mrb[1].mxu0 }
 0x229   : > { %337 = vst.msk [vmem:[%s215_s11] sm:$0xff] %vm336_vm2, %v333_v26 }
 0x22a   : > { %504 = shalt.err (!%p501_p3)
}
 0x22b   : > { %s505_s26 = scalar_lea.hbm %s671_s15, 128  ;;  %s509_s7 = scalar_lea.hbm %s718_s5, 256 }
 0x22c   : > { %p506_p4 = scmp.ne.s32.totalorder %s671_s15, %s505_s26  ;;  %p510_p9 = scmp.lt.u32.totalorder %s671_s15, %s718_s5 }
 0x22d   : > { %p511_p10 = scmp.lt.u32.totalorder %s509_s7, %s505_s26  ;;  %p513_p12 = scmp.lt.u32.totalorder %s505_s26, %s671_s15 }
 0x22e   : > { %p507_p7 = pnand %p506_p4, %p627_p5 }
 0x22f   : > { %p512_p11 = por %p511_p10, %p510_p9 }
 0x230   : > { %p508_p8 = pneg %p507_p7 }
 0x231   : > { %p514_p13 = por %p513_p12, %p512_p11 }
 0x233   : > { %p515_p0 = pnand %p514_p13, %p508_p8 }
 0x235   : > { %518 = shalt.err (!%p515_p0)
}
 0x236   : > { %447 = dma.vmem_to_hbm [thread:$0]  (%p627_p5), %s673_s12, 128, %s671_s15, %s339_s16  }
 0x237 PF: > { %p453_p1 = scmp.ge.s32.totalorder %s553_s21, 2  ;;  %s364_s10 = sand.u32 1, %s541_s18  }
 0x238   : > { %s365_s11 = scalar_lea.sflag [#allocation3], %s364_s10 }
 0x239   : > { %p450_p2 = pnand %p453_p1, %p631_p6 }
 0x23b   : > { %536 = dma.done.wait (!%p450_p2), %s365_s11, 128  }
 0x23c   : > { %538 = vsyncadd (!%p450_p2), %s365_s11, 4294967168  ;;  %p15_p3 = scmp.ge.s32.totalorder %s614_s24, 4   ;;  %s721_s18 = smov %s545_s19 }
 0x23d   : > { %s722_s19 = smov %s549_s20  ;;  %s723_s20 = smov %s625_s27 }
 0x23e   : > { %s724_s21 = smov %s614_s24  ;;  %17 = sbr.rel (!%p15_p3) target bundleno = 3 (0x3), region = 75 }
 0x245   :  { %370 = vsyncpa [#allocation3], 1 }
 0x246   :  { %372 = vsyncpa [#allocation3 + $0x1], 1 }

// kernel: forward.5
= control target key start
LH: loop header
LB: loop body
LE: loop exit
PB: predicated region body
PF: predicated region fallthrough
CT: control target
= control target key end

     0   :  { %s1943_s25 = smov 0   ;;  %s2144_s0 = inlined_call_operand.vmem [shape: f32[2,8,32], index: 0, kind: input, shape index: {}]   ;;  %s2145_s1 = inlined_call_operand.vmem [shape: f32[2,1,8], index: 1, kind: input, shape index: {}]   ;;  %s2146_s2 = inlined_call_operand.vmem [shape: f32[1,32], index: 2, kind: input, shape index: {}]   ;;  %s2147_s3 = inlined_call_operand.vmem [shape: f32[1,32], index: 3, kind: input, shape index: {}]   ;;  %s2148_s4 = inlined_call_operand.vmem [shape: f32[32,96], index: 4, kind: input, shape index: {}]   ;;  %s2149_s5 = inlined_call_operand.vmem [shape: f32[32,32], index: 5, kind: input, shape index: {}]   ;;  %s2150_s6 = inlined_call_operand.vmem [shape: f32[1,32], index: 6, kind: input, shape index: {}]   ;;  %s2151_s7 = inlined_call_operand.vmem [shape: f32[1,32], index: 7, kind: input, shape index: {}]   ;;  %s2152_s8 = inlined_call_operand.vmem [shape: f32[1,32], index: 8, kind: input, shape index: {}]   ;;  %s2153_s9 = inlined_call_operand.vmem [shape: f32[32,64], index: 9, kind: input, shape index: {}]   ;;  %s2154_s10 = inlined_call_operand.vmem [shape: f32[1,64], index: 10, kind: input, shape index: {}]   ;;  %s2155_s11 = inlined_call_operand.vmem [shape: f32[64,32], index: 11, kind: input, shape index: {}]   ;;  %s2156_s12 = inlined_call_operand.vmem [shape: f32[1,32], index: 12, kind: input, shape index: {}]   ;;  %s2157_s13 = inlined_call_operand.vmem [shape: f32[2,8,32], index: 13, kind: output, shape index: {}]  }
   0x1 LB: > { %s1606_s26 = sadd.s32 4294967295, %s1854_s25   ;;  %p1610_p0 = scmp.ge.s32.totalorder %s1854_s25, 1  ;;  %s1854_s25 = sphi %s1943_s25, %s23_s25  }
   0x2   : > { %p394_p1 = scmp.lt.s32.totalorder %s1854_s25, 3 }
   0x4   : > { %p395_p2 = pnand %p1610_p0, %p394_p1 }
   0x5   : > { %p439_p3 = scmp.lt.s32.totalorder (!%p395_p2), %s1606_s26, 1  ;;  %vm454_vm0 = vcmask (!%p395_p2), 261120   ;;  %v483_v7 = vld [vmem:[%s2148_s4] sm:$0xff] (!%p395_p2)  ;;  %v484_v8 = vld [vmem:[%s2148_s4 + $0x8] sm:$0xff] (!%p395_p2)  ;;  %v485_v9 = vld [vmem:[%s2148_s4 + $0x10] sm:$0xff] (!%p395_p2)  ;;  %v1856_v10 = vmov (!%p395_p2), 0.0|0.0  }
   0x6   : > { %398 = sbr.rel (%p395_p2) target bundleno = 2518 (0x9d6), region = 72  ;;  %1771 = vmatprep.subr.bf16.mxu1 (!%p395_p2), %v1856_v10  ;;  %v1772_v11 = vpack.c.bf16 (!%p395_p2), %v484_v8, %v483_v7  ;;  %v486_v12 = vld [vmem:[%s2148_s4 + $0x18] sm:$0xff] (!%p395_p2)  ;;  %vm1857_vm1 = vmmov (!%p395_p2), 0   ;;  %v1858_v13 = vmov (!%p395_p2), 0.0   ;;  %v1613_v19 = vld [vmem:[%s2146_s2] ss:$0 sm:$0xff] (!%p395_p2) }
   0x7   : > { %1687 = vmatprep.mubr.msk.f32.mxu1 (!%p395_p2), %vm1857_vm1, %v1858_v13  ;;  %1700 = vmatprep.subr.mxu0 (!%p395_p2), %v1858_v13  ;;  %v1775_v14 = vpack.c.bf16 (!%p395_p2), %v486_v12, %v485_v9  ;;  %v1614_v21 = vld [vmem:[%s2147_s3] ss:$0 sm:$0xff] (!%p395_p2)  ;;  %s1859_s29 = smov (!%p395_p2), 96   ;;  %s1861_s14 = smov (!%p395_p2), 88   ;;  %vm575_vm2 = vcmask (!%p395_p2), 64512   ;;  %vm1246_vm3 = vcmask (!%p395_p2), 130048  }
   0x8   : > { %1702 = vmatprep.mubr.msk.f32.mxu0 (!%p395_p2), %vm1857_vm1, %v1858_v13  ;;  %1773 = vmatpush3.bf16.msra.mxu1 (!%p395_p2), %v1772_v11  ;;  %s1862_s15 = smov (!%p395_p2), 80   ;;  %s1863_s16 = smov (!%p395_p2), 72   ;;  %vm1248_vm4 = vcmask (!%p395_p2), 195584   ;;  %vm1460_vm5 = vcmask (!%p395_p2), 523264  }
   0x9   : > { %1774 = vmatprep.subr.bf16.mxu1 (!%p395_p2), %v1856_v10  ;;  %s1864_s17 = smov (!%p395_p2), 112   ;;  %s1865_s18 = smov (!%p395_p2), 104  }
   0xa   : > { %s1866_s22 = smov (!%p395_p2), 64   ;;  %s1867_s23 = smov (!%p395_p2), 48  }
   0xb   : > { %s1868_s24 = smov (!%p395_p2), 40   ;;  %s1869_s28 = smov (!%p395_p2), 56  }
   0xc   : > { %1776 = vmatpush3.bf16.msra.mxu1 (!%p395_p2), %v1775_v14  ;;  %s1870_s20 = smov (!%p395_p2), 8  }
   0xd   : > { %s2159_s26 = smov (!%p439_p3, %s1606_s26), 1  ;;  %1690 = vmatprep.subr.mxu1 %v1858_v13 }
   0xe   : > { %s1611_s27 = sshll.u32 %s2159_s26, 3  ;;  %s445_s21 = scalar_lea.vmem %s2145_s1, %s2159_s26 }
   0xf   : > { %s442_s30 = scalar_lea.vmem %s2144_s0, %s1611_s27  ;;  %v1616_v34 = vld [vmem:[%s445_s21] ss:$0 sm:$0xff]  ;;  %s1871_s21 = smov 16  }
  0x10   : > { %v1959_v0 = vld [vmem:[%s442_s30] sm:$0xff]  ;;  %s1860_s30 = smov 120  }
  0x11   : > { %v455_v1 = vsel %vm454_vm0, %v1959_v0, 0.0 }
  0x12   : > { %456 = vadd.xlane.f32.xlu0 %v455_v1 }
  0x9f   : > { %v457_v2 = vpop.xlane.xlu0 %456 }
  0xa0   : > { %v459_v3 = vmul.f32 0.03125, %v457_v2 }
  0xa2   : > { %v460_v4 = vsub.f32 %v1959_v0, %v459_v3 }
  0xa4   : > { %v461_v5 = vmul.f32 %v460_v4, %v460_v4 }
  0xa6   : > { %v462_v6 = vsel %vm454_vm0, %v461_v5, 0.0 }
  0xa7   : > { %463 = vadd.xlane.f32.xlu0 %v462_v6 }
 0x134   : > { %v464_v15 = vpop.xlane.xlu0 %463 }
 0x135   : > { %v465_v16 = vmul.f32 0.03125, %v464_v15 }
 0x137   : > { %v466_v17 = vadd.f32 1e-05, %v465_v16 }
 0x139   : > { %1826 = vrsqrt.f32 %v466_v17 }
 0x143   : > { %v1827_v18 = vpop.eup %1826 }
 0x144   : > { %v468_v20 = vmul.f32 %v1827_v18, %v460_v4 }
 0x146   : > { %v475_v22 = vmul.f32 %v1613_v19, %v468_v20 }
 0x148   : > { %v482_v23 = vadd.f32 %v1614_v21, %v475_v22 }
 0x14a   : > { %1688 = vmatmul.mubr.msk.f32.vlgmr.msra.gmra.mrb[0].mxu1 %vm454_vm0, %v482_v23 }
 0x14b   : > { %1692 = vmatprep.mubr.msk.f32.mxu1 %vm1857_vm1, %v1858_v13 }
 0x21d   : > { %v1994_v24 = vpop.f32.mrb[0].mxu1 }
 0x21e   : > { %573 = vrot.lane.b32.xlu1 %v1994_v24, %s1859_s29  ;;  %v1689_v25 = vpop.f32.mrb[1].mxu1  ;;  %v560_v26 = vmul.f32 0.35355338, %v1994_v24 }
 0x220   : > { %738 = vrot.lane.b32.xlu0 %v560_v26, %s1860_s30 }
 0x222   : > { %740 = vrot.lane.b32.xlu1 %v1994_v24, %s1861_s14 }
 0x226   : > { %905 = vrot.lane.b32.xlu1 %v1994_v24, %s1862_s15 }
 0x22a   : > { %1070 = vrot.lane.b32.xlu1 %v1994_v24, %s1863_s16 }
 0x22e   : > { %903 = vrot.lane.b32.xlu1 %v560_v26, %s1864_s17  ;;  %s449_s17 = scalar_lea.vmem %s2157_s13, %s1611_s27 }
 0x232   : > { %1068 = vrot.lane.b32.xlu1 %v560_v26, %s1865_s18 }
 0x290   : > { %v574_v27 = vpop.permute.xlu1 %573 }
 0x291   : > { %1691 = vmatpush3.xpose.msk.msra.mxu1 %vm575_vm2, %v574_v27  ;;  %v562_v27 = vld [vmem:[%s2149_s5 + $0x8] sm:$0xff] }
 0x292   : > { %1695 = vmatprep.subr.mxu1 %v1858_v13  ;;  %v739_v29 = vpop.permute.xlu0 %738 }
 0x294   : > { %v741_v28 = vpop.permute.xlu1 %740  ;;  %1693 = vmatmul.mubr.msk.f32.vlgmr.msra.gmra.mrb[2].mxu1 %vm575_vm2, %v560_v26  ;;  %v561_v26 = vld [vmem:[%s2149_s5] sm:$0xff] }
 0x295   : > { %1701 = vmatpush3.xpose.msk.msra.mxu0 %vm575_vm2, %v741_v28  ;;  %1697 = vmatprep.mubr.msk.f32.mxu1 %vm1857_vm1, %v1858_v13  ;;  %v1778_v28 = vpack.c.bf16 %v562_v27, %v561_v26 }
 0x296   : > { %1710 = vmatprep.subr.mxu0 %v1858_v13 }
 0x298   : > { %v906_v30 = vpop.permute.xlu1 %905  ;;  %1703 = vmatmul.mubr.msk.f32.vlgmr.msra.gmra.mrb[0].mxu0 %vm575_vm2, %v739_v29 }
 0x299   : > { %1711 = vmatpush3.xpose.msk.msra.mxu0 %vm575_vm2, %v906_v30  ;;  %1712 = vmatprep.mubr.msk.f32.mxu0 %vm1857_vm1, %v1858_v13 }
 0x29a   : > { %1720 = vmatprep.subr.mxu0 %v1858_v13 }
 0x29c   : > { %v1071_v31 = vpop.permute.xlu1 %1070 }
 0x2a0   : > { %v904_v32 = vpop.permute.xlu1 %903 }
 0x2a1   : > { %1713 = vmatmul.mubr.msk.f32.vlgmr.msra.gmra.mrb[2].mxu0 %vm575_vm2, %v904_v32  ;;  %v564_v32 = vld [vmem:[%s2149_s5 + $0x18] sm:$0xff] }
 0x2a2   : > { %1721 = vmatpush3.xpose.msk.msra.mxu0 %vm575_vm2, %v1071_v31  ;;  %1722 = vmatprep.mubr.msk.f32.mxu0 %vm1857_vm1, %v1858_v13  ;;  %v563_v31 = vld [vmem:[%s2149_s5 + $0x10] sm:$0xff] }
 0x2a3   : > { %1777 = vmatprep.subr.bf16.mxu0 %v1856_v10 }
 0x2a4   : > { %v1069_v33 = vpop.permute.xlu1 %1068 }
 0x2a5   : > { %1723 = vmatmul.mubr.msk.f32.vlgmr.msra.gmra.mrb[4].mxu0 %vm575_vm2, %v1069_v33  ;;  %v1781_v33 = vpack.c.bf16 %v564_v32, %v563_v31 }
 0x2a6   : > { %1738 = vmatprep.mubr.msk.f32.mxu0 %vm1857_vm1, %v1858_v13  ;;  %1779 = vmatpush3.bf16.msra.mxu0 %v1778_v28 }
 0x2a7   : > { %1780 = vmatprep.subr.bf16.mxu0 %v1856_v10 }
 0x2aa   : > { %1782 = vmatpush3.bf16.msra.mxu0 %v1781_v33 }
 0x2ab   : > { %1789 = vmatprep.subr.bf16.mxu0 %v1856_v10 }
 0x367   : > { %v647_v35 = vpop.f32.mrb[2].mxu1 }
 0x368   : > { %v648_v36 = vadd.f32 %v1616_v34, %v647_v35  ;;  %v1694_v37 = vpop.f32.mrb[3].mxu1 }
 0x36a   : > { %v651_v38 = vsel %vm575_vm2, %v648_v36, -inf }
 0x36b   : > { %v812_v39 = vpop.f32.mrb[0].mxu0  ;;  %652 = vmax.xlane.f32.xlu1 %v651_v38 }
 0x36c   : > { %v813_v40 = vadd.f32 %v1616_v34, %v812_v39  ;;  %v1704_v41 = vpop.f32.mrb[1].mxu0 }
 0x36e   : > { %v816_v42 = vsel %vm575_vm2, %v813_v40, -inf }
 0x36f   : > { %817 = vmax.xlane.f32.xlu0 %v816_v42 }
 0x374   : > { %v977_v43 = vpop.f32.mrb[2].mxu0 }
 0x375   : > { %v978_v44 = vadd.f32 %v1616_v34, %v977_v43  ;;  %v1714_v45 = vpop.f32.mrb[3].mxu0 }
 0x377   : > { %v981_v46 = vsel %vm575_vm2, %v978_v44, -inf }
 0x378   : > { %v1142_v47 = vpop.f32.mrb[4].mxu0  ;;  %982 = vmax.xlane.f32.xlu1 %v981_v46  ;;  %v1629_v46 = vld [vmem:[%s2150_s6] ss:$0 sm:$0xff] }
 0x379   : > { %v1143_v48 = vadd.f32 %v1616_v34, %v1142_v47  ;;  %v1724_v49 = vpop.f32.mrb[5].mxu0 }
 0x37b   : > { %v1146_v50 = vsel %vm575_vm2, %v1143_v48, -inf }
 0x37c   : > { %1147 = vmax.xlane.f32.xlu0 %v1146_v50 }
 0x389   : > { %662 = vrot.lane.b32.xlu1 %v1994_v24, %s1866_s22  ;;  %s1872_s22 = smov 24  }
 0x3f8   : > { %v653_v51 = vpop.xlane.xlu1 %652 }
 0x3f9   : > { %v654_v52 = vsub.f32 %v648_v36, %v653_v51 }
 0x3fb   : > { %v655_v53 = vmul.f32 1.442695, %v654_v52 }
 0x3fc   : > { %v818_v54 = vpop.xlane.xlu0 %817 }
 0x3fd   : > { %1828 = vpow2.f32 %v655_v53  ;;  %v819_v55 = vsub.f32 %v813_v40, %v818_v54 }
 0x3ff   : > { %v820_v56 = vmul.f32 1.442695, %v819_v55 }
 0x401   : > { %1830 = vpow2.f32 %v820_v56  ;;  %v1359_v56 = vld [vmem:[%s2153_s9] sm:$0xff] }
 0x405   : > { %v983_v57 = vpop.xlane.xlu1 %982 }
 0x406   : > { %v984_v58 = vsub.f32 %v978_v44, %v983_v57 }
 0x407   : > { %v1829_v59 = vpop.eup %1828 }
 0x408   : > { %v985_v60 = vmul.f32 1.442695, %v984_v58  ;;  %v657_v61 = vsel %vm575_vm2, %v1829_v59, 0.0  ;;  %v1361_v58 = vld [vmem:[%s2153_s9 + $0x10] sm:$0xff] }
 0x409   : > { %v1148_v62 = vpop.xlane.xlu0 %1147  ;;  %658 = vadd.xlane.f32.xlu1 %v657_v61  ;;  %v663_v63 = vpop.permute.xlu1 %662 }
 0x40a   : > { %1832 = vpow2.f32 %v985_v60  ;;  %v1149_v1 = vsub.f32 %v1143_v48, %v1148_v62  ;;  %1696 = vmatpush3.msra.mxu1 %v663_v63 }
 0x40b   : > { %v1831_v2 = vpop.eup %1830  ;;  %1705 = vmatprep.subr.mxu1 %v1858_v13 }
 0x40c   : > { %v1150_v3 = vmul.f32 1.442695, %v1149_v1  ;;  %v822_v4 = vsel %vm575_vm2, %v1831_v2, 0.0 }
 0x40d   : > { %823 = vadd.xlane.f32.xlu0 %v822_v4  ;;  %v1632_v4 = vld [vmem:[%s2152_s8] ss:$0 sm:$0xff] }
 0x40e   : > { %1834 = vpow2.f32 %v1150_v3 }
 0x414   : > { %v1833_v5 = vpop.eup %1832 }
 0x415   : > { %v987_v6 = vsel %vm575_vm2, %v1833_v5, 0.0 }
 0x416   : > { %988 = vadd.xlane.f32.xlu1 %v987_v6 }
 0x418   : > { %v1835_v7 = vpop.eup %1834 }
 0x419   : > { %v1152_v8 = vsel %vm575_vm2, %v1835_v7, 0.0 }
 0x41a   : > { %1153 = vadd.xlane.f32.xlu0 %v1152_v8  ;;  %v1453_v8 = vld [vmem:[%s2155_s11 + $0x8] sm:$0xff] }
 0x427   : > { %992 = vrot.lane.b32.xlu1 %v1994_v24, %s1867_s23 }
 0x42b   : > { %1157 = vrot.lane.b32.xlu1 %v1994_v24, %s1868_s24 }
 0x430   : > { %827 = vrot.lane.b32.xlu0 %v1994_v24, %s1869_s28 }
 0x496   : > { %v659_v9 = vpop.xlane.xlu1 %658 }
 0x497   : > { %1836 = vrcp.f32 %v659_v9 }
 0x49a   : > { %v824_v11 = vpop.xlane.xlu0 %823 }
 0x49b   : > { %1838 = vrcp.f32 %v824_v11  ;;  %v1454_v11 = vld [vmem:[%s2155_s11 + $0x10] sm:$0xff] }
 0x4a1   : > { %v1837_v12 = vpop.eup %1836 }
 0x4a2   : > { %v661_v14 = vmul.f32 %v1837_v12, %v1829_v59  ;;  %v1362_v59 = vld [vmem:[%s2153_s9 + $0x18] sm:$0xff] }
 0x4a3   : > { %v989_v15 = vpop.xlane.xlu1 %988  ;;  %v1787_v60 = vpack.c.bf16 %v1362_v59, %v1361_v58  ;;  %v1455_v12 = vld [vmem:[%s2155_s11 + $0x18] sm:$0xff] }
 0x4a4   : > { %1840 = vrcp.f32 %v989_v15  ;;  %1698 = vmatmul.mubr.msk.f32.vlgmr.msra.gmra.mrb[4].mxu1 %vm575_vm2, %v661_v14  ;;  %v1793_v14 = vpack.c.bf16 %v1455_v12, %v1454_v11  ;;  %v1456_v15 = vld [vmem:[%s2155_s11 + $0x20] sm:$0xff] }
 0x4a5   : > { %1707 = vmatprep.mubr.msk.f32.mxu1 %vm1857_vm1, %v1858_v13  ;;  %v1839_v17 = vpop.eup %1838 }
 0x4a6   : > { %v826_v18 = vmul.f32 %v1839_v17, %v1831_v2  ;;  %v1631_v2 = vld [vmem:[%s2151_s7] ss:$0 sm:$0xff] }
 0x4a7   : > { %v1154_v16 = vpop.xlane.xlu0 %1153  ;;  %v993_v19 = vpop.permute.xlu1 %992 }
 0x4a8   : > { %1842 = vrcp.f32 %v1154_v16  ;;  %v1457_v16 = vld [vmem:[%s2155_s11 + $0x28] sm:$0xff] }
 0x4a9   : > { %v1796_v17 = vpack.c.bf16 %v1457_v16, %v1456_v15 }
 0x4ab   : > { %v828_v20 = vpop.permute.xlu0 %827  ;;  %v1158_v23 = vpop.permute.xlu1 %1157 }
 0x4ac   : > { %1706 = vmatpush3.msra.mxu1 %v828_v20 }
 0x4ad   : > { %1708 = vmatmul.mubr.msk.f32.vlgmr.msra.gmra.mrb[6].mxu1 %vm575_vm2, %v826_v18  ;;  %1715 = vmatprep.subr.mxu1 %v1858_v13  ;;  %v1458_v18 = vld [vmem:[%s2155_s11 + $0x30] sm:$0xff] }
 0x4ae   : > { %v1841_v21 = vpop.eup %1840  ;;  %1716 = vmatpush3.msra.mxu1 %v993_v19  ;;  %1717 = vmatprep.mubr.msk.f32.mxu1 %vm1857_vm1, %v1858_v13  ;;  %v1459_v19 = vld [vmem:[%s2155_s11 + $0x38] sm:$0xff] }
 0x4af   : > { %v991_v22 = vmul.f32 %v1841_v21, %v1833_v5  ;;  %1725 = vmatprep.subr.mxu1 %v1858_v13  ;;  %v1799_v20 = vpack.c.bf16 %v1459_v19, %v1458_v18  ;;  %v1633_v21 = vld [vmem:[%s2154_s10] ss:$0 sm:$0xff] }
 0x4b1   : > { %1718 = vmatmul.mubr.msk.f32.vlgmr.msra.gmra.mrb[8].mxu1 %vm575_vm2, %v991_v22 }
 0x4b2   : > { %v1843_v24 = vpop.eup %1842  ;;  %1726 = vmatpush3.msra.mxu1 %v1158_v23  ;;  %1727 = vmatprep.mubr.msk.f32.mxu1 %vm1857_vm1, %v1858_v13 }
 0x4b3   : > { %v1156_v25 = vmul.f32 %v1843_v24, %v1835_v7  ;;  %1783 = vmatprep.subr.bf16.mxu1 %v1856_v10  ;;  %v1452_v7 = vld [vmem:[%s2155_s11] sm:$0xff] }
 0x4b4   : > { %v1790_v9 = vpack.c.bf16 %v1453_v8, %v1452_v7 }
 0x4b5   : > { %1728 = vmatmul.mubr.msk.f32.vlgmr.msra.gmra.mrb[10].mxu1 %vm575_vm2, %v1156_v25 }
 0x4b6   : > { %1749 = vmatprep.mubr.msk.f32.mxu1 %vm1857_vm1, %v1858_v13 }
 0x577   : > { %v734_v29 = vpop.f32.mrb[4].mxu1 }
 0x578   : > { %v1699_v30 = vpop.f32.mrb[5].mxu1 }
 0x580   : > { %v899_v34 = vpop.f32.mrb[6].mxu1 }
 0x581   : > { %1234 = vrot.lane.b32.xlu0 %v899_v34, %s1870_s20  ;;  %v1709_v35 = vpop.f32.mrb[7].mxu1  ;;  %v1636_v34 = vld [vmem:[%s2156_s12] ss:$0 sm:$0xff] }
 0x584   : > { %v1064_v36 = vpop.f32.mrb[8].mxu1 }
 0x585   : > { %1238 = vrot.lane.b32.xlu1 %v1064_v36, %s1871_s21  ;;  %v1719_v37 = vpop.f32.mrb[9].mxu1 }
 0x588   : > { %v1229_v38 = vpop.f32.mrb[10].mxu1 }
 0x589   : > { %1242 = vrot.lane.b32.xlu0 %v1229_v38, %s1872_s22  ;;  %v1729_v39 = vpop.f32.mrb[11].mxu1 }
 0x5f3   : > { %v1235_v40 = vpop.permute.xlu0 %1234 }
 0x5f4   : > { %v1245_v42 = vsel %vm575_vm2, %v734_v29, %v1235_v40 }
 0x5f7   : > { %v1239_v41 = vpop.permute.xlu1 %1238 }
 0x5f8   : > { %v1247_v43 = vsel %vm1246_vm3, %v1245_v42, %v1239_v41 }
 0x5fb   : > { %v1243_v44 = vpop.permute.xlu0 %1242 }
 0x5fc   : > { %v1249_v45 = vsel %vm1248_vm4, %v1247_v43, %v1243_v44 }
 0x5fd   : > { %1739 = vmatmul.mubr.msk.f32.vlgmr.msra.gmra.mrb[6].mxu0 %vm454_vm0, %v1249_v45 }
 0x5fe   : > { %1768 = vmatprep.mubr.msk.f32.mxu0 %vm1857_vm1, %v1858_v13  ;;  %1791 = vmatpush3.bf16.msra.mxu0 %v1790_v9 }
 0x5ff   : > { %1792 = vmatprep.subr.bf16.mxu0 %v1856_v10 }
 0x602   : > { %1794 = vmatpush3.bf16.msra.mxu0 %v1793_v14 }
 0x603   : > { %1795 = vmatprep.subr.bf16.mxu0 %v1856_v10 }
 0x606   : > { %1797 = vmatpush3.bf16.msra.mxu0 %v1796_v17 }
 0x607   : > { %1798 = vmatprep.subr.bf16.mxu0 %v1856_v10 }
 0x60a   : > { %1800 = vmatpush3.bf16.msra.mxu0 %v1799_v20 }
 0x6d0   : > { %v1325_v47 = vpop.f32.mrb[6].mxu0 }
 0x6d1   : > { %v1326_v48 = vadd.f32 %v1629_v46, %v1325_v47  ;;  %v1740_v49 = vpop.f32.mrb[7].mxu0 }
 0x6d3   : > { %v2075_v50 = vadd.f32 %v1326_v48, %v1959_v0  ;;  %v1360_v0 = vld [vmem:[%s2153_s9 + $0x8] sm:$0xff] }
 0x6d4   : > { %v1784_v57 = vpack.c.bf16 %v1360_v0, %v1359_v56 }
 0x6d5   : > { %v1332_v51 = vsel %vm454_vm0, %v2075_v50, 0.0 }
 0x6d6   : > { %1333 = vadd.xlane.f32.xlu1 %v1332_v51  ;;  %1785 = vmatpush3.bf16.msra.mxu1 %v1784_v57 }
 0x6d7   : > { %1786 = vmatprep.subr.bf16.mxu1 %v1856_v10 }
 0x6da   : > { %1788 = vmatpush3.bf16.msra.mxu1 %v1787_v60 }
 0x763   : > { %v1334_v52 = vpop.xlane.xlu1 %1333 }
 0x764   : > { %v1335_v53 = vmul.f32 0.03125, %v1334_v52 }
 0x766   : > { %v1336_v54 = vsub.f32 %v2075_v50, %v1335_v53 }
 0x768   : > { %v1337_v55 = vmul.f32 %v1336_v54, %v1336_v54 }
 0x76a   : > { %v1338_v13 = vsel %vm454_vm0, %v1337_v55, 0.0 }
 0x76b   : > { %1339 = vadd.xlane.f32.xlu0 %v1338_v13 }
 0x7f8   : > { %v1340_v61 = vpop.xlane.xlu0 %1339 }
 0x7f9   : > { %v1341_v62 = vmul.f32 0.03125, %v1340_v61 }
 0x7fb   : > { %v1342_v63 = vadd.f32 1e-05, %v1341_v62 }
 0x7fd   : > { %1844 = vrsqrt.f32 %v1342_v63 }
 0x807   : > { %v1845_v1 = vpop.eup %1844 }
 0x808   : > { %v1344_v3 = vmul.f32 %v1845_v1, %v1336_v54 }
 0x80a   : > { %v1351_v5 = vmul.f32 %v1631_v2, %v1344_v3 }
 0x80c   : > { %v1358_v6 = vadd.f32 %v1632_v4, %v1351_v5 }
 0x80e   : > { %1750 = vmatmul.mubr.msk.f32.vlgmr.msra.gmra.mrb[12].mxu1 %vm454_vm0, %v1358_v6 }
 0x8e1   : > { %v1439_v22 = vpop.f32.mrb[12].mxu1 }
 0x8e2   : > { %v1440_v23 = vadd.f32 %v1633_v21, %v1439_v22  ;;  %v1751_v24 = vpop.f32.mrb[13].mxu1 }
 0x8e4   : > { %v1444_v25 = vmul.f32 0.044715, %v1440_v23  ;;  %v1443_v31 = vmul.f32 0.5, %v1440_v23 }
 0x8e6   : > { %v1445_v26 = vmul.f32 %v1444_v25, %v1440_v23 }
 0x8e8   : > { %v1446_v27 = vmul.f32 %v1445_v26, %v1440_v23 }
 0x8ea   : > { %v1447_v28 = vadd.f32 %v1446_v27, %v1440_v23 }
 0x8ec   : > { %v1448_v29 = vmul.f32 0.7978846, %v1447_v28 }
 0x8ee   : > { %1846 = vtanh.f32 %v1448_v29 }
 0x8f8   : > { %v1847_v30 = vpop.eup %1846 }
 0x8f9   : > { %v1450_v32 = vadd.f32 1.0, %v1847_v30 }
 0x8fb   : > { %v1451_v10 = vmul.f32 %v1450_v32, %v1443_v31 }
 0x8fd   : > { %1769 = vmatmul.mubr.msk.f32.vlgmr.msra.gmra.mrb[8].mxu0 %vm1460_vm5, %v1451_v10 }
 0x9d0   : > { %v1530_v33 = vpop.f32.mrb[8].mxu0 }
 0x9d1   : > { %v1534_v35 = vadd.f32 %v1530_v33, %v2075_v50  ;;  %v1770_v36 = vpop.f32.mrb[9].mxu0 }
 0x9d3   : > { %v1542_v37 = vadd.f32 %v1636_v34, %v1534_v35 }
 0x9d5   : > { %1543 = vst.msk [vmem:[%s449_s17] sm:$0xff] %vm454_vm0, %v1542_v37 }
 0x9d6 PF: > { %s23_s25 = sadd.s32 1, %s1854_s25  }
 0x9d7   : > { %p20_p4 = scmp.ge.s32.totalorder %s23_s25, 4  }
 0x9d9   :  { %22 = sbr.rel (!%p20_p4) target bundleno = 1 (0x1), region = 105 }

// kernel: forward.6
= control target key start
LH: loop header
LB: loop body
LE: loop exit
PB: predicated region body
PF: predicated region fallthrough
CT: control target
= control target key end

     0   :  { %s2040_s18 = smov 0   ;;  %s2249_s0 = inlined_call_operand.vmem [shape: f32[2,8,32], index: 0, kind: input, shape index: {}]   ;;  %s2250_s1 = inlined_call_operand.vmem [shape: f32[2,1,8], index: 1, kind: input, shape index: {}]   ;;  %s2251_s2 = inlined_call_operand.vmem [shape: f32[1,32], index: 2, kind: input, shape index: {}]   ;;  %s2252_s3 = inlined_call_operand.vmem [shape: f32[1,32], index: 3, kind: input, shape index: {}]   ;;  %s2253_s4 = inlined_call_operand.vmem [shape: f32[32,96], index: 4, kind: input, shape index: {}]   ;;  %s2254_s5 = inlined_call_operand.vmem [shape: f32[32,32], index: 5, kind: input, shape index: {}]   ;;  %s2255_s6 = inlined_call_operand.vmem [shape: f32[1,32], index: 6, kind: input, shape index: {}]   ;;  %s2256_s7 = inlined_call_operand.vmem [shape: f32[1,32], index: 7, kind: input, shape index: {}]   ;;  %s2257_s8 = inlined_call_operand.vmem [shape: f32[1,32], index: 8, kind: input, shape index: {}]   ;;  %s2258_s9 = inlined_call_operand.vmem [shape: f32[32,64], index: 9, kind: input, shape index: {}]   ;;  %s2259_s10 = inlined_call_operand.vmem [shape: f32[1,64], index: 10, kind: input, shape index: {}]   ;;  %s2260_s11 = inlined_call_operand.vmem [shape: f32[64,32], index: 11, kind: input, shape index: {}]   ;;  %s2261_s12 = inlined_call_operand.vmem [shape: f32[1,32], index: 12, kind: input, shape index: {}]   ;;  %s2262_s13 = inlined_call_operand.vmem [shape: f32[1,32], index: 13, kind: input, shape index: {}]   ;;  %s2263_s14 = inlined_call_operand.vmem [shape: f32[1,32], index: 14, kind: input, shape index: {}]   ;;  %s2264_s15 = inlined_call_operand.vmem [shape: f32[2,8,32], index: 15, kind: output, shape index: {}]  }
   0x1 LB: > { %s1689_s19 = sadd.s32 4294967295, %s1941_s18   ;;  %p1693_p0 = scmp.ge.s32.totalorder %s1941_s18, 1  ;;  %s1941_s18 = sphi %s2040_s18, %s25_s18  }
   0x2   : > { %p444_p1 = scmp.lt.s32.totalorder %s1941_s18, 3 }
   0x4   : > { %p445_p2 = pnand %p1693_p0, %p444_p1 }
   0x5   : > { %p493_p3 = scmp.lt.s32.totalorder (!%p445_p2), %s1689_s19, 1  ;;  %vm508_vm0 = vcmask (!%p445_p2), 261120   ;;  %v537_v7 = vld [vmem:[%s2253_s4] sm:$0xff] (!%p445_p2)  ;;  %v538_v8 = vld [vmem:[%s2253_s4 + $0x8] sm:$0xff] (!%p445_p2)  ;;  %v539_v9 = vld [vmem:[%s2253_s4 + $0x10] sm:$0xff] (!%p445_p2)  ;;  %v1943_v10 = vmov (!%p445_p2), 0.0|0.0  }
   0x6   : > { %448 = sbr.rel (%p445_p2) target bundleno = 2831 (0xb0f), region = 80  ;;  %1856 = vmatprep.subr.bf16.mxu1 (!%p445_p2), %v1943_v10  ;;  %v1857_v11 = vpack.c.bf16 (!%p445_p2), %v538_v8, %v537_v7  ;;  %v540_v12 = vld [vmem:[%s2253_s4 + $0x18] sm:$0xff] (!%p445_p2)  ;;  %vm1944_vm1 = vmmov (!%p445_p2), 0   ;;  %v1945_v13 = vmov (!%p445_p2), 0.0   ;;  %v1696_v19 = vld [vmem:[%s2251_s2] ss:$0 sm:$0xff] (!%p445_p2) }
   0x7   : > { %1772 = vmatprep.mubr.msk.f32.mxu1 (!%p445_p2), %vm1944_vm1, %v1945_v13  ;;  %1785 = vmatprep.subr.mxu0 (!%p445_p2), %v1945_v13  ;;  %v1860_v14 = vpack.c.bf16 (!%p445_p2), %v540_v12, %v539_v9  ;;  %v1697_v21 = vld [vmem:[%s2252_s3] ss:$0 sm:$0xff] (!%p445_p2)  ;;  %s1946_s24 = smov (!%p445_p2), 96   ;;  %s1947_s25 = smov (!%p445_p2), 120   ;;  %vm629_vm2 = vcmask (!%p445_p2), 64512   ;;  %vm1300_vm3 = vcmask (!%p445_p2), 130048  }
   0x8   : > { %1787 = vmatprep.mubr.msk.f32.mxu0 (!%p445_p2), %vm1944_vm1, %v1945_v13  ;;  %1858 = vmatpush3.bf16.msra.mxu1 (!%p445_p2), %v1857_v11  ;;  %s1948_s26 = smov (!%p445_p2), 88   ;;  %s1949_s27 = smov (!%p445_p2), 80   ;;  %vm1302_vm4 = vcmask (!%p445_p2), 195584   ;;  %vm1514_vm5 = vcmask (!%p445_p2), 523264  }
   0x9   : > { %1859 = vmatprep.subr.bf16.mxu1 (!%p445_p2), %v1943_v10  ;;  %s1950_s28 = smov (!%p445_p2), 72   ;;  %s1951_s29 = smov (!%p445_p2), 112  }
   0xa   : > { %s1952_s30 = smov (!%p445_p2), 104   ;;  %s1953_s22 = smov (!%p445_p2), 64  }
   0xc   : > { %1861 = vmatpush3.bf16.msra.mxu1 (!%p445_p2), %v1860_v14 }
   0xd   : > { %s2266_s19 = smov (!%p493_p3, %s1689_s19), 1  ;;  %1775 = vmatprep.subr.mxu1 %v1945_v13 }
   0xe   : > { %s1694_s20 = sshll.u32 %s2266_s19, 3  ;;  %s499_s21 = scalar_lea.vmem %s2250_s1, %s2266_s19 }
   0xf   : > { %s496_s23 = scalar_lea.vmem %s2249_s0, %s1694_s20  ;;  %v1699_v34 = vld [vmem:[%s499_s21] ss:$0 sm:$0xff] }
  0x10   : > { %v2056_v0 = vld [vmem:[%s496_s23] sm:$0xff]  ;;  %s1954_s23 = smov 48  }
  0x11   : > { %v509_v1 = vsel %vm508_vm0, %v2056_v0, 0.0 }
  0x12   : > { %510 = vadd.xlane.f32.xlu0 %v509_v1 }
  0x9f   : > { %v511_v2 = vpop.xlane.xlu0 %510 }
  0xa0   : > { %v513_v3 = vmul.f32 0.03125, %v511_v2 }
  0xa2   : > { %v514_v4 = vsub.f32 %v2056_v0, %v513_v3 }
  0xa4   : > { %v515_v5 = vmul.f32 %v514_v4, %v514_v4 }
  0xa6   : > { %v516_v6 = vsel %vm508_vm0, %v515_v5, 0.0 }
  0xa7   : > { %517 = vadd.xlane.f32.xlu0 %v516_v6 }
 0x134   : > { %v518_v15 = vpop.xlane.xlu0 %517 }
 0x135   : > { %v519_v16 = vmul.f32 0.03125, %v518_v15 }
 0x137   : > { %v520_v17 = vadd.f32 1e-05, %v519_v16 }
 0x139   : > { %1911 = vrsqrt.f32 %v520_v17 }
 0x143   : > { %v1912_v18 = vpop.eup %1911 }
 0x144   : > { %v522_v20 = vmul.f32 %v1912_v18, %v514_v4 }
 0x146   : > { %v529_v22 = vmul.f32 %v1696_v19, %v522_v20 }
 0x148   : > { %v536_v23 = vadd.f32 %v1697_v21, %v529_v22 }
 0x14a   : > { %1773 = vmatmul.mubr.msk.f32.vlgmr.msra.gmra.mrb[0].mxu1 %vm508_vm0, %v536_v23 }
 0x14b   : > { %1777 = vmatprep.mubr.msk.f32.mxu1 %vm1944_vm1, %v1945_v13 }
 0x21d   : > { %v2091_v24 = vpop.f32.mrb[0].mxu1 }
 0x21e   : > { %627 = vrot.lane.b32.xlu1 %v2091_v24, %s1946_s24  ;;  %v1774_v25 = vpop.f32.mrb[1].mxu1  ;;  %v614_v26 = vmul.f32 0.35355338, %v2091_v24  ;;  %s1955_s24 = smov 40  }
 0x220   : > { %792 = vrot.lane.b32.xlu0 %v614_v26, %s1947_s25  ;;  %s1956_s25 = smov 56  }
 0x222   : > { %794 = vrot.lane.b32.xlu1 %v2091_v24, %s1948_s26 }
 0x226   : > { %959 = vrot.lane.b32.xlu1 %v2091_v24, %s1949_s27 }
 0x22a   : > { %1124 = vrot.lane.b32.xlu1 %v2091_v24, %s1950_s28 }
 0x22e   : > { %957 = vrot.lane.b32.xlu1 %v614_v26, %s1951_s29  ;;  %s503_s29 = scalar_lea.vmem %s2264_s15, %s1694_s20 }
 0x232   : > { %1122 = vrot.lane.b32.xlu1 %v614_v26, %s1952_s30 }
 0x290   : > { %v628_v27 = vpop.permute.xlu1 %627 }
 0x291   : > { %1776 = vmatpush3.xpose.msk.msra.mxu1 %vm629_vm2, %v628_v27  ;;  %v616_v27 = vld [vmem:[%s2254_s5 + $0x8] sm:$0xff] }
 0x292   : > { %1780 = vmatprep.subr.mxu1 %v1945_v13  ;;  %v793_v29 = vpop.permute.xlu0 %792 }
 0x294   : > { %v795_v28 = vpop.permute.xlu1 %794  ;;  %1778 = vmatmul.mubr.msk.f32.vlgmr.msra.gmra.mrb[2].mxu1 %vm629_vm2, %v614_v26  ;;  %v615_v26 = vld [vmem:[%s2254_s5] sm:$0xff] }
 0x295   : > { %1786 = vmatpush3.xpose.msk.msra.mxu0 %vm629_vm2, %v795_v28  ;;  %1782 = vmatprep.mubr.msk.f32.mxu1 %vm1944_vm1, %v1945_v13  ;;  %v1863_v28 = vpack.c.bf16 %v616_v27, %v615_v26 }
 0x296   : > { %1795 = vmatprep.subr.mxu0 %v1945_v13 }
 0x298   : > { %v960_v30 = vpop.permute.xlu1 %959  ;;  %1788 = vmatmul.mubr.msk.f32.vlgmr.msra.gmra.mrb[0].mxu0 %vm629_vm2, %v793_v29 }
 0x299   : > { %1796 = vmatpush3.xpose.msk.msra.mxu0 %vm629_vm2, %v960_v30  ;;  %1797 = vmatprep.mubr.msk.f32.mxu0 %vm1944_vm1, %v1945_v13 }
 0x29a   : > { %1805 = vmatprep.subr.mxu0 %v1945_v13 }
 0x29c   : > { %v1125_v31 = vpop.permute.xlu1 %1124 }
 0x2a0   : > { %v958_v32 = vpop.permute.xlu1 %957 }
 0x2a1   : > { %1798 = vmatmul.mubr.msk.f32.vlgmr.msra.gmra.mrb[2].mxu0 %vm629_vm2, %v958_v32  ;;  %v618_v32 = vld [vmem:[%s2254_s5 + $0x18] sm:$0xff] }
 0x2a2   : > { %1806 = vmatpush3.xpose.msk.msra.mxu0 %vm629_vm2, %v1125_v31  ;;  %1807 = vmatprep.mubr.msk.f32.mxu0 %vm1944_vm1, %v1945_v13  ;;  %v617_v31 = vld [vmem:[%s2254_s5 + $0x10] sm:$0xff] }
 0x2a3   : > { %1862 = vmatprep.subr.bf16.mxu0 %v1943_v10 }
 0x2a4   : > { %v1123_v33 = vpop.permute.xlu1 %1122 }
 0x2a5   : > { %1808 = vmatmul.mubr.msk.f32.vlgmr.msra.gmra.mrb[4].mxu0 %vm629_vm2, %v1123_v33  ;;  %v1866_v33 = vpack.c.bf16 %v618_v32, %v617_v31 }
 0x2a6   : > { %1823 = vmatprep.mubr.msk.f32.mxu0 %vm1944_vm1, %v1945_v13  ;;  %1864 = vmatpush3.bf16.msra.mxu0 %v1863_v28 }
 0x2a7   : > { %1865 = vmatprep.subr.bf16.mxu0 %v1943_v10 }
 0x2aa   : > { %1867 = vmatpush3.bf16.msra.mxu0 %v1866_v33 }
 0x2ab   : > { %1874 = vmatprep.subr.bf16.mxu0 %v1943_v10 }
 0x367   : > { %v701_v35 = vpop.f32.mrb[2].mxu1 }
 0x368   : > { %v702_v36 = vadd.f32 %v1699_v34, %v701_v35  ;;  %v1779_v37 = vpop.f32.mrb[3].mxu1 }
 0x36a   : > { %v705_v38 = vsel %vm629_vm2, %v702_v36, -inf }
 0x36b   : > { %v866_v39 = vpop.f32.mrb[0].mxu0  ;;  %706 = vmax.xlane.f32.xlu1 %v705_v38 }
 0x36c   : > { %v867_v40 = vadd.f32 %v1699_v34, %v866_v39  ;;  %v1789_v41 = vpop.f32.mrb[1].mxu0 }
 0x36e   : > { %v870_v42 = vsel %vm629_vm2, %v867_v40, -inf }
 0x36f   : > { %871 = vmax.xlane.f32.xlu0 %v870_v42 }
 0x374   : > { %v1031_v43 = vpop.f32.mrb[2].mxu0 }
 0x375   : > { %v1032_v44 = vadd.f32 %v1699_v34, %v1031_v43  ;;  %v1799_v45 = vpop.f32.mrb[3].mxu0 }
 0x377   : > { %v1035_v46 = vsel %vm629_vm2, %v1032_v44, -inf }
 0x378   : > { %v1196_v47 = vpop.f32.mrb[4].mxu0  ;;  %1036 = vmax.xlane.f32.xlu1 %v1035_v46  ;;  %v1712_v46 = vld [vmem:[%s2255_s6] ss:$0 sm:$0xff] }
 0x379   : > { %v1197_v48 = vadd.f32 %v1699_v34, %v1196_v47  ;;  %v1809_v49 = vpop.f32.mrb[5].mxu0 }
 0x37b   : > { %v1200_v50 = vsel %vm629_vm2, %v1197_v48, -inf }
 0x37c   : > { %1201 = vmax.xlane.f32.xlu0 %v1200_v50 }
 0x389   : > { %716 = vrot.lane.b32.xlu1 %v2091_v24, %s1953_s22  ;;  %s1957_s22 = smov 8  }
 0x3f8   : > { %v707_v51 = vpop.xlane.xlu1 %706 }
 0x3f9   : > { %v708_v52 = vsub.f32 %v702_v36, %v707_v51 }
 0x3fb   : > { %v709_v53 = vmul.f32 1.442695, %v708_v52 }
 0x3fc   : > { %v872_v54 = vpop.xlane.xlu0 %871 }
 0x3fd   : > { %1913 = vpow2.f32 %v709_v53  ;;  %v873_v55 = vsub.f32 %v867_v40, %v872_v54 }
 0x3ff   : > { %v874_v56 = vmul.f32 1.442695, %v873_v55 }
 0x401   : > { %1915 = vpow2.f32 %v874_v56  ;;  %v1413_v56 = vld [vmem:[%s2258_s9] sm:$0xff] }
 0x405   : > { %v1037_v57 = vpop.xlane.xlu1 %1036 }
 0x406   : > { %v1038_v58 = vsub.f32 %v1032_v44, %v1037_v57 }
 0x407   : > { %v1914_v59 = vpop.eup %1913 }
 0x408   : > { %v1039_v60 = vmul.f32 1.442695, %v1038_v58  ;;  %v711_v61 = vsel %vm629_vm2, %v1914_v59, 0.0  ;;  %v1415_v58 = vld [vmem:[%s2258_s9 + $0x10] sm:$0xff] }
 0x409   : > { %v1202_v62 = vpop.xlane.xlu0 %1201  ;;  %712 = vadd.xlane.f32.xlu1 %v711_v61  ;;  %v717_v63 = vpop.permute.xlu1 %716 }
 0x40a   : > { %1917 = vpow2.f32 %v1039_v60  ;;  %v1203_v1 = vsub.f32 %v1197_v48, %v1202_v62  ;;  %1781 = vmatpush3.msra.mxu1 %v717_v63 }
 0x40b   : > { %v1916_v2 = vpop.eup %1915  ;;  %1790 = vmatprep.subr.mxu1 %v1945_v13 }
 0x40c   : > { %v1204_v3 = vmul.f32 1.442695, %v1203_v1  ;;  %v876_v4 = vsel %vm629_vm2, %v1916_v2, 0.0 }
 0x40d   : > { %877 = vadd.xlane.f32.xlu0 %v876_v4  ;;  %v1715_v4 = vld [vmem:[%s2257_s8] ss:$0 sm:$0xff] }
 0x40e   : > { %1919 = vpow2.f32 %v1204_v3 }
 0x414   : > { %v1918_v5 = vpop.eup %1917 }
 0x415   : > { %v1041_v6 = vsel %vm629_vm2, %v1918_v5, 0.0 }
 0x416   : > { %1042 = vadd.xlane.f32.xlu1 %v1041_v6 }
 0x418   : > { %v1920_v7 = vpop.eup %1919 }
 0x419   : > { %v1206_v8 = vsel %vm629_vm2, %v1920_v7, 0.0 }
 0x41a   : > { %1207 = vadd.xlane.f32.xlu0 %v1206_v8  ;;  %v1507_v8 = vld [vmem:[%s2260_s11 + $0x8] sm:$0xff] }
 0x427   : > { %1046 = vrot.lane.b32.xlu1 %v2091_v24, %s1954_s23  ;;  %s1958_s23 = smov 16  }
 0x42b   : > { %1211 = vrot.lane.b32.xlu1 %v2091_v24, %s1955_s24  ;;  %s1959_s24 = smov 24  }
 0x430   : > { %881 = vrot.lane.b32.xlu0 %v2091_v24, %s1956_s25 }
 0x496   : > { %v713_v9 = vpop.xlane.xlu1 %712 }
 0x497   : > { %1921 = vrcp.f32 %v713_v9 }
 0x49a   : > { %v878_v11 = vpop.xlane.xlu0 %877 }
 0x49b   : > { %1923 = vrcp.f32 %v878_v11  ;;  %v1508_v11 = vld [vmem:[%s2260_s11 + $0x10] sm:$0xff] }
 0x4a1   : > { %v1922_v12 = vpop.eup %1921 }
 0x4a2   : > { %v715_v14 = vmul.f32 %v1922_v12, %v1914_v59  ;;  %v1416_v59 = vld [vmem:[%s2258_s9 + $0x18] sm:$0xff] }
 0x4a3   : > { %v1043_v15 = vpop.xlane.xlu1 %1042  ;;  %v1872_v60 = vpack.c.bf16 %v1416_v59, %v1415_v58  ;;  %v1509_v12 = vld [vmem:[%s2260_s11 + $0x18] sm:$0xff] }
 0x4a4   : > { %1925 = vrcp.f32 %v1043_v15  ;;  %1783 = vmatmul.mubr.msk.f32.vlgmr.msra.gmra.mrb[4].mxu1 %vm629_vm2, %v715_v14  ;;  %v1878_v14 = vpack.c.bf16 %v1509_v12, %v1508_v11  ;;  %v1510_v15 = vld [vmem:[%s2260_s11 + $0x20] sm:$0xff] }
 0x4a5   : > { %1792 = vmatprep.mubr.msk.f32.mxu1 %vm1944_vm1, %v1945_v13  ;;  %v1924_v17 = vpop.eup %1923 }
 0x4a6   : > { %v880_v18 = vmul.f32 %v1924_v17, %v1916_v2  ;;  %v1714_v2 = vld [vmem:[%s2256_s7] ss:$0 sm:$0xff] }
 0x4a7   : > { %v1208_v16 = vpop.xlane.xlu0 %1207  ;;  %v1047_v19 = vpop.permute.xlu1 %1046 }
 0x4a8   : > { %1927 = vrcp.f32 %v1208_v16  ;;  %v1511_v16 = vld [vmem:[%s2260_s11 + $0x28] sm:$0xff] }
 0x4a9   : > { %v1881_v17 = vpack.c.bf16 %v1511_v16, %v1510_v15 }
 0x4ab   : > { %v882_v20 = vpop.permute.xlu0 %881  ;;  %v1212_v23 = vpop.permute.xlu1 %1211 }
 0x4ac   : > { %1791 = vmatpush3.msra.mxu1 %v882_v20 }
 0x4ad   : > { %1793 = vmatmul.mubr.msk.f32.vlgmr.msra.gmra.mrb[6].mxu1 %vm629_vm2, %v880_v18  ;;  %1800 = vmatprep.subr.mxu1 %v1945_v13  ;;  %v1512_v18 = vld [vmem:[%s2260_s11 + $0x30] sm:$0xff] }
 0x4ae   : > { %v1926_v21 = vpop.eup %1925  ;;  %1801 = vmatpush3.msra.mxu1 %v1047_v19  ;;  %1802 = vmatprep.mubr.msk.f32.mxu1 %vm1944_vm1, %v1945_v13  ;;  %v1513_v19 = vld [vmem:[%s2260_s11 + $0x38] sm:$0xff] }
 0x4af   : > { %v1045_v22 = vmul.f32 %v1926_v21, %v1918_v5  ;;  %1810 = vmatprep.subr.mxu1 %v1945_v13  ;;  %v1884_v20 = vpack.c.bf16 %v1513_v19, %v1512_v18  ;;  %v1716_v21 = vld [vmem:[%s2259_s10] ss:$0 sm:$0xff] }
 0x4b1   : > { %1803 = vmatmul.mubr.msk.f32.vlgmr.msra.gmra.mrb[8].mxu1 %vm629_vm2, %v1045_v22 }
 0x4b2   : > { %v1928_v24 = vpop.eup %1927  ;;  %1811 = vmatpush3.msra.mxu1 %v1212_v23  ;;  %1812 = vmatprep.mubr.msk.f32.mxu1 %vm1944_vm1, %v1945_v13 }
 0x4b3   : > { %v1210_v25 = vmul.f32 %v1928_v24, %v1920_v7  ;;  %1868 = vmatprep.subr.bf16.mxu1 %v1943_v10  ;;  %v1506_v7 = vld [vmem:[%s2260_s11] sm:$0xff] }
 0x4b4   : > { %v1875_v9 = vpack.c.bf16 %v1507_v8, %v1506_v7 }
 0x4b5   : > { %1813 = vmatmul.mubr.msk.f32.vlgmr.msra.gmra.mrb[10].mxu1 %vm629_vm2, %v1210_v25 }
 0x4b6   : > { %1834 = vmatprep.mubr.msk.f32.mxu1 %vm1944_vm1, %v1945_v13 }
 0x577   : > { %v788_v29 = vpop.f32.mrb[4].mxu1 }
 0x578   : > { %v1784_v30 = vpop.f32.mrb[5].mxu1 }
 0x580   : > { %v953_v34 = vpop.f32.mrb[6].mxu1 }
 0x581   : > { %1288 = vrot.lane.b32.xlu0 %v953_v34, %s1957_s22  ;;  %v1794_v35 = vpop.f32.mrb[7].mxu1  ;;  %v1719_v34 = vld [vmem:[%s2261_s12] ss:$0 sm:$0xff] }
 0x584   : > { %v1118_v36 = vpop.f32.mrb[8].mxu1 }
 0x585   : > { %1292 = vrot.lane.b32.xlu1 %v1118_v36, %s1958_s23  ;;  %v1804_v37 = vpop.f32.mrb[9].mxu1 }
 0x588   : > { %v1283_v38 = vpop.f32.mrb[10].mxu1 }
 0x589   : > { %1296 = vrot.lane.b32.xlu0 %v1283_v38, %s1959_s24  ;;  %v1814_v39 = vpop.f32.mrb[11].mxu1 }
 0x5f3   : > { %v1289_v40 = vpop.permute.xlu0 %1288 }
 0x5f4   : > { %v1299_v42 = vsel %vm629_vm2, %v788_v29, %v1289_v40 }
 0x5f7   : > { %v1293_v41 = vpop.permute.xlu1 %1292 }
 0x5f8   : > { %v1301_v43 = vsel %vm1300_vm3, %v1299_v42, %v1293_v41 }
 0x5fb   : > { %v1297_v44 = vpop.permute.xlu0 %1296 }
 0x5fc   : > { %v1303_v45 = vsel %vm1302_vm4, %v1301_v43, %v1297_v44 }
 0x5fd   : > { %1824 = vmatmul.mubr.msk.f32.vlgmr.msra.gmra.mrb[6].mxu0 %vm508_vm0, %v1303_v45 }
 0x5fe   : > { %1853 = vmatprep.mubr.msk.f32.mxu0 %vm1944_vm1, %v1945_v13  ;;  %1876 = vmatpush3.bf16.msra.mxu0 %v1875_v9 }
 0x5ff   : > { %1877 = vmatprep.subr.bf16.mxu0 %v1943_v10 }
 0x602   : > { %1879 = vmatpush3.bf16.msra.mxu0 %v1878_v14 }
 0x603   : > { %1880 = vmatprep.subr.bf16.mxu0 %v1943_v10 }
 0x606   : > { %1882 = vmatpush3.bf16.msra.mxu0 %v1881_v17 }
 0x607   : > { %1883 = vmatprep.subr.bf16.mxu0 %v1943_v10 }
 0x60a   : > { %1885 = vmatpush3.bf16.msra.mxu0 %v1884_v20 }
 0x6d0   : > { %v1379_v47 = vpop.f32.mrb[6].mxu0 }
 0x6d1   : > { %v1380_v48 = vadd.f32 %v1712_v46, %v1379_v47  ;;  %v1825_v49 = vpop.f32.mrb[7].mxu0 }
 0x6d3   : > { %v2172_v50 = vadd.f32 %v1380_v48, %v2056_v0  ;;  %v1414_v0 = vld [vmem:[%s2258_s9 + $0x8] sm:$0xff]  ;;  %v1720_v48 = vld [vmem:[%s2262_s13] ss:$0 sm:$0xff] }
 0x6d4   : > { %v1869_v57 = vpack.c.bf16 %v1414_v0, %v1413_v56 }
 0x6d5   : > { %v1386_v51 = vsel %vm508_vm0, %v2172_v50, 0.0 }
 0x6d6   : > { %1387 = vadd.xlane.f32.xlu1 %v1386_v51  ;;  %1870 = vmatpush3.bf16.msra.mxu1 %v1869_v57 }
 0x6d7   : > { %1871 = vmatprep.subr.bf16.mxu1 %v1943_v10 }
 0x6da   : > { %1873 = vmatpush3.bf16.msra.mxu1 %v1872_v60 }
 0x763   : > { %v1388_v52 = vpop.xlane.xlu1 %1387 }
 0x764   : > { %v1389_v53 = vmul.f32 0.03125, %v1388_v52 }
 0x766   : > { %v1390_v54 = vsub.f32 %v2172_v50, %v1389_v53 }
 0x768   : > { %v1391_v55 = vmul.f32 %v1390_v54, %v1390_v54 }
 0x76a   : > { %v1392_v13 = vsel %vm508_vm0, %v1391_v55, 0.0 }
 0x76b   : > { %1393 = vadd.xlane.f32.xlu0 %v1392_v13 }
 0x7f8   : > { %v1394_v61 = vpop.xlane.xlu0 %1393 }
 0x7f9   : > { %v1395_v62 = vmul.f32 0.03125, %v1394_v61 }
 0x7fb   : > { %v1396_v63 = vadd.f32 1e-05, %v1395_v62 }
 0x7fd   : > { %1929 = vrsqrt.f32 %v1396_v63 }
 0x807   : > { %v1930_v1 = vpop.eup %1929 }
 0x808   : > { %v1398_v3 = vmul.f32 %v1930_v1, %v1390_v54 }
 0x80a   : > { %v1405_v5 = vmul.f32 %v1714_v2, %v1398_v3 }
 0x80c   : > { %v1412_v6 = vadd.f32 %v1715_v4, %v1405_v5 }
 0x80e   : > { %1835 = vmatmul.mubr.msk.f32.vlgmr.msra.gmra.mrb[12].mxu1 %vm508_vm0, %v1412_v6 }
 0x8e1   : > { %v1493_v22 = vpop.f32.mrb[12].mxu1 }
 0x8e2   : > { %v1494_v23 = vadd.f32 %v1716_v21, %v1493_v22  ;;  %v1836_v24 = vpop.f32.mrb[13].mxu1 }
 0x8e4   : > { %v1498_v25 = vmul.f32 0.044715, %v1494_v23  ;;  %v1497_v31 = vmul.f32 0.5, %v1494_v23 }
 0x8e6   : > { %v1499_v26 = vmul.f32 %v1498_v25, %v1494_v23 }
 0x8e8   : > { %v1500_v27 = vmul.f32 %v1499_v26, %v1494_v23 }
 0x8ea   : > { %v1501_v28 = vadd.f32 %v1500_v27, %v1494_v23 }
 0x8ec   : > { %v1502_v29 = vmul.f32 0.7978846, %v1501_v28 }
 0x8ee   : > { %1931 = vtanh.f32 %v1502_v29 }
 0x8f8   : > { %v1932_v30 = vpop.eup %1931 }
 0x8f9   : > { %v1504_v32 = vadd.f32 1.0, %v1932_v30 }
 0x8fb   : > { %v1505_v33 = vmul.f32 %v1504_v32, %v1497_v31 }
 0x8fd   : > { %1854 = vmatmul.mubr.msk.f32.vlgmr.msra.gmra.mrb[8].mxu0 %vm1514_vm5, %v1505_v33 }
 0x9d0   : > { %v1584_v10 = vpop.f32.mrb[8].mxu0 }
 0x9d1   : > { %v1588_v35 = vadd.f32 %v1584_v10, %v2172_v50  ;;  %v1855_v36 = vpop.f32.mrb[9].mxu0  ;;  %v1721_v50 = vld [vmem:[%s2263_s14] ss:$0 sm:$0xff] }
 0x9d3   : > { %v1596_v37 = vadd.f32 %v1719_v34, %v1588_v35 }
 0x9d5   : > { %v1599_v38 = vsel %vm508_vm0, %v1596_v37, 0.0 }
 0x9d6   : > { %1600 = vadd.xlane.f32.xlu0 %v1599_v38 }
 0xa63   : > { %v1601_v39 = vpop.xlane.xlu0 %1600 }
 0xa64   : > { %v1602_v40 = vmul.f32 0.03125, %v1601_v39 }
 0xa66   : > { %v1603_v41 = vsub.f32 %v1596_v37, %v1602_v40 }
 0xa68   : > { %v1604_v42 = vmul.f32 %v1603_v41, %v1603_v41 }
 0xa6a   : > { %v1605_v43 = vsel %vm508_vm0, %v1604_v42, 0.0 }
 0xa6b   : > { %1606 = vadd.xlane.f32.xlu1 %v1605_v43 }
 0xaf8   : > { %v1607_v44 = vpop.xlane.xlu1 %1606 }
 0xaf9   : > { %v1608_v45 = vmul.f32 0.03125, %v1607_v44 }
 0xafb   : > { %v1609_v46 = vadd.f32 1e-05, %v1608_v45 }
 0xafd   : > { %1933 = vrsqrt.f32 %v1609_v46 }
 0xb07   : > { %v1934_v47 = vpop.eup %1933 }
 0xb08   : > { %v1611_v49 = vmul.f32 %v1934_v47, %v1603_v41 }
 0xb0a   : > { %v1618_v51 = vmul.f32 %v1720_v48, %v1611_v49 }
 0xb0c   : > { %v1625_v52 = vadd.f32 %v1721_v50, %v1618_v51 }
 0xb0e   : > { %1626 = vst.msk [vmem:[%s503_s29] sm:$0xff] %vm508_vm0, %v1625_v52 }
 0xb0f PF: > { %s25_s18 = sadd.s32 1, %s1941_s18  }
 0xb10   : > { %p22_p4 = scmp.ge.s32.totalorder %s25_s18, 4  }
 0xb12   :  { %24 = sbr.rel (!%p22_p4) target bundleno = 1 (0x1), region = 113 }

// kernel: forward.7
= control target key start
LH: loop header
LB: loop body
LE: loop exit
PB: predicated region body
PF: predicated region fallthrough
CT: control target
= control target key end

     0   :  { %s3688_s0 = inlined_call_operand.vmem [shape: f32[2,8,32], index: 0, kind: input, shape index: {}]   ;;  %s3689_s1 = inlined_call_operand.vmem [shape: f32[2,8,32], index: 1, kind: input, shape index: {}]   ;;  %s3690_s2 = inlined_call_operand.vmem [shape: f32[8,8], index: 2, kind: input, shape index: {}]   ;;  %s3691_s3 = inlined_call_operand.vmem [shape: f32[2,1,8], index: 3, kind: input, shape index: {}]   ;;  %s3692_s4 = inlined_call_operand.vmem [shape: f32[1,32], index: 4, kind: input, shape index: {}]   ;;  %s3693_s5 = inlined_call_operand.vmem [shape: f32[1,32], index: 5, kind: input, shape index: {}]   ;;  %s3694_s6 = inlined_call_operand.vmem [shape: f32[32,96], index: 6, kind: input, shape index: {}]   ;;  %s3695_s7 = inlined_call_operand.vmem [shape: f32[32,32], index: 7, kind: input, shape index: {}]   ;;  %s3696_s8 = inlined_call_operand.vmem [shape: f32[1,32], index: 8, kind: input, shape index: {}]   ;;  %s3697_s9 = inlined_call_operand.vmem [shape: f32[1,32], index: 9, kind: input, shape index: {}]   ;;  %s3698_s10 = inlined_call_operand.vmem [shape: f32[1,32], index: 10, kind: input, shape index: {}]   ;;  %s3699_s11 = inlined_call_operand.vmem [shape: f32[32,32], index: 11, kind: input, shape index: {}]   ;;  %s3700_s12 = inlined_call_operand.vmem [shape: f32[32,64], index: 12, kind: input, shape index: {}]   ;;  %s3701_s13 = inlined_call_operand.vmem [shape: f32[32,32], index: 13, kind: input, shape index: {}]   ;;  %s3702_s14 = inlined_call_operand.vmem [shape: f32[1,32], index: 14, kind: input, shape index: {}]   ;;  %s3703_s15 = inlined_call_operand.vmem [shape: f32[1,32], index: 15, kind: input, shape index: {}]   ;;  %s3704_s16 = inlined_call_operand.vmem [shape: f32[1,32], index: 16, kind: input, shape index: {}]   ;;  %s3705_s17 = inlined_call_operand.vmem [shape: f32[32,64], index: 17, kind: input, shape index: {}]   ;;  %s3706_s18 = inlined_call_operand.vmem [shape: f32[1,64], index: 18, kind: input, shape index: {}]   ;;  %s3707_s19 = inlined_call_operand.vmem [shape: f32[64,32], index: 19, kind: input, shape index: {}]   ;;  %s3708_s20 = inlined_call_operand.vmem [shape: f32[1,32], index: 20, kind: input, shape index: {}]   ;;  %s3709_s21 = inlined_call_operand.vmem [shape: f32[2,8,32], index: 21, kind: output, shape index: {}]  }
   0x1   :  { %3723 = sst [smem:[#allocation2_spill]] %s3688_s0 }
   0x2   :  { %3724 = sst [smem:[#allocation3_spill]] %s3689_s1 }
   0x3   :  { %3725 = sst [smem:[#allocation4_spill]] %s3690_s2  ;;  %s3331_s2 = smov 0  }
   0x4   :  { %3726 = sst [smem:[#allocation5_spill]] %s3691_s3 }
   0x5   :  { %3727 = sst [smem:[#allocation6_spill]] %s3692_s4 }
   0x6   :  { %3728 = sst [smem:[#allocation7_spill]] %s3693_s5 }
   0x7 LB: > { %s2795_s25 = sadd.s32 4294967295, %s3202_s2   ;;  %p2799_p0 = scmp.ge.s32.totalorder %s3202_s2, 1  ;;  %s3202_s2 = sphi %s3331_s2, %s31_s2  }
   0x8   : > { %p603_p1 = scmp.lt.s32.totalorder %s3202_s2, 3 }
   0xa   : > { %p604_p2 = pnand %p2799_p0, %p603_p1 }
   0xb   : > { %p668_p3 = scmp.lt.s32.totalorder (!%p604_p2), %s2795_s25, 1  ;;  %vm689_vm0 = vcmask (!%p604_p2), 261120   ;;  %s3729_s28 = sld [smem:[#allocation2_spill]] (!%p604_p2)  ;;  %v718_v7 = vld [vmem:[%s3694_s6] sm:$0xff] (!%p604_p2)  ;;  %v719_v8 = vld [vmem:[%s3694_s6 + $0x8] sm:$0xff] (!%p604_p2)  ;;  %v720_v9 = vld [vmem:[%s3694_s6 + $0x10] sm:$0xff] (!%p604_p2) }
   0xc   : > { %607 = sbr.rel (%p604_p2) target bundleno = 4249 (0x1099), region = 104  ;;  %v3204_v10 = vmov (!%p604_p2), 0.0|0.0   ;;  %v3084_v11 = vpack.c.bf16 (!%p604_p2), %v719_v8, %v718_v7  ;;  %v721_v12 = vld [vmem:[%s3694_s6 + $0x18] sm:$0xff] (!%p604_p2)  ;;  %vm3205_vm1 = vmmov (!%p604_p2), 0   ;;  %v3206_v13 = vmov (!%p604_p2), 0.0   ;;  %s3731_s4 = sld [smem:[#allocation7_spill]] (!%p604_p2) }
   0xd   : > { %3083 = vmatprep.subr.bf16.mxu1 (!%p604_p2), %v3204_v10  ;;  %2926 = vmatprep.mubr.msk.f32.mxu1 (!%p604_p2), %vm3205_vm1, %v3206_v13  ;;  %v3087_v14 = vpack.c.bf16 (!%p604_p2), %v721_v12, %v720_v9  ;;  %s3712_s30 = smov (!%p604_p2), 96   ;;  %s3721_s5 = smov (!%p604_p2), 120   ;;  %vm804_vm2 = vcmask (!%p604_p2), 64512   ;;  %vm1475_vm3 = vcmask (!%p604_p2), 130048   ;;  %vm1477_vm4 = vcmask (!%p604_p2), 195584  }
   0xe   : > { %2939 = vmatprep.subr.mxu0 (!%p604_p2), %v3206_v13  ;;  %2941 = vmatprep.mubr.msk.f32.mxu0 (!%p604_p2), %vm3205_vm1, %v3206_v13  ;;  %s3716_s22 = smov (!%p604_p2), 88   ;;  %s3711_s23 = smov (!%p604_p2), 80   ;;  %vm2637_vm5 = vcmask (!%p604_p2), 523264  }
   0xf   : > { %3085 = vmatpush3.bf16.msra.mxu1 (!%p604_p2), %v3084_v11  ;;  %s3710_s1 = smov (!%p604_p2), 72   ;;  %s3719_s24 = smov (!%p604_p2), 112  }
  0x10   : > { %3086 = vmatprep.subr.bf16.mxu1 (!%p604_p2), %v3204_v10  ;;  %s3717_s27 = smov (!%p604_p2), 104   ;;  %s3214_s0 = smov (!%p604_p2), 64  }
  0x11   : > { %s3216_s3 = smov (!%p604_p2), 40  }
  0x12   : > { %v2804_v21 = vld [vmem:[%s3731_s4] ss:$0 sm:$0xff] (!%p604_p2)  ;;  %s3215_s4 = smov (!%p604_p2), 48  }
  0x13   : > { %s3746_s25 = smov (!%p668_p3, %s2795_s25), 1  ;;  %3088 = vmatpush3.bf16.msra.mxu1 %v3087_v14 }
  0x14   : > { %s3342_s26 = sshll.u32 %s3746_s25, 3  ;;  %2929 = vmatprep.subr.mxu1 %v3206_v13 }
  0x15   : > { %s671_s29 = scalar_lea.vmem %s3729_s28, %s3342_s26  ;;  %s3730_s28 = sld [smem:[#allocation6_spill]] }
  0x16   : > { %v3348_v0 = vld [vmem:[%s671_s29] sm:$0xff]  ;;  %s3732_s29 = sld [smem:[#allocation4_spill]] }
  0x17   : > { %v690_v1 = vsel %vm689_vm0, %v3348_v0, 0.0 }
  0x18   : > { %691 = vadd.xlane.f32.xlu0 %v690_v1 }
  0x1b   : > { %v2803_v19 = vld [vmem:[%s3730_s28] ss:$0 sm:$0xff]  ;;  %s3217_s28 = smov 56  }
  0x1c   : > { %v685_v34 = vld [vmem:[%s3732_s29] sm:$0xff]  ;;  %s3715_s29 = smov 8  }
  0xa5   : > { %v692_v2 = vpop.xlane.xlu0 %691 }
  0xa6   : > { %v694_v3 = vmul.f32 0.03125, %v692_v2 }
  0xa8   : > { %v695_v4 = vsub.f32 %v3348_v0, %v694_v3 }
  0xaa   : > { %v696_v5 = vmul.f32 %v695_v4, %v695_v4 }
  0xac   : > { %v697_v6 = vsel %vm689_vm0, %v696_v5, 0.0 }
  0xad   : > { %698 = vadd.xlane.f32.xlu0 %v697_v6 }
 0x13a   : > { %v699_v15 = vpop.xlane.xlu0 %698 }
 0x13b   : > { %v700_v16 = vmul.f32 0.03125, %v699_v15 }
 0x13d   : > { %v701_v17 = vadd.f32 1e-05, %v700_v16 }
 0x13f   : > { %3156 = vrsqrt.f32 %v701_v17 }
 0x149   : > { %v3157_v18 = vpop.eup %3156 }
 0x14a   : > { %v703_v20 = vmul.f32 %v3157_v18, %v695_v4 }
 0x14c   : > { %v710_v22 = vmul.f32 %v2803_v19, %v703_v20 }
 0x14e   : > { %v717_v23 = vadd.f32 %v2804_v21, %v710_v22 }
 0x150   : > { %2927 = vmatmul.mubr.msk.f32.vlgmr.msra.gmra.mrb[0].mxu1 %vm689_vm0, %v717_v23 }
 0x151   : > { %2931 = vmatprep.mubr.msk.f32.mxu1 %vm3205_vm1, %v3206_v13 }
 0x223   : > { %v3383_v24 = vpop.f32.mrb[0].mxu1 }
 0x224   : > { %802 = vrot.lane.b32.xlu1 %v3383_v24, %s3712_s30  ;;  %v2928_v25 = vpop.f32.mrb[1].mxu1  ;;  %v795_v26 = vmul.f32 0.35355338, %v3383_v24 }
 0x226   : > { %967 = vrot.lane.b32.xlu0 %v795_v26, %s3721_s5 }
 0x228   : > { %969 = vrot.lane.b32.xlu1 %v3383_v24, %s3716_s22  ;;  %s3740_s22 = smov 80  }
 0x22c   : > { %1134 = vrot.lane.b32.xlu1 %v3383_v24, %s3711_s23  ;;  %s3739_s23 = smov 96  }
 0x230   : > { %1299 = vrot.lane.b32.xlu1 %v3383_v24, %s3710_s1  ;;  %s3713_s1 = smov 24  }
 0x234   : > { %1132 = vrot.lane.b32.xlu1 %v795_v26, %s3719_s24  ;;  %s3733_s24 = sld [smem:[#allocation3_spill]] }
 0x238   : > { %1297 = vrot.lane.b32.xlu1 %v795_v26, %s3717_s27 }
 0x23a   : > { %s675_s5 = scalar_lea.vmem %s3733_s24, %s3342_s26  ;;  %s3741_s24 = smov 72  }
 0x296   : > { %v803_v27 = vpop.permute.xlu1 %802 }
 0x297   : > { %2930 = vmatpush3.xpose.msk.msra.mxu1 %vm804_vm2, %v803_v27  ;;  %v797_v27 = vld [vmem:[%s3695_s7 + $0x8] sm:$0xff] }
 0x298   : > { %2934 = vmatprep.subr.mxu1 %v3206_v13  ;;  %v968_v29 = vpop.permute.xlu0 %967 }
 0x29a   : > { %v970_v28 = vpop.permute.xlu1 %969  ;;  %2932 = vmatmul.mubr.msk.f32.vlgmr.msra.gmra.mrb[2].mxu1 %vm804_vm2, %v795_v26  ;;  %v796_v26 = vld [vmem:[%s3695_s7] sm:$0xff] }
 0x29b   : > { %2940 = vmatpush3.xpose.msk.msra.mxu0 %vm804_vm2, %v970_v28  ;;  %2936 = vmatprep.mubr.msk.f32.mxu1 %vm3205_vm1, %v3206_v13  ;;  %v3090_v28 = vpack.c.bf16 %v797_v27, %v796_v26 }
 0x29c   : > { %2949 = vmatprep.subr.mxu0 %v3206_v13 }
 0x29e   : > { %v1135_v30 = vpop.permute.xlu1 %1134  ;;  %2942 = vmatmul.mubr.msk.f32.vlgmr.msra.gmra.mrb[0].mxu0 %vm804_vm2, %v968_v29 }
 0x29f   : > { %2950 = vmatpush3.xpose.msk.msra.mxu0 %vm804_vm2, %v1135_v30  ;;  %2951 = vmatprep.mubr.msk.f32.mxu0 %vm3205_vm1, %v3206_v13 }
 0x2a0   : > { %2959 = vmatprep.subr.mxu0 %v3206_v13 }
 0x2a2   : > { %v1300_v31 = vpop.permute.xlu1 %1299 }
 0x2a6   : > { %v1133_v32 = vpop.permute.xlu1 %1132 }
 0x2a7   : > { %2952 = vmatmul.mubr.msk.f32.vlgmr.msra.gmra.mrb[2].mxu0 %vm804_vm2, %v1133_v32  ;;  %v799_v32 = vld [vmem:[%s3695_s7 + $0x18] sm:$0xff] }
 0x2a8   : > { %2960 = vmatpush3.xpose.msk.msra.mxu0 %vm804_vm2, %v1300_v31  ;;  %2961 = vmatprep.mubr.msk.f32.mxu0 %vm3205_vm1, %v3206_v13  ;;  %v798_v31 = vld [vmem:[%s3695_s7 + $0x10] sm:$0xff] }
 0x2a9   : > { %3089 = vmatprep.subr.bf16.mxu0 %v3204_v10 }
 0x2aa   : > { %v1298_v33 = vpop.permute.xlu1 %1297 }
 0x2ab   : > { %2962 = vmatmul.mubr.msk.f32.vlgmr.msra.gmra.mrb[4].mxu0 %vm804_vm2, %v1298_v33  ;;  %v3093_v33 = vpack.c.bf16 %v799_v32, %v798_v31 }
 0x2ac   : > { %2977 = vmatprep.mubr.msk.f32.mxu0 %vm3205_vm1, %v3206_v13  ;;  %3091 = vmatpush3.bf16.msra.mxu0 %v3090_v28 }
 0x2ad   : > { %3092 = vmatprep.subr.bf16.mxu0 %v3204_v10 }
 0x2b0   : > { %3094 = vmatpush3.bf16.msra.mxu0 %v3093_v33 }
 0x2b1   : > { %3101 = vmatprep.subr.bf16.mxu0 %v3204_v10 }
 0x36d   : > { %v876_v35 = vpop.f32.mrb[2].mxu1 }
 0x36e   : > { %v877_v36 = vadd.f32 %v876_v35, %v685_v34  ;;  %v2933_v37 = vpop.f32.mrb[3].mxu1 }
 0x370   : > { %v880_v38 = vsel %vm804_vm2, %v877_v36, -inf }
 0x371   : > { %v1041_v39 = vpop.f32.mrb[0].mxu0  ;;  %881 = vmax.xlane.f32.xlu1 %v880_v38 }
 0x372   : > { %v1042_v40 = vadd.f32 %v1041_v39, %v685_v34  ;;  %v2943_v41 = vpop.f32.mrb[1].mxu0 }
 0x374   : > { %v1045_v42 = vsel %vm804_vm2, %v1042_v40, -inf }
 0x375   : > { %1046 = vmax.xlane.f32.xlu0 %v1045_v42 }
 0x37a   : > { %v1206_v43 = vpop.f32.mrb[2].mxu0 }
 0x37b   : > { %v1207_v44 = vadd.f32 %v1206_v43, %v685_v34  ;;  %v2953_v45 = vpop.f32.mrb[3].mxu0 }
 0x37d   : > { %v1210_v46 = vsel %vm804_vm2, %v1207_v44, -inf }
 0x37e   : > { %v1371_v47 = vpop.f32.mrb[4].mxu0  ;;  %1211 = vmax.xlane.f32.xlu1 %v1210_v46  ;;  %v2818_v46 = vld [vmem:[%s3696_s8] ss:$0 sm:$0xff] }
 0x37f   : > { %v1372_v48 = vadd.f32 %v1371_v47, %v685_v34  ;;  %v2963_v49 = vpop.f32.mrb[5].mxu0 }
 0x381   : > { %v1375_v50 = vsel %vm804_vm2, %v1372_v48, -inf }
 0x382   : > { %1376 = vmax.xlane.f32.xlu0 %v1375_v50 }
 0x38f   : > { %891 = vrot.lane.b32.xlu1 %v3383_v24, %s3214_s0  ;;  %s3714_s0 = smov 16  }
 0x3fe   : > { %v882_v51 = vpop.xlane.xlu1 %881 }
 0x3ff   : > { %v883_v52 = vsub.f32 %v877_v36, %v882_v51 }
 0x401   : > { %v884_v53 = vmul.f32 1.442695, %v883_v52 }
 0x402   : > { %v1047_v54 = vpop.xlane.xlu0 %1046 }
 0x403   : > { %3158 = vpow2.f32 %v884_v53  ;;  %v1048_v55 = vsub.f32 %v1042_v40, %v1047_v54 }
 0x405   : > { %v1049_v56 = vmul.f32 1.442695, %v1048_v55 }
 0x407   : > { %3160 = vpow2.f32 %v1049_v56 }
 0x40b   : > { %v1212_v57 = vpop.xlane.xlu1 %1211 }
 0x40c   : > { %v1213_v58 = vsub.f32 %v1207_v44, %v1212_v57  ;;  %v1666_v57 = vld [vmem:[%s3700_s12] sm:$0xff] }
 0x40d   : > { %v3159_v59 = vpop.eup %3158 }
 0x40e   : > { %v1214_v60 = vmul.f32 1.442695, %v1213_v58  ;;  %v886_v61 = vsel %vm804_vm2, %v3159_v59, 0.0 }
 0x40f   : > { %v1377_v62 = vpop.xlane.xlu0 %1376  ;;  %887 = vadd.xlane.f32.xlu1 %v886_v61  ;;  %v892_v63 = vpop.permute.xlu1 %891 }
 0x410   : > { %3162 = vpow2.f32 %v1214_v60  ;;  %v1378_v1 = vsub.f32 %v1372_v48, %v1377_v62  ;;  %2935 = vmatpush3.msra.mxu1 %v892_v63  ;;  %v1589_v60 = vld [vmem:[%s3699_s11 + $0x8] sm:$0xff]  ;;  %v1668_v62 = vld [vmem:[%s3700_s12 + $0x10] sm:$0xff]  ;;  %v1669_v63 = vld [vmem:[%s3700_s12 + $0x18] sm:$0xff] }
 0x411   : > { %v3161_v2 = vpop.eup %3160  ;;  %2944 = vmatprep.subr.mxu1 %v3206_v13 }
 0x412   : > { %v1379_v3 = vmul.f32 1.442695, %v1378_v1  ;;  %v1051_v4 = vsel %vm804_vm2, %v3161_v2, 0.0  ;;  %v3105_v1 = vpack.c.bf16 %v1669_v63, %v1668_v62 }
 0x413   : > { %1052 = vadd.xlane.f32.xlu0 %v1051_v4 }
 0x414   : > { %3164 = vpow2.f32 %v1379_v3  ;;  %v1591_v3 = vld [vmem:[%s3699_s11 + $0x18] sm:$0xff] }
 0x41a   : > { %v3163_v5 = vpop.eup %3162 }
 0x41b   : > { %v1216_v6 = vsel %vm804_vm2, %v3163_v5, 0.0 }
 0x41c   : > { %1217 = vadd.xlane.f32.xlu1 %v1216_v6 }
 0x41e   : > { %v3165_v7 = vpop.eup %3164 }
 0x41f   : > { %v1381_v8 = vsel %vm804_vm2, %v3165_v7, 0.0 }
 0x420   : > { %1382 = vadd.xlane.f32.xlu0 %v1381_v8 }
 0x42d   : > { %1221 = vrot.lane.b32.xlu1 %v3383_v24, %s3215_s4  ;;  %s3734_s4 = smov 120  }
 0x431   : > { %1386 = vrot.lane.b32.xlu1 %v3383_v24, %s3216_s3  ;;  %s3735_s3 = smov 112  }
 0x436   : > { %1056 = vrot.lane.b32.xlu0 %v3383_v24, %s3217_s28  ;;  %s3736_s28 = smov 104  }
 0x49c   : > { %v888_v9 = vpop.xlane.xlu1 %887 }
 0x49d   : > { %3166 = vrcp.f32 %v888_v9 }
 0x4a0   : > { %v1053_v11 = vpop.xlane.xlu0 %1052 }
 0x4a1   : > { %3168 = vrcp.f32 %v1053_v11  ;;  %v2820_v11 = vld [vmem:[%s3697_s9] ss:$0 sm:$0xff] }
 0x4a7   : > { %v3167_v12 = vpop.eup %3166 }
 0x4a8   : > { %v890_v14 = vmul.f32 %v3167_v12, %v3159_v59  ;;  %v1588_v59 = vld [vmem:[%s3699_s11] sm:$0xff] }
 0x4a9   : > { %v1218_v15 = vpop.xlane.xlu1 %1217  ;;  %v3096_v61 = vpack.c.bf16 %v1589_v60, %v1588_v59 }
 0x4aa   : > { %3170 = vrcp.f32 %v1218_v15  ;;  %2937 = vmatmul.mubr.msk.f32.vlgmr.msra.gmra.mrb[4].mxu1 %vm804_vm2, %v890_v14  ;;  %v2821_v14 = vld [vmem:[%s3698_s10] ss:$0 sm:$0xff] }
 0x4ab   : > { %2946 = vmatprep.mubr.msk.f32.mxu1 %vm3205_vm1, %v3206_v13  ;;  %v3169_v17 = vpop.eup %3168 }
 0x4ac   : > { %v1055_v18 = vmul.f32 %v3169_v17, %v3161_v2  ;;  %v1590_v2 = vld [vmem:[%s3699_s11 + $0x10] sm:$0xff] }
 0x4ad   : > { %v1383_v16 = vpop.xlane.xlu0 %1382  ;;  %v1222_v19 = vpop.permute.xlu1 %1221  ;;  %v3099_v4 = vpack.c.bf16 %v1591_v3, %v1590_v2 }
 0x4ae   : > { %3172 = vrcp.f32 %v1383_v16 }
 0x4b1   : > { %v1057_v20 = vpop.permute.xlu0 %1056  ;;  %v1387_v23 = vpop.permute.xlu1 %1386 }
 0x4b2   : > { %2945 = vmatpush3.msra.mxu1 %v1057_v20 }
 0x4b3   : > { %2947 = vmatmul.mubr.msk.f32.vlgmr.msra.gmra.mrb[6].mxu1 %vm804_vm2, %v1055_v18  ;;  %2954 = vmatprep.subr.mxu1 %v3206_v13 }
 0x4b4   : > { %v3171_v21 = vpop.eup %3170  ;;  %2955 = vmatpush3.msra.mxu1 %v1222_v19  ;;  %2956 = vmatprep.mubr.msk.f32.mxu1 %vm3205_vm1, %v3206_v13 }
 0x4b5   : > { %v1220_v22 = vmul.f32 %v3171_v21, %v3163_v5  ;;  %2964 = vmatprep.subr.mxu1 %v3206_v13  ;;  %v684_v5 = vld [vmem:[%s675_s5] sm:$0xff] }
 0x4b7   : > { %2957 = vmatmul.mubr.msk.f32.vlgmr.msra.gmra.mrb[8].mxu1 %vm804_vm2, %v1220_v22 }
 0x4b8   : > { %v3173_v24 = vpop.eup %3172  ;;  %2965 = vmatpush3.msra.mxu1 %v1387_v23  ;;  %2966 = vmatprep.mubr.msk.f32.mxu1 %vm3205_vm1, %v3206_v13 }
 0x4b9   : > { %v1385_v25 = vmul.f32 %v3173_v24, %v3165_v7  ;;  %3095 = vmatprep.subr.bf16.mxu1 %v3204_v10 }
 0x4bb   : > { %2967 = vmatmul.mubr.msk.f32.vlgmr.msra.gmra.mrb[10].mxu1 %vm804_vm2, %v1385_v25 }
 0x4bc   : > { %2988 = vmatprep.mubr.msk.f32.mxu1 %vm3205_vm1, %v3206_v13  ;;  %3097 = vmatpush3.bf16.msra.mxu1 %v3096_v61 }
 0x4bd   : > { %3098 = vmatprep.subr.bf16.mxu1 %v3204_v10 }
 0x4c0   : > { %3100 = vmatpush3.bf16.msra.mxu1 %v3099_v4 }
 0x4c1   : > { %3002 = vmatprep.subr.mxu1 %v3206_v13 }
 0x57d   : > { %v963_v29 = vpop.f32.mrb[4].mxu1 }
 0x57e   : > { %v2938_v30 = vpop.f32.mrb[5].mxu1 }
 0x586   : > { %v1128_v34 = vpop.f32.mrb[6].mxu1 }
 0x587   : > { %1463 = vrot.lane.b32.xlu0 %v1128_v34, %s3715_s29  ;;  %v2948_v35 = vpop.f32.mrb[7].mxu1  ;;  %s3737_s29 = sld [smem:[#allocation5_spill]] }
 0x58a   : > { %v1293_v36 = vpop.f32.mrb[8].mxu1 }
 0x58b   : > { %1467 = vrot.lane.b32.xlu1 %v1293_v36, %s3714_s0  ;;  %v2958_v37 = vpop.f32.mrb[9].mxu1 }
 0x58d   : > { %s678_s0 = scalar_lea.vmem %s3737_s29, %s3746_s25  ;;  %s3738_s25 = smov 88  }
 0x58e   : > { %v1458_v38 = vpop.f32.mrb[10].mxu1  ;;  %v2824_v28 = vld [vmem:[%s678_s0] ss:$0 sm:$0xff]  ;;  %s3742_s0 = smov 8  }
 0x58f   : > { %1471 = vrot.lane.b32.xlu0 %v1458_v38, %s3713_s1  ;;  %v2968_v39 = vpop.f32.mrb[11].mxu1 }
 0x5f9   : > { %v1464_v40 = vpop.permute.xlu0 %1463 }
 0x5fa   : > { %v1474_v42 = vsel %vm804_vm2, %v963_v29, %v1464_v40 }
 0x5fd   : > { %v1468_v41 = vpop.permute.xlu1 %1467 }
 0x5fe   : > { %v1476_v43 = vsel %vm1475_vm3, %v1474_v42, %v1468_v41 }
 0x601   : > { %v1472_v44 = vpop.permute.xlu0 %1471 }
 0x602   : > { %v1478_v45 = vsel %vm1477_vm4, %v1476_v43, %v1472_v44 }
 0x603   : > { %2978 = vmatmul.mubr.msk.f32.vlgmr.msra.gmra.mrb[6].mxu0 %vm689_vm0, %v1478_v45 }
 0x604   : > { %2999 = vmatprep.mubr.msk.f32.mxu0 %vm3205_vm1, %v3206_v13 }
 0x6d6   : > { %v1554_v47 = vpop.f32.mrb[6].mxu0 }
 0x6d7   : > { %v1555_v48 = vadd.f32 %v2818_v46, %v1554_v47  ;;  %v2979_v49 = vpop.f32.mrb[7].mxu0 }
 0x6d9   : > { %v3475_v50 = vadd.f32 %v1555_v48, %v3348_v0  ;;  %v1667_v0 = vld [vmem:[%s3700_s12 + $0x8] sm:$0xff] }
 0x6da   : > { %v3102_v58 = vpack.c.bf16 %v1667_v0, %v1666_v57 }
 0x6db   : > { %v1561_v51 = vsel %vm689_vm0, %v3475_v50, 0.0 }
 0x6dc   : > { %1562 = vadd.xlane.f32.xlu1 %v1561_v51  ;;  %3103 = vmatpush3.bf16.msra.mxu0 %v3102_v58 }
 0x6dd   : > { %3104 = vmatprep.subr.bf16.mxu0 %v3204_v10 }
 0x6e0   : > { %3106 = vmatpush3.bf16.msra.mxu0 %v3105_v1 }
 0x6e1   : > { %3012 = vmatprep.subr.mxu0 %v3206_v13 }
 0x6e3   : > { %3000 = vmatmul.mubr.msk.f32.vlgmr.msra.gmra.mrb[8].mxu0 %vm689_vm0, %v684_v5 }
 0x6e4   : > { %3014 = vmatprep.mubr.msk.f32.mxu0 %vm3205_vm1, %v3206_v13 }
 0x769   : > { %v1563_v52 = vpop.xlane.xlu1 %1562 }
 0x76a   : > { %v1564_v53 = vmul.f32 0.03125, %v1563_v52 }
 0x76c   : > { %v1565_v54 = vsub.f32 %v3475_v50, %v1564_v53 }
 0x76e   : > { %v1566_v55 = vmul.f32 %v1565_v54, %v1565_v54 }
 0x770   : > { %v1567_v56 = vsel %vm689_vm0, %v1566_v55, 0.0 }
 0x771   : > { %1568 = vadd.xlane.f32.xlu0 %v1567_v56 }
 0x7b6   : > { %v3525_v17 = vpop.f32.mrb[8].mxu0 }
 0x7b7   : > { %1919 = vrot.lane.b32.xlu0 %v3525_v17, %s3734_s4  ;;  %v3001_v18 = vpop.f32.mrb[9].mxu0 }
 0x7fe   : > { %v1569_v6 = vpop.xlane.xlu0 %1568 }
 0x7ff   : > { %v1570_v7 = vmul.f32 0.03125, %v1569_v6 }
 0x801   : > { %v1571_v8 = vadd.f32 1e-05, %v1570_v7 }
 0x803   : > { %3174 = vrsqrt.f32 %v1571_v8 }
 0x80d   : > { %v3175_v9 = vpop.eup %3174 }
 0x80e   : > { %v1573_v12 = vmul.f32 %v3175_v9, %v1565_v54 }
 0x810   : > { %v1580_v15 = vmul.f32 %v2820_v11, %v1573_v12 }
 0x812   : > { %v1587_v16 = vadd.f32 %v2821_v14, %v1580_v15 }
 0x814   : > { %2989 = vmatmul.mubr.msk.f32.vlgmr.msra.gmra.mrb[12].mxu1 %vm689_vm0, %v1587_v16 }
 0x815   : > { %3004 = vmatprep.mubr.msk.f32.mxu1 %vm3205_vm1, %v3206_v13  ;;  %3003 = vmatpush3.xpose.msk.msra.mxu1 %vm804_vm2, %v3525_v17 }
 0x816   : > { %3007 = vmatprep.subr.mxu1 %v3206_v13 }
 0x829   : > { %v1920_v19 = vpop.permute.xlu0 %1919 }
 0x82a   : > { %3013 = vmatpush3.xpose.msk.msra.mxu0 %vm804_vm2, %v1920_v19 }
 0x82b   : > { %3022 = vmatprep.subr.mxu0 %v3206_v13 }
 0x8e7   : > { %v1661_v20 = vpop.f32.mrb[12].mxu1 }
 0x8e8   : > { %v1665_v21 = vmul.f32 0.35355338, %v1661_v20  ;;  %v2990_v22 = vpop.f32.mrb[13].mxu1 }
 0x8e9   : > { %v1743_v22 = vld [vmem:[%s3701_s13] sm:$0xff] }
 0x8ea   : > { %2082 = vrot.lane.b32.xlu0 %v1665_v21, %s3735_s3  ;;  %1917 = vrot.lane.b32.xlu1 %v1665_v21, %s3734_s4 }
 0x8eb   : > { %3005 = vmatmul.mubr.msk.f32.vlgmr.msra.gmra.mrb[14].mxu1 %vm804_vm2, %v1665_v21 }
 0x8ec   : > { %3009 = vmatprep.mubr.msk.f32.mxu1 %vm3205_vm1, %v3206_v13 }
 0x8ee   : > { %2247 = vrot.lane.b32.xlu0 %v1665_v21, %s3736_s28  ;;  %2084 = vrot.lane.b32.xlu1 %v3525_v17, %s3735_s3 }
 0x8f2   : > { %2249 = vrot.lane.b32.xlu1 %v3525_v17, %s3736_s28 }
 0x95c   : > { %v1918_v23 = vpop.permute.xlu1 %1917  ;;  %v2083_v25 = vpop.permute.xlu0 %2082 }
 0x95d   : > { %3015 = vmatmul.mubr.msk.f32.vlgmr.msra.gmra.mrb[10].mxu0 %vm804_vm2, %v1918_v23  ;;  %v1744_v23 = vld [vmem:[%s3701_s13 + $0x8] sm:$0xff] }
 0x95e   : > { %3024 = vmatprep.mubr.msk.f32.mxu0 %vm3205_vm1, %v3206_v13 }
 0x960   : > { %v2085_v24 = vpop.permute.xlu1 %2084  ;;  %v2248_v27 = vpop.permute.xlu0 %2247 }
 0x961   : > { %3023 = vmatpush3.xpose.msk.msra.mxu0 %vm804_vm2, %v2085_v24  ;;  %v3108_v24 = vpack.c.bf16 %v1744_v23, %v1743_v22 }
 0x962   : > { %3032 = vmatprep.subr.mxu0 %v3206_v13 }
 0x964   : > { %3025 = vmatmul.mubr.msk.f32.vlgmr.msra.gmra.mrb[12].mxu0 %vm804_vm2, %v2083_v25  ;;  %v2250_v26 = vpop.permute.xlu1 %2249  ;;  %v1745_v25 = vld [vmem:[%s3701_s13 + $0x10] sm:$0xff] }
 0x965   : > { %3033 = vmatpush3.xpose.msk.msra.mxu0 %vm804_vm2, %v2250_v26  ;;  %3034 = vmatprep.mubr.msk.f32.mxu0 %vm3205_vm1, %v3206_v13  ;;  %v1746_v26 = vld [vmem:[%s3701_s13 + $0x18] sm:$0xff] }
 0x966   : > { %3107 = vmatprep.subr.bf16.mxu0 %v3204_v10 }
 0x968   : > { %3035 = vmatmul.mubr.msk.f32.vlgmr.msra.gmra.mrb[14].mxu0 %vm804_vm2, %v2248_v27  ;;  %v3111_v27 = vpack.c.bf16 %v1746_v26, %v1745_v25 }
 0x969   : > { %3050 = vmatprep.mubr.msk.f32.mxu0 %vm3205_vm1, %v3206_v13  ;;  %3109 = vmatpush3.bf16.msra.mxu0 %v3108_v24 }
 0x96a   : > { %3110 = vmatprep.subr.bf16.mxu0 %v3204_v10 }
 0x96d   : > { %3112 = vmatpush3.bf16.msra.mxu0 %v3111_v27 }
 0x96e   : > { %3119 = vmatprep.subr.bf16.mxu0 %v3204_v10 }
 0x9be   : > { %v1826_v29 = vpop.f32.mrb[14].mxu1 }
 0x9bf   : > { %v1827_v30 = vadd.f32 %v2824_v28, %v1826_v29  ;;  %v3006_v31 = vpop.f32.mrb[15].mxu1 }
 0x9c1   : > { %v1830_v32 = vsel %vm804_vm2, %v1827_v30, -inf }
 0x9c2   : > { %1831 = vmax.xlane.f32.xlu1 %v1830_v32 }
 0xa30   : > { %v1991_v33 = vpop.f32.mrb[10].mxu0 }
 0xa31   : > { %v1992_v34 = vadd.f32 %v2824_v28, %v1991_v33  ;;  %v3016_v35 = vpop.f32.mrb[11].mxu0 }
 0xa33   : > { %v1995_v36 = vsel %vm804_vm2, %v1992_v34, -inf }
 0xa34   : > { %1996 = vmax.xlane.f32.xlu0 %v1995_v36 }
 0xa37   : > { %v2156_v37 = vpop.f32.mrb[12].mxu0 }
 0xa38   : > { %v2157_v38 = vadd.f32 %v2824_v28, %v2156_v37  ;;  %v3026_v39 = vpop.f32.mrb[13].mxu0 }
 0xa3a   : > { %v2160_v40 = vsel %vm804_vm2, %v2157_v38, -inf }
 0xa3b   : > { %2161 = vmax.xlane.f32.xlu0 %v2160_v40  ;;  %v2321_v41 = vpop.f32.mrb[14].mxu0  ;;  %v2837_v40 = vld [vmem:[%s3702_s14] ss:$0 sm:$0xff] }
 0xa3c   : > { %v2322_v42 = vadd.f32 %v2824_v28, %v2321_v41  ;;  %v3036_v43 = vpop.f32.mrb[15].mxu0 }
 0xa3e   : > { %v2325_v44 = vsel %vm804_vm2, %v2322_v42, -inf }
 0xa3f   : > { %2326 = vmax.xlane.f32.xlu1 %v2325_v44 }
 0xa4f   : > { %v1832_v45 = vpop.xlane.xlu1 %1831 }
 0xa50   : > { %v1833_v46 = vsub.f32 %v1827_v30, %v1832_v45  ;;  %2006 = vrot.lane.b32.xlu1 %v3525_v17, %s3738_s25  ;;  %s3743_s25 = smov 16  }
 0xa52   : > { %v1834_v47 = vmul.f32 1.442695, %v1833_v46 }
 0xa54   : > { %3176 = vpow2.f32 %v1834_v47 }
 0xa5e   : > { %v3177_v48 = vpop.eup %3176 }
 0xa5f   : > { %v1836_v49 = vsel %vm804_vm2, %v3177_v48, 0.0 }
 0xa60   : > { %1837 = vadd.xlane.f32.xlu0 %v1836_v49 }
 0xa76   : > { %1841 = vrot.lane.b32.xlu0 %v3525_v17, %s3739_s23  ;;  %s3744_s23 = smov 24  }
 0xac1   : > { %v1997_v51 = vpop.xlane.xlu0 %1996 }
 0xac2   : > { %v1998_v52 = vsub.f32 %v1992_v34, %v1997_v51  ;;  %v2536_v51 = vld [vmem:[%s3705_s17] sm:$0xff] }
 0xac4   : > { %v1999_v53 = vmul.f32 1.442695, %v1998_v52 }
 0xac6   : > { %3178 = vpow2.f32 %v1999_v53  ;;  %v2538_v53 = vld [vmem:[%s3705_s17 + $0x10] sm:$0xff] }
 0xac8   : > { %v2162_v54 = vpop.xlane.xlu0 %2161 }
 0xac9   : > { %v2163_v55 = vsub.f32 %v2157_v38, %v2162_v54  ;;  %v2539_v54 = vld [vmem:[%s3705_s17 + $0x18] sm:$0xff] }
 0xacb   : > { %v2164_v56 = vmul.f32 1.442695, %v2163_v55  ;;  %v3117_v55 = vpack.c.bf16 %v2539_v54, %v2538_v53 }
 0xacc   : > { %v2327_v57 = vpop.xlane.xlu1 %2326 }
 0xacd   : > { %3180 = vpow2.f32 %v2164_v56  ;;  %v2328_v0 = vsub.f32 %v2322_v42, %v2327_v57 }
 0xacf   : > { %v2329_v58 = vmul.f32 1.442695, %v2328_v0 }
 0xad0   : > { %v3179_v59 = vpop.eup %3178  ;;  %v2007_v6 = vpop.permute.xlu1 %2006 }
 0xad1   : > { %3182 = vpow2.f32 %v2329_v58  ;;  %v2001_v60 = vsel %vm804_vm2, %v3179_v59, 0.0 }
 0xad2   : > { %2002 = vadd.xlane.f32.xlu1 %v2001_v60 }
 0xad7   : > { %v3181_v61 = vpop.eup %3180 }
 0xad8   : > { %v2166_v62 = vsel %vm804_vm2, %v3181_v61, 0.0 }
 0xad9   : > { %2167 = vadd.xlane.f32.xlu0 %v2166_v62 }
 0xadb   : > { %v3183_v63 = vpop.eup %3182 }
 0xadc   : > { %v2331_v1 = vsel %vm804_vm2, %v3183_v63, 0.0 }
 0xadd   : > { %2332 = vadd.xlane.f32.xlu1 %v2331_v1  ;;  %v2629_v1 = vld [vmem:[%s3707_s19] sm:$0xff] }
 0xaed   : > { %v1838_v2 = vpop.xlane.xlu0 %1837 }
 0xaee   : > { %3184 = vrcp.f32 %v1838_v2  ;;  %2171 = vrot.lane.b32.xlu1 %v3525_v17, %s3740_s22  ;;  %v2630_v2 = vld [vmem:[%s3707_s19 + $0x8] sm:$0xff] }
 0xaef   : > { %2336 = vrot.lane.b32.xlu0 %v3525_v17, %s3741_s24 }
 0xaf1   : > { %v1842_v3 = vpop.permute.xlu0 %1841 }
 0xaf2   : > { %3008 = vmatpush3.msra.mxu1 %v1842_v3  ;;  %v3120_v3 = vpack.c.bf16 %v2630_v2, %v2629_v1 }
 0xaf3   : > { %3017 = vmatprep.subr.mxu1 %v3206_v13 }
 0xaf8   : > { %v3185_v4 = vpop.eup %3184 }
 0xaf9   : > { %v1840_v5 = vmul.f32 %v3185_v4, %v3177_v48  ;;  %v2631_v4 = vld [vmem:[%s3707_s19 + $0x10] sm:$0xff] }
 0xafb   : > { %3010 = vmatmul.mubr.msk.f32.vlgmr.msra.gmra.mrb[16].mxu1 %vm804_vm2, %v1840_v5  ;;  %v2632_v5 = vld [vmem:[%s3707_s19 + $0x18] sm:$0xff] }
 0xafc   : > { %3018 = vmatpush3.msra.mxu1 %v2007_v6  ;;  %3019 = vmatprep.mubr.msk.f32.mxu1 %vm3205_vm1, %v3206_v13  ;;  %v3123_v6 = vpack.c.bf16 %v2632_v5, %v2631_v4 }
 0xafd   : > { %3027 = vmatprep.subr.mxu1 %v3206_v13 }
 0xb5f   : > { %v2003_v7 = vpop.xlane.xlu1 %2002 }
 0xb60   : > { %3186 = vrcp.f32 %v2003_v7  ;;  %v2633_v7 = vld [vmem:[%s3707_s19 + $0x20] sm:$0xff] }
 0xb66   : > { %v2168_v8 = vpop.xlane.xlu0 %2167 }
 0xb67   : > { %3188 = vrcp.f32 %v2168_v8  ;;  %v2634_v8 = vld [vmem:[%s3707_s19 + $0x28] sm:$0xff] }
 0xb6a   : > { %v3187_v9 = vpop.eup %3186  ;;  %v2333_v11 = vpop.xlane.xlu1 %2332 }
 0xb6b   : > { %v2005_v12 = vmul.f32 %v3187_v9, %v3179_v59  ;;  %3190 = vrcp.f32 %v2333_v11  ;;  %v2337_v17 = vpop.permute.xlu0 %2336  ;;  %v2839_v59 = vld [vmem:[%s3703_s15] ss:$0 sm:$0xff]  ;;  %v3126_v9 = vpack.c.bf16 %v2634_v8, %v2633_v7  ;;  %v2635_v11 = vld [vmem:[%s3707_s19 + $0x30] sm:$0xff] }
 0xb6d   : > { %3020 = vmatmul.mubr.msk.f32.vlgmr.msra.gmra.mrb[18].mxu1 %vm804_vm2, %v2005_v12  ;;  %v2636_v12 = vld [vmem:[%s3707_s19 + $0x38] sm:$0xff] }
 0xb6e   : > { %v2172_v14 = vpop.permute.xlu1 %2171  ;;  %3029 = vmatprep.mubr.msk.f32.mxu1 %vm3205_vm1, %v3206_v13 }
 0xb6f   : > { %3028 = vmatpush3.msra.mxu1 %v2172_v14  ;;  %v3129_v14 = vpack.c.bf16 %v2636_v12, %v2635_v11 }
 0xb70   : > { %3037 = vmatprep.subr.mxu1 %v3206_v13 }
 0xb71   : > { %v3189_v15 = vpop.eup %3188 }
 0xb72   : > { %v2170_v16 = vmul.f32 %v3189_v15, %v3181_v61  ;;  %v2840_v61 = vld [vmem:[%s3704_s16] ss:$0 sm:$0xff] }
 0xb73   : > { %v2841_v15 = vld [vmem:[%s3706_s18] ss:$0 sm:$0xff] }
 0xb74   : > { %3030 = vmatmul.mubr.msk.f32.vlgmr.msra.gmra.mrb[20].mxu1 %vm804_vm2, %v2170_v16 }
 0xb75   : > { %v3191_v18 = vpop.eup %3190  ;;  %3038 = vmatpush3.msra.mxu1 %v2337_v17  ;;  %3039 = vmatprep.mubr.msk.f32.mxu1 %vm3205_vm1, %v3206_v13 }
 0xb76   : > { %v2335_v19 = vmul.f32 %v3191_v18, %v3183_v63  ;;  %3113 = vmatprep.subr.bf16.mxu1 %v3204_v10 }
 0xb78   : > { %3040 = vmatmul.mubr.msk.f32.vlgmr.msra.gmra.mrb[22].mxu1 %vm804_vm2, %v2335_v19 }
 0xb79   : > { %3061 = vmatprep.mubr.msk.f32.mxu1 %vm3205_vm1, %v3206_v13 }
 0xbce   : > { %v1913_v20 = vpop.f32.mrb[16].mxu1 }
 0xbcf   : > { %v3011_v21 = vpop.f32.mrb[17].mxu1 }
 0xc40   : > { %v2078_v28 = vpop.f32.mrb[18].mxu1 }
 0xc41   : > { %2413 = vrot.lane.b32.xlu1 %v2078_v28, %s3742_s0  ;;  %v3021_v29 = vpop.f32.mrb[19].mxu1  ;;  %v2844_v28 = vld [vmem:[%s3708_s20] ss:$0 sm:$0xff]  ;;  %s682_s0 = scalar_lea.vmem %s3709_s21, %s3342_s26 }
 0xc47   : > { %v2243_v30 = vpop.f32.mrb[20].mxu1 }
 0xc48   : > { %2417 = vrot.lane.b32.xlu0 %v2243_v30, %s3743_s25  ;;  %v3031_v31 = vpop.f32.mrb[21].mxu1 }
 0xc4b   : > { %v2408_v32 = vpop.f32.mrb[22].mxu1 }
 0xc4c   : > { %2421 = vrot.lane.b32.xlu1 %v2408_v32, %s3744_s23  ;;  %v3041_v33 = vpop.f32.mrb[23].mxu1 }
 0xcb3   : > { %v2414_v34 = vpop.permute.xlu1 %2413 }
 0xcb4   : > { %v2424_v36 = vsel %vm804_vm2, %v1913_v20, %v2414_v34 }
 0xcba   : > { %v2418_v35 = vpop.permute.xlu0 %2417 }
 0xcbb   : > { %v2425_v37 = vsel %vm1475_vm3, %v2424_v36, %v2418_v35 }
 0xcbe   : > { %v2422_v38 = vpop.permute.xlu1 %2421 }
 0xcbf   : > { %v2426_v39 = vsel %vm1477_vm4, %v2425_v37, %v2422_v38 }
 0xcc0   : > { %3051 = vmatmul.mubr.msk.f32.vlgmr.msra.gmra.mrb[16].mxu0 %vm689_vm0, %v2426_v39 }
 0xcc1   : > { %3080 = vmatprep.mubr.msk.f32.mxu0 %vm3205_vm1, %v3206_v13  ;;  %3121 = vmatpush3.bf16.msra.mxu0 %v3120_v3 }
 0xcc2   : > { %3122 = vmatprep.subr.bf16.mxu0 %v3204_v10 }
 0xcc5   : > { %3124 = vmatpush3.bf16.msra.mxu0 %v3123_v6 }
 0xcc6   : > { %3125 = vmatprep.subr.bf16.mxu0 %v3204_v10 }
 0xcc9   : > { %3127 = vmatpush3.bf16.msra.mxu0 %v3126_v9 }
 0xcca   : > { %3128 = vmatprep.subr.bf16.mxu0 %v3204_v10 }
 0xccd   : > { %3130 = vmatpush3.bf16.msra.mxu0 %v3129_v14 }
 0xd93   : > { %v2502_v41 = vpop.f32.mrb[16].mxu0 }
 0xd94   : > { %v2503_v42 = vadd.f32 %v2837_v40, %v2502_v41  ;;  %v3052_v43 = vpop.f32.mrb[17].mxu0 }
 0xd96   : > { %v3620_v44 = vadd.f32 %v2503_v42, %v3475_v50  ;;  %v2537_v50 = vld [vmem:[%s3705_s17 + $0x8] sm:$0xff] }
 0xd97   : > { %v3114_v52 = vpack.c.bf16 %v2537_v50, %v2536_v51 }
 0xd98   : > { %v2509_v45 = vsel %vm689_vm0, %v3620_v44, 0.0 }
 0xd99   : > { %2510 = vadd.xlane.f32.xlu0 %v2509_v45  ;;  %3115 = vmatpush3.bf16.msra.mxu1 %v3114_v52 }
 0xd9a   : > { %3116 = vmatprep.subr.bf16.mxu1 %v3204_v10 }
 0xd9d   : > { %3118 = vmatpush3.bf16.msra.mxu1 %v3117_v55 }
 0xe26   : > { %v2511_v46 = vpop.xlane.xlu0 %2510 }
 0xe27   : > { %v2512_v47 = vmul.f32 0.03125, %v2511_v46 }
 0xe29   : > { %v2513_v48 = vsub.f32 %v3620_v44, %v2512_v47 }
 0xe2b   : > { %v2514_v49 = vmul.f32 %v2513_v48, %v2513_v48 }
 0xe2d   : > { %v2515_v13 = vsel %vm689_vm0, %v2514_v49, 0.0 }
 0xe2e   : > { %2516 = vadd.xlane.f32.xlu1 %v2515_v13 }
 0xebb   : > { %v2517_v56 = vpop.xlane.xlu1 %2516 }
 0xebc   : > { %v2518_v57 = vmul.f32 0.03125, %v2517_v56 }
 0xebe   : > { %v2519_v0 = vadd.f32 1e-05, %v2518_v57 }
 0xec0   : > { %3192 = vrsqrt.f32 %v2519_v0 }
 0xeca   : > { %v3193_v58 = vpop.eup %3192 }
 0xecb   : > { %v2521_v60 = vmul.f32 %v3193_v58, %v2513_v48 }
 0xecd   : > { %v2528_v62 = vmul.f32 %v2839_v59, %v2521_v60 }
 0xecf   : > { %v2535_v63 = vadd.f32 %v2840_v61, %v2528_v62 }
 0xed1   : > { %3062 = vmatmul.mubr.msk.f32.vlgmr.msra.gmra.mrb[24].mxu1 %vm689_vm0, %v2535_v63 }
 0xfa4   : > { %v2616_v16 = vpop.f32.mrb[24].mxu1 }
 0xfa5   : > { %v2617_v17 = vadd.f32 %v2841_v15, %v2616_v16  ;;  %v3063_v18 = vpop.f32.mrb[25].mxu1 }
 0xfa7   : > { %v2621_v19 = vmul.f32 0.044715, %v2617_v17  ;;  %v2620_v25 = vmul.f32 0.5, %v2617_v17 }
 0xfa9   : > { %v2622_v20 = vmul.f32 %v2621_v19, %v2617_v17 }
 0xfab   : > { %v2623_v21 = vmul.f32 %v2622_v20, %v2617_v17 }
 0xfad   : > { %v2624_v22 = vadd.f32 %v2623_v21, %v2617_v17 }
 0xfaf   : > { %v2625_v23 = vmul.f32 0.7978846, %v2624_v22 }
 0xfb1   : > { %3194 = vtanh.f32 %v2625_v23 }
 0xfbb   : > { %v3195_v24 = vpop.eup %3194 }
 0xfbc   : > { %v2627_v26 = vadd.f32 1.0, %v3195_v24 }
 0xfbe   : > { %v2628_v10 = vmul.f32 %v2627_v26, %v2620_v25 }
 0xfc0   : > { %3081 = vmatmul.mubr.msk.f32.vlgmr.msra.gmra.mrb[18].mxu0 %vm2637_vm5, %v2628_v10 }
0x1093   : > { %v2707_v27 = vpop.f32.mrb[18].mxu0 }
0x1094   : > { %v2711_v29 = vadd.f32 %v2707_v27, %v3620_v44  ;;  %v3082_v30 = vpop.f32.mrb[19].mxu0 }
0x1096   : > { %v2719_v31 = vadd.f32 %v2844_v28, %v2711_v29 }
0x1098   : > { %2720 = vst.msk [vmem:[%s682_s0] sm:$0xff] %vm689_vm0, %v2719_v31 }
0x1099 PF: > { %s31_s2 = sadd.s32 1, %s3202_s2  }
0x109a   : > { %p28_p4 = scmp.ge.s32.totalorder %s31_s2, 4  }
0x109c   :  { %30 = sbr.rel (!%p28_p4) target bundleno = 7 (0x7), region = 140 }

</bundles_post_ra>
